<compile_context>
chip_gen: v5e
topology: v5e:2x2
jax: 0.10.0
libtpu: 0.0.40
codegen_flags: <defaults>
</compile_context>

<pallas_src>
import functools
import math

import jax
import jax.numpy as jnp
import numpy as np
from jax.experimental import pallas as pl
from jax.experimental.pallas import tpu as pltpu

image_encoder_width = {
    'L': [40, 80, 192, 384],
    'S2': [32, 64, 144, 288],
    'S1': [32, 48, 120, 224],
    'S0': [32, 48, 96, 176],
}


# ----------------------------------------------------------------------------
# Hardware-aware knobs
# ----------------------------------------------------------------------------
def _vmem_budget_bytes():
    """Scoped-VMEM budget per generation: ~3/4 of physical VMEM.

    ~48 MiB on v7x (64 MiB physical), ~96 MiB on v5e/v6e (128 MiB physical).
    The headroom is for Mosaic internal scratch / pipeline bookkeeping.
    """
    phys = 64 << 20                      # conservative default (v7x per-core)
    try:
        phys = int(getattr(pltpu.get_tpu_info(), "vmem_capacity_bytes", phys))
    except Exception:
        pass
    return min((phys * 3) // 4, 100 << 20)


def _tensorcores_per_chip():
    """Best-effort TensorCore count (2 on v7x, 1 on v5e/v6e); defaults to 1."""
    try:
        info = pltpu.get_tpu_info()
        for name in ("num_cores", "tensorcores_per_chip", "num_tensorcores",
                     "core_count"):
            v = getattr(info, name, None)
            if isinstance(v, int) and v > 0:
                return min(v, 2)
    except Exception:
        pass
    return 1


# ----------------------------------------------------------------------------
# In-kernel helpers
# ----------------------------------------------------------------------------
def _eca_conv(pooled, taps_ref):
    """k-tap zero-padded 1-D conv over the channel (sublane) axis.

    pooled: (C, 1) f32 column; taps_ref: (k,) f32 in SMEM.  Computes
        out[i] = sum_j taps[j] * pooled[i + j - (k-1)//2]      (zero padded)
    i.e. PyTorch nn.Conv1d(1, 1, k, padding=(k-1)//2, bias=False) on the
    channel vector, expressed as k scalar*column FMAs on static sublane
    windows of a zero-extended column — no MXU, no O(C^2) band matrix, and
    the taps come from SMEM as scalars (no per-tap vector broadcasts).
    """
    k = taps_ref.shape[0]
    pad = (k - 1) // 2
    c = pooled.shape[0]
    if pad > 0:
        z = jnp.zeros((pad, 1), jnp.float32)
        padded = jnp.concatenate([z, pooled, z], axis=0)       # (C + 2*pad, 1)
    else:
        padded = pooled
    acc = taps_ref[0] * padded[0:c, :]
    for j in range(1, k):
        acc = acc + taps_ref[j] * padded[j:j + c, :]
    return acc


def _fuse_kernel(img_ref, rad_ref, scale_ref, bias_ref, timg_ref, trad_ref,
                 out_ref, *, cimg, inv_hw):
    """ECA(img) || ECA(radar) -> concat -> folded BN -> ReLU, one batch elem."""
    dt = out_ref.dtype

    # Global average pool over HW: f32 accumulation directly off the streamed
    # dtype (no full-block f32 copy is materialised).
    pooled_img = jnp.sum(img_ref[...], axis=-1, keepdims=True,
                         dtype=jnp.float32) * inv_hw            # (Cimg, 1)
    pooled_rad = jnp.sum(rad_ref[...], axis=-1, keepdims=True,
                         dtype=jnp.float32) * inv_hw            # (Crad, 1)

    # ECA channel conv + sigmoid on tiny (C,1) columns (sigmoid -> EUP).
    attn_img = jax.nn.sigmoid(_eca_conv(pooled_img, timg_ref))
    attn_rad = jax.nn.sigmoid(_eca_conv(pooled_rad, trad_ref))

    # Fold the inference-mode BN scale into the attention so the per-element
    # path is one FMA + ReLU in the streamed dtype (bf16 VALU on v6e/v7x).
    scale = scale_ref[...]                                      # (Ctot, 1) f32
    bias = bias_ref[...]
    s_img = (attn_img * scale[:cimg, :]).astype(dt)
    s_rad = (attn_rad * scale[cimg:, :]).astype(dt)
    b_img = bias[:cimg, :].astype(dt)
    b_rad = bias[cimg:, :].astype(dt)

    # Channel concat realised as two sublane-slab stores.  cimg is a multiple
    # of the bf16 sublane tile (16) for every configured width except
    # phi='S1' stage s4 (cimg=120), where the second store is masked but
    # still correct.
    out_ref[:cimg, :] = jnp.maximum(img_ref[...] * s_img + b_img, 0.0)
    out_ref[cimg:, :] = jnp.maximum(rad_ref[...] * s_rad + b_rad, 0.0)


def _apply_kernel(img_ref, rad_ref, s_ref, b_ref, out_ref, *, cimg):
    """Two-pass path: apply precomputed (attn*BN-scale, BN-bias) + ReLU to one
    HW chunk.  Grid is parallel over (batch, hw-chunks)."""
    dt = out_ref.dtype
    s = s_ref[...]                                              # (Ctot, 1) f32
    b = b_ref[...]
    out_ref[:cimg, :] = jnp.maximum(
        img_ref[...] * s[:cimg, :].astype(dt) + b[:cimg, :].astype(dt), 0.0)
    out_ref[cimg:, :] = jnp.maximum(
        rad_ref[...] * s[cimg:, :].astype(dt) + b[cimg:, :].astype(dt), 0.0)


# ----------------------------------------------------------------------------
# Plain-JAX helpers (two-pass prologue / numerical reference)
# ----------------------------------------------------------------------------
def _eca_conv_ref(pooled, taps):
    """Same conv as _eca_conv on a (B, C) f32 array (plain JAX)."""
    k = taps.shape[0]
    pad = (k - 1) // 2
    c = pooled.shape[1]
    pp = jnp.pad(pooled, ((0, 0), (pad, pad)))
    out = taps[0] * pp[:, 0:c]
    for j in range(1, k):
        out = out + taps[j] * pp[:, j:j + c]
    return out


def _eca_fuse_reference(img, rad, taps_img, taps_rad, bn_scale, bn_bias):
    """Pure-JAX f32 reference of one fused stage (for numerical checking)."""
    def eca(x, taps):
        pooled = x.mean(axis=(2, 3))                            # (B, C)
        attn = jax.nn.sigmoid(_eca_conv_ref(pooled, taps))
        return x * attn[:, :, None, None]
    cat = jnp.concatenate([eca(img, taps_img), eca(rad, taps_rad)], axis=1)
    out = cat * bn_scale[None, :, None, None] + bn_bias[None, :, None, None]
    return jnp.maximum(out, 0.0)


def _pick_hw_chunk(hw, row_bytes, max_block_bytes):
    """Largest lane-aligned chunk that splits hw into >=2 equal pieces whose
    double-buffered streaming block fits the VMEM budget."""
    if hw % 128 != 0:
        return None
    for n in (2, 4, 8, 16, 32, 64, 128):
        if hw % n != 0:
            continue
        chunk = hw // n
        if chunk % 128 != 0:
            continue
        if 2 * chunk * row_bytes <= max_block_bytes:
            return chunk
    return None


# ----------------------------------------------------------------------------
# Fused stage wrapper
# ----------------------------------------------------------------------------
def eca_fuse_stage(img_feat, rad_feat, taps_img, taps_rad, bn_scale, bn_bias,
                   *, force_two_pass=False):
    """Fused ECA + concat + folded-BN + ReLU.

    img_feat: (B, Cimg, H, W); rad_feat: (B, Crad, H, W)
    -> (B, Cimg+Crad, H, W) in img_feat's dtype.
    No wrapper-side HBM copies: reshapes are views, output is final-sized.
    """
    B, cimg, H, W = img_feat.shape
    crad = rad_feat.shape[1]
    hw = H * W
    ctot = cimg + crad
    io_dtype = img_feat.dtype
    if rad_feat.dtype != io_dtype:
        rad_feat = rad_feat.astype(io_dtype)

    img = img_feat.reshape(B, cimg, hw)              # no-copy views
    rad = rad_feat.reshape(B, crad, hw)
    scale_col = bn_scale.astype(jnp.float32).reshape(ctot, 1)
    bias_col = bn_bias.astype(jnp.float32).reshape(ctot, 1)
    taps_i = taps_img.astype(jnp.float32).reshape(-1)
    taps_r = taps_rad.astype(jnp.float32).reshape(-1)

    itemsize = jnp.dtype(io_dtype).itemsize
    budget = _vmem_budget_bytes()
    row_bytes = (cimg + crad + ctot) * itemsize
    single_pass_need = 2 * hw * row_bytes            # double-buffered streams

    use_two_pass = force_two_pass
    if not use_two_pass and single_pass_need > (budget * 4) // 5:
        use_two_pass = True                          # (C, HW) slab won't fit
    if (not use_two_pass and B == 1 and hw >= 1024
            and _tensorcores_per_chip() >= 2):
        use_two_pass = True                          # keep both v7x TCs busy
    chunk = None
    if use_two_pass:
        chunk = _pick_hw_chunk(hw, row_bytes, (budget * 4) // 5)
        if chunk is None:
            use_two_pass = False                     # best-effort single pass

    # TODO(synk): for stages whose HW << 128 (s5 / low-res s4) the lane axis is
    # mostly masked; a C-on-lanes layout variant would raise lane occupancy.

    if not use_two_pass:
        # ---- single pass: one read + one write, grid over batch ----
        kernel = functools.partial(_fuse_kernel, cimg=cimg, inv_hw=1.0 / hw)
        out = pl.pallas_call(
            kernel,
            out_shape=jax.ShapeDtypeStruct((B, ctot, hw), io_dtype),
            grid_spec=pltpu.PrefetchScalarGridSpec(
                num_scalar_prefetch=0,
                grid=(B,),
                in_specs=[
                    pl.BlockSpec((None, cimg, hw), lambda b: (b, 0, 0)),
                    pl.BlockSpec((None, crad, hw), lambda b: (b, 0, 0)),
                    pl.BlockSpec((ctot, 1), lambda b: (0, 0)),
                    pl.BlockSpec((ctot, 1), lambda b: (0, 0)),
                    pl.BlockSpec(memory_space=pltpu.MemorySpace.SMEM),
                    pl.BlockSpec(memory_space=pltpu.MemorySpace.SMEM),
                ],
                out_specs=pl.BlockSpec((None, ctot, hw), lambda b: (b, 0, 0)),
            ),
            compiler_params=pltpu.CompilerParams(
                dimension_semantics=("parallel",),
                vmem_limit_bytes=budget,
            ),
        )(img, rad, scale_col, bias_col, taps_i, taps_r)
    else:
        # ---- two passes: tiny pooled/attn prologue (XLA reduce, one extra
        # read) + an HW-tiled apply kernel parallel over (batch, hw-chunks) --
        pooled_img = jnp.mean(img, axis=-1, dtype=jnp.float32)   # (B, Cimg)
        pooled_rad = jnp.mean(rad, axis=-1, dtype=jnp.float32)   # (B, Crad)
        attn_img = jax.nn.sigmoid(_eca_conv_ref(pooled_img, taps_i))
        attn_rad = jax.nn.sigmoid(_eca_conv_ref(pooled_rad, taps_r))
        scale_f = scale_col[:, 0]
        s_full = jnp.concatenate(
            [attn_img * scale_f[None, :cimg], attn_rad * scale_f[None, cimg:]],
            axis=1)[..., None]                                   # (B, Ctot, 1)
        n_hw = hw // chunk
        kernel = functools.partial(_apply_kernel, cimg=cimg)
        out = pl.pallas_call(
            kernel,
            out_shape=jax.ShapeDtypeStruct((B, ctot, hw), io_dtype),
            grid_spec=pltpu.PrefetchScalarGridSpec(
                num_scalar_prefetch=0,
                grid=(B, n_hw),
                in_specs=[
                    pl.BlockSpec((None, cimg, chunk), lambda b, h: (b, 0, h)),
                    pl.BlockSpec((None, crad, chunk), lambda b, h: (b, 0, h)),
                    pl.BlockSpec((None, ctot, 1), lambda b, h: (b, 0, 0)),
                    pl.BlockSpec((ctot, 1), lambda b, h: (0, 0)),
                ],
                out_specs=pl.BlockSpec((None, ctot, chunk),
                                       lambda b, h: (b, 0, h)),
            ),
            compiler_params=pltpu.CompilerParams(
                dimension_semantics=("parallel", "parallel"),
                vmem_limit_bytes=budget,
            ),
        )(img, rad, s_full, bias_col)

    return out.reshape(B, ctot, H, W)                # no-copy view


# ----------------------------------------------------------------------------
# Glue: deterministic parameter construction & stand-in backbones
# ----------------------------------------------------------------------------
def eca_kernel_size(channel, b=1, gamma=2):
    t = int(abs((math.log(channel, 2) + b) / gamma))
    return t if t % 2 else t + 1


def fold_bn(gamma, beta, mean, var, eps=1e-5):
    scale = gamma / jnp.sqrt(var + eps)
    bias = beta - mean * scale
    return scale, bias


def stub_stage_features(x, proj_weights, strides, out_dtype=jnp.bfloat16):
    """TODO(synk): stand-in for GhostDualFPN / RCNet stage extractors."""
    feats = []
    for w, s in zip(proj_weights, strides):
        B, C, H, W = x.shape
        pooled = x.reshape(B, C, H // s, s, W // s, s).mean(axis=(3, 5))
        feats.append(jnp.einsum('oc,bchw->bohw', w, pooled).astype(out_dtype))
    return feats


def ir_encoder_forward(x, x_radar, params):
    """x, x_radar: NCHW. Returns ((p3, p4, p5), se_seg, lane_seg) like IREncoder."""
    map_s3, map_s4, map_s5 = stub_stage_features(
        x, params['img_proj'], strides=(8, 16, 32))
    rad_s3, rad_s4, rad_s5 = stub_stage_features(
        x_radar, params['rad_proj'], strides=(8, 16, 32))
    # TODO(synk): se_seg / lane_seg heads of GhostDualFPN not defined in source.
    se_seg_output = jnp.einsum('oc,bchw->bohw', params['se_head'], x)
    lane_seg_output = jnp.einsum('oc,bchw->bohw', params['lane_head'], x)

    outs = []
    for (img_f, rad_f, key) in ((map_s3, rad_s3, 's3'),
                                (map_s4, rad_s4, 's4'),
                                (map_s5, rad_s5, 's5')):
        outs.append(eca_fuse_stage(
            img_f, rad_f,
            params[key]['taps_img'], params[key]['taps_rad'],
            params[key]['bn_scale'], params[key]['bn_bias']))

    p3_fuse_out, p4_fuse_out, p5_fuse_out = outs
    return (p3_fuse_out, p4_fuse_out, p5_fuse_out), se_seg_output, lane_seg_output


def make_params(key, phi, num_class_seg, image_channels, radar_channels):
    widths = image_encoder_width[phi]
    cimgs = [widths[1], widths[2], widths[3]]            # stages 3, 4, 5
    crads = [c // 4 for c in cimgs]
    keys = jax.random.split(key, 32)
    ki = iter(range(32))

    params = {}
    params['img_proj'] = [
        0.1 * jax.random.normal(keys[next(ki)], (c, image_channels), jnp.float32)
        for c in cimgs]
    params['rad_proj'] = [
        0.1 * jax.random.normal(keys[next(ki)], (c, radar_channels), jnp.float32)
        for c in crads]
    params['se_head'] = 0.1 * jax.random.normal(
        keys[next(ki)], (num_class_seg, image_channels), jnp.float32)
    params['lane_head'] = 0.1 * jax.random.normal(
        keys[next(ki)], (2, image_channels), jnp.float32)

    for name, ci, cr in zip(('s3', 's4', 's5'), cimgs, crads):
        ct = ci + cr
        taps_img = jax.random.normal(
            keys[next(ki)], (eca_kernel_size(ci),), jnp.float32)
        taps_rad = jax.random.normal(
            keys[next(ki)], (eca_kernel_size(cr),), jnp.float32)
        gamma = 1.0 + 0.1 * jax.random.normal(keys[next(ki)], (ct,), jnp.float32)
        beta = 0.1 * jax.random.normal(keys[next(ki)], (ct,), jnp.float32)
        mean = 0.1 * jax.random.normal(keys[next(ki)], (ct,), jnp.float32)
        var = 0.5 + jax.random.uniform(keys[next(ki)], (ct,), jnp.float32)
        scale, bias = fold_bn(gamma, beta, mean, var)
        params[name] = dict(taps_img=taps_img, taps_rad=taps_rad,
                            bn_scale=scale, bn_bias=bias)
    return params


if __name__ == "__main__":
    key = jax.random.PRNGKey(0)
    k_x, k_r, k_p, k_c = jax.random.split(key, 4)

    B, image_channels, radar_channels = 2, 3, 3
    H = W = 64
    num_class_seg = 4
    phi = 'S0'

    x = jax.random.normal(k_x, (B, image_channels, H, W), jnp.float32)
    x_radar = jax.random.normal(k_r, (B, radar_channels, H, W), jnp.float32)
    params = make_params(k_p, phi, num_class_seg, image_channels, radar_channels)

    fwd = jax.jit(ir_encoder_forward)
    (p3, p4, p5), se_seg, lane_seg = fwd(x, x_radar, params)
    jax.block_until_ready((p3, p4, p5, se_seg, lane_seg))

    widths = image_encoder_width[phi]
    assert p3.shape == (B, widths[1] * 5 // 4, H // 8, W // 8)
    assert p4.shape == (B, widths[2] * 5 // 4, H // 16, W // 16)
    assert p5.shape == (B, widths[3] * 5 // 4, H // 32, W // 32)

    # ---- numerical check of the fused stage against a pure-JAX reference ----
    ci, cr = 32, 8
    keys = jax.random.split(k_c, 8)
    t_i = 0.3 * jax.random.normal(keys[2], (eca_kernel_size(ci),), jnp.float32)
    t_r = 0.3 * jax.random.normal(keys[3], (eca_kernel_size(cr),), jnp.float32)
    sc = 1.0 + 0.1 * jax.random.normal(keys[4], (ci + cr,), jnp.float32)
    bi = 0.1 * jax.random.normal(keys[5], (ci + cr,), jnp.float32)

    # single-pass path (grid over batch)
    img_t = jax.random.normal(keys[0], (2, ci, 8, 8), jnp.float32).astype(jnp.bfloat16)
    rad_t = jax.random.normal(keys[1], (2, cr, 8, 8), jnp.float32).astype(jnp.bfloat16)
    got_a = eca_fuse_stage(img_t, rad_t, t_i, t_r, sc, bi)
    ref_a = _eca_fuse_reference(img_t.astype(jnp.float32), rad_t.astype(jnp.float32),
                                t_i, t_r, sc, bi)

    # two-pass path (as used on v7x at batch 1 / oversized stages)
    img_t1 = jax.random.normal(keys[6], (1, ci, 16, 16), jnp.float32).astype(jnp.bfloat16)
    rad_t1 = jax.random.normal(keys[7], (1, cr, 16, 16), jnp.float32).astype(jnp.bfloat16)
    got_b = eca_fuse_stage(img_t1, rad_t1, t_i, t_r, sc, bi, force_two_pass=True)
    ref_b = _eca_fuse_reference(img_t1.astype(jnp.float32), rad_t1.astype(jnp.float32),
                                t_i, t_r, sc, bi)

    jax.block_until_ready((got_a, got_b))
    np.testing.assert_allclose(np.asarray(got_a, np.float32), np.asarray(ref_a),
                               rtol=5e-2, atol=5e-2)
    np.testing.assert_allclose(np.asarray(got_b, np.float32), np.asarray(ref_b),
                               rtol=5e-2, atol=5e-2)

    print("KERNEL_OK")
</pallas_src>

<mosaic_0001>
module attributes {stable_mosaic.version = 11 : i64} {
  func.func @_fuse_kernel(%arg0: i32, %arg1: memref<1x48x64xbf16, #tpu.memory_space<vmem>>, %arg2: memref<1x12x64xbf16, #tpu.memory_space<vmem>>, %arg3: memref<60x1xf32, #tpu.memory_space<vmem>>, %arg4: memref<60x1xf32, #tpu.memory_space<vmem>>, %arg5: memref<3xf32, #tpu.memory_space<smem>>, %arg6: memref<3xf32, #tpu.memory_space<smem>>, %arg7: memref<1x60x64xbf16, #tpu.memory_space<vmem>>) attributes {dimension_semantics = [#tpu.dimension_semantics<parallel>], iteration_bounds = array<i64: 2>, scalar_prefetch = 0 : i64, scratch_operands = 0 : i64, tpu.core_type = #tpu.core_type<tc>, window_params = [{transform_indices = @transform_0, window_bounds = array<i64: 1, 48, 64>}, {transform_indices = @transform_1, window_bounds = array<i64: 1, 12, 64>}, {pipeline_mode = #tpu.pipeline_mode<synchronous>, transform_indices = @transform_2, window_bounds = array<i64: 60, 1>}, {pipeline_mode = #tpu.pipeline_mode<synchronous>, transform_indices = @transform_3, window_bounds = array<i64: 60, 1>}, {transform_indices = @transform_4, window_bounds = array<i64: 3>}, {transform_indices = @transform_5, window_bounds = array<i64: 3>}, {transform_indices = @transform_6, window_bounds = array<i64: 1, 60, 64>}]} {
    %c0 = arith.constant 0 : index
    %c0_0 = arith.constant 0 : index
    %c0_1 = arith.constant 0 : index
    %0 = vector.load %arg1[%c0, %c0_0, %c0_1] : memref<1x48x64xbf16, #tpu.memory_space<vmem>>, vector<1x48x64xbf16>
    %1 = vector.shape_cast %0 : vector<1x48x64xbf16> to vector<48x64xbf16>
    %2 = arith.extf %1 : vector<48x64xbf16> to vector<48x64xf32>
    %cst = arith.constant dense<0.000000e+00> : vector<48xf32>
    %3 = vector.multi_reduction <add>, %2, %cst [1] : vector<48x64xf32> to vector<48xf32>
    %4 = vector.shape_cast %3 : vector<48xf32> to vector<48x1xf32>
    %cst_2 = arith.constant 1.562500e-02 : f32
    %5 = vector.broadcast %cst_2 : f32 to vector<48x1xf32>
    %6 = arith.mulf %4, %5 : vector<48x1xf32>
    %c0_3 = arith.constant 0 : index
    %c0_4 = arith.constant 0 : index
    %c0_5 = arith.constant 0 : index
    %7 = vector.load %arg2[%c0_3, %c0_4, %c0_5] : memref<1x12x64xbf16, #tpu.memory_space<vmem>>, vector<1x12x64xbf16>
    %8 = vector.shape_cast %7 : vector<1x12x64xbf16> to vector<12x64xbf16>
    %9 = arith.extf %8 : vector<12x64xbf16> to vector<12x64xf32>
    %cst_6 = arith.constant dense<0.000000e+00> : vector<12xf32>
    %10 = vector.multi_reduction <add>, %9, %cst_6 [1] : vector<12x64xf32> to vector<12xf32>
    %11 = vector.shape_cast %10 : vector<12xf32> to vector<12x1xf32>
    %cst_7 = arith.constant 1.562500e-02 : f32
    %12 = vector.broadcast %cst_7 : f32 to vector<12x1xf32>
    %13 = arith.mulf %11, %12 : vector<12x1xf32>
    %cst_8 = arith.constant 0.000000e+00 : f32
    %14 = vector.broadcast %cst_8 : f32 to vector<1x1xf32>
    %15 = tpu.concatenate %14, %6, %14 in 0 : vector<1x1xf32>, vector<48x1xf32>, vector<1x1xf32> -> vector<50x1xf32>
    %c0_9 = arith.constant 0 : index
    %16 = memref.load %arg5[%c0_9] : memref<3xf32, #tpu.memory_space<smem>>
    %17 = vector.extract_strided_slice %15 {offsets = [0, 0], sizes = [48, 1], strides = [1, 1]} : vector<50x1xf32> to vector<48x1xf32>
    %18 = vector.broadcast %16 : f32 to vector<48x1xf32>
    %19 = arith.mulf %18, %17 : vector<48x1xf32>
    %c1 = arith.constant 1 : index
    %20 = memref.load %arg5[%c1] : memref<3xf32, #tpu.memory_space<smem>>
    %21 = vector.extract_strided_slice %15 {offsets = [1, 0], sizes = [48, 1], strides = [1, 1]} : vector<50x1xf32> to vector<48x1xf32>
    %22 = vector.broadcast %20 : f32 to vector<48x1xf32>
    %23 = arith.mulf %22, %21 : vector<48x1xf32>
    %24 = arith.addf %19, %23 : vector<48x1xf32>
    %c2 = arith.constant 2 : index
    %25 = memref.load %arg5[%c2] : memref<3xf32, #tpu.memory_space<smem>>
    %26 = vector.extract_strided_slice %15 {offsets = [2, 0], sizes = [48, 1], strides = [1, 1]} : vector<50x1xf32> to vector<48x1xf32>
    %27 = vector.broadcast %25 : f32 to vector<48x1xf32>
    %28 = arith.mulf %27, %26 : vector<48x1xf32>
    %29 = arith.addf %24, %28 : vector<48x1xf32>
    %30 = arith.negf %29 : vector<48x1xf32>
    %31 = math.exp %30 : vector<48x1xf32>
    %cst_10 = arith.constant 1.000000e+00 : f32
    %32 = vector.broadcast %cst_10 : f32 to vector<48x1xf32>
    %33 = arith.addf %32, %31 : vector<48x1xf32>
    %34 = arith.divf %32, %33 : vector<48x1xf32>
    %cst_11 = arith.constant 0.000000e+00 : f32
    %35 = vector.broadcast %cst_11 : f32 to vector<1x1xf32>
    %36 = tpu.concatenate %35, %13, %35 in 0 : vector<1x1xf32>, vector<12x1xf32>, vector<1x1xf32> -> vector<14x1xf32>
    %c0_12 = arith.constant 0 : index
    %37 = memref.load %arg6[%c0_12] : memref<3xf32, #tpu.memory_space<smem>>
    %38 = vector.extract_strided_slice %36 {offsets = [0, 0], sizes = [12, 1], strides = [1, 1]} : vector<14x1xf32> to vector<12x1xf32>
    %39 = vector.broadcast %37 : f32 to vector<12x1xf32>
    %40 = arith.mulf %39, %38 : vector<12x1xf32>
    %c1_13 = arith.constant 1 : index
    %41 = memref.load %arg6[%c1_13] : memref<3xf32, #tpu.memory_space<smem>>
    %42 = vector.extract_strided_slice %36 {offsets = [1, 0], sizes = [12, 1], strides = [1, 1]} : vector<14x1xf32> to vector<12x1xf32>
    %43 = vector.broadcast %41 : f32 to vector<12x1xf32>
    %44 = arith.mulf %43, %42 : vector<12x1xf32>
    %45 = arith.addf %40, %44 : vector<12x1xf32>
    %c2_14 = arith.constant 2 : index
    %46 = memref.load %arg6[%c2_14] : memref<3xf32, #tpu.memory_space<smem>>
    %47 = vector.extract_strided_slice %36 {offsets = [2, 0], sizes = [12, 1], strides = [1, 1]} : vector<14x1xf32> to vector<12x1xf32>
    %48 = vector.broadcast %46 : f32 to vector<12x1xf32>
    %49 = arith.mulf %48, %47 : vector<12x1xf32>
    %50 = arith.addf %45, %49 : vector<12x1xf32>
    %51 = arith.negf %50 : vector<12x1xf32>
    %52 = math.exp %51 : vector<12x1xf32>
    %cst_15 = arith.constant 1.000000e+00 : f32
    %53 = vector.broadcast %cst_15 : f32 to vector<12x1xf32>
    %54 = arith.addf %53, %52 : vector<12x1xf32>
    %55 = arith.divf %53, %54 : vector<12x1xf32>
    %c0_16 = arith.constant 0 : index
    %c0_17 = arith.constant 0 : index
    %56 = vector.load %arg3[%c0_16, %c0_17] : memref<60x1xf32, #tpu.memory_space<vmem>>, vector<60x1xf32>
    %c0_18 = arith.constant 0 : index
    %c0_19 = arith.constant 0 : index
    %57 = vector.load %arg4[%c0_18, %c0_19] : memref<60x1xf32, #tpu.memory_space<vmem>>, vector<60x1xf32>
    %58 = vector.extract_strided_slice %56 {offsets = [0, 0], sizes = [48, 1], strides = [1, 1]} : vector<60x1xf32> to vector<48x1xf32>
    %59 = arith.mulf %34, %58 : vector<48x1xf32>
    %60 = arith.truncf %59 : vector<48x1xf32> to vector<48x1xbf16>
    %61 = vector.extract_strided_slice %56 {offsets = [48, 0], sizes = [12, 1], strides = [1, 1]} : vector<60x1xf32> to vector<12x1xf32>
    %62 = arith.mulf %55, %61 : vector<12x1xf32>
    %63 = arith.truncf %62 : vector<12x1xf32> to vector<12x1xbf16>
    %64 = vector.extract_strided_slice %57 {offsets = [0, 0], sizes = [48, 1], strides = [1, 1]} : vector<60x1xf32> to vector<48x1xf32>
    %65 = arith.truncf %64 : vector<48x1xf32> to vector<48x1xbf16>
    %66 = vector.extract_strided_slice %57 {offsets = [48, 0], sizes = [12, 1], strides = [1, 1]} : vector<60x1xf32> to vector<12x1xf32>
    %67 = arith.truncf %66 : vector<12x1xf32> to vector<12x1xbf16>
    %c0_20 = arith.constant 0 : index
    %c0_21 = arith.constant 0 : index
    %c0_22 = arith.constant 0 : index
    %68 = vector.load %arg1[%c0_20, %c0_21, %c0_22] : memref<1x48x64xbf16, #tpu.memory_space<vmem>>, vector<1x48x64xbf16>
    %69 = vector.shape_cast %68 : vector<1x48x64xbf16> to vector<48x64xbf16>
    %70 = vector.broadcast %60 : vector<48x1xbf16> to vector<48x64xbf16>
    %71 = arith.mulf %69, %70 : vector<48x64xbf16>
    %72 = vector.broadcast %65 : vector<48x1xbf16> to vector<48x64xbf16>
    %73 = arith.addf %71, %72 : vector<48x64xbf16>
    %cst_23 = arith.constant 0.000000e+00 : bf16
    %74 = vector.broadcast %cst_23 : bf16 to vector<48x64xbf16>
    %75 = arith.maximumf %73, %74 : vector<48x64xbf16>
    %c0_24 = arith.constant 0 : index
    %c0_25 = arith.constant 0 : index
    %c0_26 = arith.constant 0 : index
    %76 = vector.load %arg7[%c0_24, %c0_25, %c0_26] : memref<1x60x64xbf16, #tpu.memory_space<vmem>>, vector<1x48x64xbf16>
    %77 = vector.shape_cast %76 : vector<1x48x64xbf16> to vector<48x64xbf16>
    %78 = vector.shape_cast %75 : vector<48x64xbf16> to vector<1x48x64xbf16>
    tpu.vector_store %arg7[%c0_24, %c0_25, %c0_26], %78 {strides = array<i32>} : memref<1x60x64xbf16, #tpu.memory_space<vmem>>, vector<1x48x64xbf16>,
    %c0_27 = arith.constant 0 : index
    %c0_28 = arith.constant 0 : index
    %c0_29 = arith.constant 0 : index
    %79 = vector.load %arg2[%c0_27, %c0_28, %c0_29] : memref<1x12x64xbf16, #tpu.memory_space<vmem>>, vector<1x12x64xbf16>
    %80 = vector.shape_cast %79 : vector<1x12x64xbf16> to vector<12x64xbf16>
    %81 = vector.broadcast %63 : vector<12x1xbf16> to vector<12x64xbf16>
    %82 = arith.mulf %80, %81 : vector<12x64xbf16>
    %83 = vector.broadcast %67 : vector<12x1xbf16> to vector<12x64xbf16>
    %84 = arith.addf %82, %83 : vector<12x64xbf16>
    %cst_30 = arith.constant 0.000000e+00 : bf16
    %85 = vector.broadcast %cst_30 : bf16 to vector<12x64xbf16>
    %86 = arith.maximumf %84, %85 : vector<12x64xbf16>
    %c0_31 = arith.constant 0 : index
    %c48 = arith.constant 48 : index
    %c0_32 = arith.constant 0 : index
    %87 = vector.load %arg7[%c0_31, %c48, %c0_32] : memref<1x60x64xbf16, #tpu.memory_space<vmem>>, vector<1x12x64xbf16>
    %88 = vector.shape_cast %87 : vector<1x12x64xbf16> to vector<12x64xbf16>
    %89 = vector.shape_cast %86 : vector<12x64xbf16> to vector<1x12x64xbf16>
    tpu.vector_store %arg7[%c0_31, %c48, %c0_32], %89 {strides = array<i32>} : memref<1x60x64xbf16, #tpu.memory_space<vmem>>, vector<1x12x64xbf16>,
    return
  }
  func.func @transform_0(%arg0: i32) -> (i32, i32, i32) {
    %c0_i32 = arith.constant 0 : i32
    %c0_i32_0 = arith.constant 0 : i32
    %c0_i32_1 = arith.constant 0 : i32
    return %arg0, %c0_i32, %c0_i32_0 : i32, i32, i32
  }
  func.func @transform_1(%arg0: i32) -> (i32, i32, i32) {
    %c0_i32 = arith.constant 0 : i32
    %c0_i32_0 = arith.constant 0 : i32
    %c0_i32_1 = arith.constant 0 : i32
    return %arg0, %c0_i32, %c0_i32_0 : i32, i32, i32
  }
  func.func @transform_2(%arg0: i32) -> (i32, i32) {
    %c0_i32 = arith.constant 0 : i32
    %c0_i32_0 = arith.constant 0 : i32
    %c0_i32_1 = arith.constant 0 : i32
    return %c0_i32, %c0_i32_0 : i32, i32
  }
  func.func @transform_3(%arg0: i32) -> (i32, i32) {
    %c0_i32 = arith.constant 0 : i32
    %c0_i32_0 = arith.constant 0 : i32
    %c0_i32_1 = arith.constant 0 : i32
    return %c0_i32, %c0_i32_0 : i32, i32
  }
  func.func @transform_4(%arg0: i32) -> i32 {
    %c0_i32 = arith.constant 0 : i32
    %c0_i32_0 = arith.constant 0 : i32
    return %c0_i32 : i32
  }
  func.func @transform_5(%arg0: i32) -> i32 {
    %c0_i32 = arith.constant 0 : i32
    %c0_i32_0 = arith.constant 0 : i32
    return %c0_i32 : i32
  }
  func.func @transform_6(%arg0: i32) -> (i32, i32, i32) {
    %c0_i32 = arith.constant 0 : i32
    %c0_i32_0 = arith.constant 0 : i32
    %c0_i32_1 = arith.constant 0 : i32
    return %arg0, %c0_i32, %c0_i32_0 : i32, i32, i32
  }
}

module attributes {stable_mosaic.version = 11 : i64} {
  func.func @_fuse_kernel(%arg0: i32, %arg1: memref<1x96x16xbf16, #tpu.memory_space<vmem>>, %arg2: memref<1x24x16xbf16, #tpu.memory_space<vmem>>, %arg3: memref<120x1xf32, #tpu.memory_space<vmem>>, %arg4: memref<120x1xf32, #tpu.memory_space<vmem>>, %arg5: memref<3xf32, #tpu.memory_space<smem>>, %arg6: memref<3xf32, #tpu.memory_space<smem>>, %arg7: memref<1x120x16xbf16, #tpu.memory_space<vmem>>) attributes {dimension_semantics = [#tpu.dimension_semantics<parallel>], iteration_bounds = array<i64: 2>, scalar_prefetch = 0 : i64, scratch_operands = 0 : i64, tpu.core_type = #tpu.core_type<tc>, window_params = [{transform_indices = @transform_0, window_bounds = array<i64: 1, 96, 16>}, {transform_indices = @transform_1, window_bounds = array<i64: 1, 24, 16>}, {pipeline_mode = #tpu.pipeline_mode<synchronous>, transform_indices = @transform_2, window_bounds = array<i64: 120, 1>}, {pipeline_mode = #tpu.pipeline_mode<synchronous>, transform_indices = @transform_3, window_bounds = array<i64: 120, 1>}, {transform_indices = @transform_4, window_bounds = array<i64: 3>}, {transform_indices = @transform_5, window_bounds = array<i64: 3>}, {transform_indices = @transform_6, window_bounds = array<i64: 1, 120, 16>}]} {
    %c0 = arith.constant 0 : index
    %c0_0 = arith.constant 0 : index
    %c0_1 = arith.constant 0 : index
    %0 = vector.load %arg1[%c0, %c0_0, %c0_1] : memref<1x96x16xbf16, #tpu.memory_space<vmem>>, vector<1x96x16xbf16>
    %1 = vector.shape_cast %0 : vector<1x96x16xbf16> to vector<96x16xbf16>
    %2 = arith.extf %1 : vector<96x16xbf16> to vector<96x16xf32>
    %cst = arith.constant dense<0.000000e+00> : vector<96xf32>
    %3 = vector.multi_reduction <add>, %2, %cst [1] : vector<96x16xf32> to vector<96xf32>
    %4 = vector.shape_cast %3 : vector<96xf32> to vector<96x1xf32>
    %cst_2 = arith.constant 6.250000e-02 : f32
    %5 = vector.broadcast %cst_2 : f32 to vector<96x1xf32>
    %6 = arith.mulf %4, %5 : vector<96x1xf32>
    %c0_3 = arith.constant 0 : index
    %c0_4 = arith.constant 0 : index
    %c0_5 = arith.constant 0 : index
    %7 = vector.load %arg2[%c0_3, %c0_4, %c0_5] : memref<1x24x16xbf16, #tpu.memory_space<vmem>>, vector<1x24x16xbf16>
    %8 = vector.shape_cast %7 : vector<1x24x16xbf16> to vector<24x16xbf16>
    %9 = arith.extf %8 : vector<24x16xbf16> to vector<24x16xf32>
    %cst_6 = arith.constant dense<0.000000e+00> : vector<24xf32>
    %10 = vector.multi_reduction <add>, %9, %cst_6 [1] : vector<24x16xf32> to vector<24xf32>
    %11 = vector.shape_cast %10 : vector<24xf32> to vector<24x1xf32>
    %cst_7 = arith.constant 6.250000e-02 : f32
    %12 = vector.broadcast %cst_7 : f32 to vector<24x1xf32>
    %13 = arith.mulf %11, %12 : vector<24x1xf32>
    %cst_8 = arith.constant 0.000000e+00 : f32
    %14 = vector.broadcast %cst_8 : f32 to vector<1x1xf32>
    %15 = tpu.concatenate %14, %6, %14 in 0 : vector<1x1xf32>, vector<96x1xf32>, vector<1x1xf32> -> vector<98x1xf32>
    %c0_9 = arith.constant 0 : index
    %16 = memref.load %arg5[%c0_9] : memref<3xf32, #tpu.memory_space<smem>>
    %17 = vector.extract_strided_slice %15 {offsets = [0, 0], sizes = [96, 1], strides = [1, 1]} : vector<98x1xf32> to vector<96x1xf32>
    %18 = vector.broadcast %16 : f32 to vector<96x1xf32>
    %19 = arith.mulf %18, %17 : vector<96x1xf32>
    %c1 = arith.constant 1 : index
    %20 = memref.load %arg5[%c1] : memref<3xf32, #tpu.memory_space<smem>>
    %21 = vector.extract_strided_slice %15 {offsets = [1, 0], sizes = [96, 1], strides = [1, 1]} : vector<98x1xf32> to vector<96x1xf32>
    %22 = vector.broadcast %20 : f32 to vector<96x1xf32>
    %23 = arith.mulf %22, %21 : vector<96x1xf32>
    %24 = arith.addf %19, %23 : vector<96x1xf32>
    %c2 = arith.constant 2 : index
    %25 = memref.load %arg5[%c2] : memref<3xf32, #tpu.memory_space<smem>>
    %26 = vector.extract_strided_slice %15 {offsets = [2, 0], sizes = [96, 1], strides = [1, 1]} : vector<98x1xf32> to vector<96x1xf32>
    %27 = vector.broadcast %25 : f32 to vector<96x1xf32>
    %28 = arith.mulf %27, %26 : vector<96x1xf32>
    %29 = arith.addf %24, %28 : vector<96x1xf32>
    %30 = arith.negf %29 : vector<96x1xf32>
    %31 = math.exp %30 : vector<96x1xf32>
    %cst_10 = arith.constant 1.000000e+00 : f32
    %32 = vector.broadcast %cst_10 : f32 to vector<96x1xf32>
    %33 = arith.addf %32, %31 : vector<96x1xf32>
    %34 = arith.divf %32, %33 : vector<96x1xf32>
    %cst_11 = arith.constant 0.000000e+00 : f32
    %35 = vector.broadcast %cst_11 : f32 to vector<1x1xf32>
    %36 = tpu.concatenate %35, %13, %35 in 0 : vector<1x1xf32>, vector<24x1xf32>, vector<1x1xf32> -> vector<26x1xf32>
    %c0_12 = arith.constant 0 : index
    %37 = memref.load %arg6[%c0_12] : memref<3xf32, #tpu.memory_space<smem>>
    %38 = vector.extract_strided_slice %36 {offsets = [0, 0], sizes = [24, 1], strides = [1, 1]} : vector<26x1xf32> to vector<24x1xf32>
    %39 = vector.broadcast %37 : f32 to vector<24x1xf32>
    %40 = arith.mulf %39, %38 : vector<24x1xf32>
    %c1_13 = arith.constant 1 : index
    %41 = memref.load %arg6[%c1_13] : memref<3xf32, #tpu.memory_space<smem>>
    %42 = vector.extract_strided_slice %36 {offsets = [1, 0], sizes = [24, 1], strides = [1, 1]} : vector<26x1xf32> to vector<24x1xf32>
    %43 = vector.broadcast %41 : f32 to vector<24x1xf32>
    %44 = arith.mulf %43, %42 : vector<24x1xf32>
    %45 = arith.addf %40, %44 : vector<24x1xf32>
    %c2_14 = arith.constant 2 : index
    %46 = memref.load %arg6[%c2_14] : memref<3xf32, #tpu.memory_space<smem>>
    %47 = vector.extract_strided_slice %36 {offsets = [2, 0], sizes = [24, 1], strides = [1, 1]} : vector<26x1xf32> to vector<24x1xf32>
    %48 = vector.broadcast %46 : f32 to vector<24x1xf32>
    %49 = arith.mulf %48, %47 : vector<24x1xf32>
    %50 = arith.addf %45, %49 : vector<24x1xf32>
    %51 = arith.negf %50 : vector<24x1xf32>
    %52 = math.exp %51 : vector<24x1xf32>
    %cst_15 = arith.constant 1.000000e+00 : f32
    %53 = vector.broadcast %cst_15 : f32 to vector<24x1xf32>
    %54 = arith.addf %53, %52 : vector<24x1xf32>
    %55 = arith.divf %53, %54 : vector<24x1xf32>
    %c0_16 = arith.constant 0 : index
    %c0_17 = arith.constant 0 : index
    %56 = vector.load %arg3[%c0_16, %c0_17] : memref<120x1xf32, #tpu.memory_space<vmem>>, vector<120x1xf32>
    %c0_18 = arith.constant 0 : index
    %c0_19 = arith.constant 0 : index
    %57 = vector.load %arg4[%c0_18, %c0_19] : memref<120x1xf32, #tpu.memory_space<vmem>>, vector<120x1xf32>
    %58 = vector.extract_strided_slice %56 {offsets = [0, 0], sizes = [96, 1], strides = [1, 1]} : vector<120x1xf32> to vector<96x1xf32>
    %59 = arith.mulf %34, %58 : vector<96x1xf32>
    %60 = arith.truncf %59 : vector<96x1xf32> to vector<96x1xbf16>
    %61 = vector.extract_strided_slice %56 {offsets = [96, 0], sizes = [24, 1], strides = [1, 1]} : vector<120x1xf32> to vector<24x1xf32>
    %62 = arith.mulf %55, %61 : vector<24x1xf32>
    %63 = arith.truncf %62 : vector<24x1xf32> to vector<24x1xbf16>
    %64 = vector.extract_strided_slice %57 {offsets = [0, 0], sizes = [96, 1], strides = [1, 1]} : vector<120x1xf32> to vector<96x1xf32>
    %65 = arith.truncf %64 : vector<96x1xf32> to vector<96x1xbf16>
    %66 = vector.extract_strided_slice %57 {offsets = [96, 0], sizes = [24, 1], strides = [1, 1]} : vector<120x1xf32> to vector<24x1xf32>
    %67 = arith.truncf %66 : vector<24x1xf32> to vector<24x1xbf16>
    %c0_20 = arith.constant 0 : index
    %c0_21 = arith.constant 0 : index
    %c0_22 = arith.constant 0 : index
    %68 = vector.load %arg1[%c0_20, %c0_21, %c0_22] : memref<1x96x16xbf16, #tpu.memory_space<vmem>>, vector<1x96x16xbf16>
    %69 = vector.shape_cast %68 : vector<1x96x16xbf16> to vector<96x16xbf16>
    %70 = vector.broadcast %60 : vector<96x1xbf16> to vector<96x16xbf16>
    %71 = arith.mulf %69, %70 : vector<96x16xbf16>
    %72 = vector.broadcast %65 : vector<96x1xbf16> to vector<96x16xbf16>
    %73 = arith.addf %71, %72 : vector<96x16xbf16>
    %cst_23 = arith.constant 0.000000e+00 : bf16
    %74 = vector.broadcast %cst_23 : bf16 to vector<96x16xbf16>
    %75 = arith.maximumf %73, %74 : vector<96x16xbf16>
    %c0_24 = arith.constant 0 : index
    %c0_25 = arith.constant 0 : index
    %c0_26 = arith.constant 0 : index
    %76 = vector.load %arg7[%c0_24, %c0_25, %c0_26] : memref<1x120x16xbf16, #tpu.memory_space<vmem>>, vector<1x96x16xbf16>
    %77 = vector.shape_cast %76 : vector<1x96x16xbf16> to vector<96x16xbf16>
    %78 = vector.shape_cast %75 : vector<96x16xbf16> to vector<1x96x16xbf16>
    tpu.vector_store %arg7[%c0_24, %c0_25, %c0_26], %78 {strides = array<i32>} : memref<1x120x16xbf16, #tpu.memory_space<vmem>>, vector<1x96x16xbf16>,
    %c0_27 = arith.constant 0 : index
    %c0_28 = arith.constant 0 : index
    %c0_29 = arith.constant 0 : index
    %79 = vector.load %arg2[%c0_27, %c0_28, %c0_29] : memref<1x24x16xbf16, #tpu.memory_space<vmem>>, vector<1x24x16xbf16>
    %80 = vector.shape_cast %79 : vector<1x24x16xbf16> to vector<24x16xbf16>
    %81 = vector.broadcast %63 : vector<24x1xbf16> to vector<24x16xbf16>
    %82 = arith.mulf %80, %81 : vector<24x16xbf16>
    %83 = vector.broadcast %67 : vector<24x1xbf16> to vector<24x16xbf16>
    %84 = arith.addf %82, %83 : vector<24x16xbf16>
    %cst_30 = arith.constant 0.000000e+00 : bf16
    %85 = vector.broadcast %cst_30 : bf16 to vector<24x16xbf16>
    %86 = arith.maximumf %84, %85 : vector<24x16xbf16>
    %c0_31 = arith.constant 0 : index
    %c96 = arith.constant 96 : index
    %c0_32 = arith.constant 0 : index
    %87 = vector.load %arg7[%c0_31, %c96, %c0_32] : memref<1x120x16xbf16, #tpu.memory_space<vmem>>, vector<1x24x16xbf16>
    %88 = vector.shape_cast %87 : vector<1x24x16xbf16> to vector<24x16xbf16>
    %89 = vector.shape_cast %86 : vector<24x16xbf16> to vector<1x24x16xbf16>
    tpu.vector_store %arg7[%c0_31, %c96, %c0_32], %89 {strides = array<i32>} : memref<1x120x16xbf16, #tpu.memory_space<vmem>>, vector<1x24x16xbf16>,
    return
  }
  func.func @transform_0(%arg0: i32) -> (i32, i32, i32) {
    %c0_i32 = arith.constant 0 : i32
    %c0_i32_0 = arith.constant 0 : i32
    %c0_i32_1 = arith.constant 0 : i32
    return %arg0, %c0_i32, %c0_i32_0 : i32, i32, i32
  }
  func.func @transform_1(%arg0: i32) -> (i32, i32, i32) {
    %c0_i32 = arith.constant 0 : i32
    %c0_i32_0 = arith.constant 0 : i32
    %c0_i32_1 = arith.constant 0 : i32
    return %arg0, %c0_i32, %c0_i32_0 : i32, i32, i32
  }
  func.func @transform_2(%arg0: i32) -> (i32, i32) {
    %c0_i32 = arith.constant 0 : i32
    %c0_i32_0 = arith.constant 0 : i32
    %c0_i32_1 = arith.constant 0 : i32
    return %c0_i32, %c0_i32_0 : i32, i32
  }
  func.func @transform_3(%arg0: i32) -> (i32, i32) {
    %c0_i32 = arith.constant 0 : i32
    %c0_i32_0 = arith.constant 0 : i32
    %c0_i32_1 = arith.constant 0 : i32
    return %c0_i32, %c0_i32_0 : i32, i32
  }
  func.func @transform_4(%arg0: i32) -> i32 {
    %c0_i32 = arith.constant 0 : i32
    %c0_i32_0 = arith.constant 0 : i32
    return %c0_i32 : i32
  }
  func.func @transform_5(%arg0: i32) -> i32 {
    %c0_i32 = arith.constant 0 : i32
    %c0_i32_0 = arith.constant 0 : i32
    return %c0_i32 : i32
  }
  func.func @transform_6(%arg0: i32) -> (i32, i32, i32) {
    %c0_i32 = arith.constant 0 : i32
    %c0_i32_0 = arith.constant 0 : i32
    %c0_i32_1 = arith.constant 0 : i32
    return %arg0, %c0_i32, %c0_i32_0 : i32, i32, i32
  }
}

module attributes {stable_mosaic.version = 11 : i64} {
  func.func @_fuse_kernel(%arg0: i32, %arg1: memref<1x176x4xbf16, #tpu.memory_space<vmem>>, %arg2: memref<1x44x4xbf16, #tpu.memory_space<vmem>>, %arg3: memref<220x1xf32, #tpu.memory_space<vmem>>, %arg4: memref<220x1xf32, #tpu.memory_space<vmem>>, %arg5: memref<5xf32, #tpu.memory_space<smem>>, %arg6: memref<3xf32, #tpu.memory_space<smem>>, %arg7: memref<1x220x4xbf16, #tpu.memory_space<vmem>>) attributes {dimension_semantics = [#tpu.dimension_semantics<parallel>], iteration_bounds = array<i64: 2>, scalar_prefetch = 0 : i64, scratch_operands = 0 : i64, tpu.core_type = #tpu.core_type<tc>, window_params = [{transform_indices = @transform_0, window_bounds = array<i64: 1, 176, 4>}, {transform_indices = @transform_1, window_bounds = array<i64: 1, 44, 4>}, {pipeline_mode = #tpu.pipeline_mode<synchronous>, transform_indices = @transform_2, window_bounds = array<i64: 220, 1>}, {pipeline_mode = #tpu.pipeline_mode<synchronous>, transform_indices = @transform_3, window_bounds = array<i64: 220, 1>}, {transform_indices = @transform_4, window_bounds = array<i64: 5>}, {transform_indices = @transform_5, window_bounds = array<i64: 3>}, {transform_indices = @transform_6, window_bounds = array<i64: 1, 220, 4>}]} {
    %c0 = arith.constant 0 : index
    %c0_0 = arith.constant 0 : index
    %c0_1 = arith.constant 0 : index
    %0 = vector.load %arg1[%c0, %c0_0, %c0_1] : memref<1x176x4xbf16, #tpu.memory_space<vmem>>, vector<1x176x4xbf16>
    %1 = vector.shape_cast %0 : vector<1x176x4xbf16> to vector<176x4xbf16>
    %2 = arith.extf %1 : vector<176x4xbf16> to vector<176x4xf32>
    %cst = arith.constant dense<0.000000e+00> : vector<176xf32>
    %3 = vector.multi_reduction <add>, %2, %cst [1] : vector<176x4xf32> to vector<176xf32>
    %4 = vector.shape_cast %3 : vector<176xf32> to vector<176x1xf32>
    %cst_2 = arith.constant 2.500000e-01 : f32
    %5 = vector.broadcast %cst_2 : f32 to vector<176x1xf32>
    %6 = arith.mulf %4, %5 : vector<176x1xf32>
    %c0_3 = arith.constant 0 : index
    %c0_4 = arith.constant 0 : index
    %c0_5 = arith.constant 0 : index
    %7 = vector.load %arg2[%c0_3, %c0_4, %c0_5] : memref<1x44x4xbf16, #tpu.memory_space<vmem>>, vector<1x44x4xbf16>
    %8 = vector.shape_cast %7 : vector<1x44x4xbf16> to vector<44x4xbf16>
    %9 = arith.extf %8 : vector<44x4xbf16> to vector<44x4xf32>
    %cst_6 = arith.constant dense<0.000000e+00> : vector<44xf32>
    %10 = vector.multi_reduction <add>, %9, %cst_6 [1] : vector<44x4xf32> to vector<44xf32>
    %11 = vector.shape_cast %10 : vector<44xf32> to vector<44x1xf32>
    %cst_7 = arith.constant 2.500000e-01 : f32
    %12 = vector.broadcast %cst_7 : f32 to vector<44x1xf32>
    %13 = arith.mulf %11, %12 : vector<44x1xf32>
    %cst_8 = arith.constant 0.000000e+00 : f32
    %14 = vector.broadcast %cst_8 : f32 to vector<2x1xf32>
    %15 = tpu.concatenate %14, %6, %14 in 0 : vector<2x1xf32>, vector<176x1xf32>, vector<2x1xf32> -> vector<180x1xf32>
    %c0_9 = arith.constant 0 : index
    %16 = memref.load %arg5[%c0_9] : memref<5xf32, #tpu.memory_space<smem>>
    %17 = vector.extract_strided_slice %15 {offsets = [0, 0], sizes = [176, 1], strides = [1, 1]} : vector<180x1xf32> to vector<176x1xf32>
    %18 = vector.broadcast %16 : f32 to vector<176x1xf32>
    %19 = arith.mulf %18, %17 : vector<176x1xf32>
    %c1 = arith.constant 1 : index
    %20 = memref.load %arg5[%c1] : memref<5xf32, #tpu.memory_space<smem>>
    %21 = vector.extract_strided_slice %15 {offsets = [1, 0], sizes = [176, 1], strides = [1, 1]} : vector<180x1xf32> to vector<176x1xf32>
    %22 = vector.broadcast %20 : f32 to vector<176x1xf32>
    %23 = arith.mulf %22, %21 : vector<176x1xf32>
    %24 = arith.addf %19, %23 : vector<176x1xf32>
    %c2 = arith.constant 2 : index
    %25 = memref.load %arg5[%c2] : memref<5xf32, #tpu.memory_space<smem>>
    %26 = vector.extract_strided_slice %15 {offsets = [2, 0], sizes = [176, 1], strides = [1, 1]} : vector<180x1xf32> to vector<176x1xf32>
    %27 = vector.broadcast %25 : f32 to vector<176x1xf32>
    %28 = arith.mulf %27, %26 : vector<176x1xf32>
    %29 = arith.addf %24, %28 : vector<176x1xf32>
    %c3 = arith.constant 3 : index
    %30 = memref.load %arg5[%c3] : memref<5xf32, #tpu.memory_space<smem>>
    %31 = vector.extract_strided_slice %15 {offsets = [3, 0], sizes = [176, 1], strides = [1, 1]} : vector<180x1xf32> to vector<176x1xf32>
    %32 = vector.broadcast %30 : f32 to vector<176x1xf32>
    %33 = arith.mulf %32, %31 : vector<176x1xf32>
    %34 = arith.addf %29, %33 : vector<176x1xf32>
    %c4 = arith.constant 4 : index
    %35 = memref.load %arg5[%c4] : memref<5xf32, #tpu.memory_space<smem>>
    %36 = vector.extract_strided_slice %15 {offsets = [4, 0], sizes = [176, 1], strides = [1, 1]} : vector<180x1xf32> to vector<176x1xf32>
    %37 = vector.broadcast %35 : f32 to vector<176x1xf32>
    %38 = arith.mulf %37, %36 : vector<176x1xf32>
    %39 = arith.addf %34, %38 : vector<176x1xf32>
    %40 = arith.negf %39 : vector<176x1xf32>
    %41 = math.exp %40 : vector<176x1xf32>
    %cst_10 = arith.constant 1.000000e+00 : f32
    %42 = vector.broadcast %cst_10 : f32 to vector<176x1xf32>
    %43 = arith.addf %42, %41 : vector<176x1xf32>
    %44 = arith.divf %42, %43 : vector<176x1xf32>
    %cst_11 = arith.constant 0.000000e+00 : f32
    %45 = vector.broadcast %cst_11 : f32 to vector<1x1xf32>
    %46 = tpu.concatenate %45, %13, %45 in 0 : vector<1x1xf32>, vector<44x1xf32>, vector<1x1xf32> -> vector<46x1xf32>
    %c0_12 = arith.constant 0 : index
    %47 = memref.load %arg6[%c0_12] : memref<3xf32, #tpu.memory_space<smem>>
    %48 = vector.extract_strided_slice %46 {offsets = [0, 0], sizes = [44, 1], strides = [1, 1]} : vector<46x1xf32> to vector<44x1xf32>
    %49 = vector.broadcast %47 : f32 to vector<44x1xf32>
    %50 = arith.mulf %49, %48 : vector<44x1xf32>
    %c1_13 = arith.constant 1 : index
    %51 = memref.load %arg6[%c1_13] : memref<3xf32, #tpu.memory_space<smem>>
    %52 = vector.extract_strided_slice %46 {offsets = [1, 0], sizes = [44, 1], strides = [1, 1]} : vector<46x1xf32> to vector<44x1xf32>
    %53 = vector.broadcast %51 : f32 to vector<44x1xf32>
    %54 = arith.mulf %53, %52 : vector<44x1xf32>
    %55 = arith.addf %50, %54 : vector<44x1xf32>
    %c2_14 = arith.constant 2 : index
    %56 = memref.load %arg6[%c2_14] : memref<3xf32, #tpu.memory_space<smem>>
    %57 = vector.extract_strided_slice %46 {offsets = [2, 0], sizes = [44, 1], strides = [1, 1]} : vector<46x1xf32> to vector<44x1xf32>
    %58 = vector.broadcast %56 : f32 to vector<44x1xf32>
    %59 = arith.mulf %58, %57 : vector<44x1xf32>
    %60 = arith.addf %55, %59 : vector<44x1xf32>
    %61 = arith.negf %60 : vector<44x1xf32>
    %62 = math.exp %61 : vector<44x1xf32>
    %cst_15 = arith.constant 1.000000e+00 : f32
    %63 = vector.broadcast %cst_15 : f32 to vector<44x1xf32>
    %64 = arith.addf %63, %62 : vector<44x1xf32>
    %65 = arith.divf %63, %64 : vector<44x1xf32>
    %c0_16 = arith.constant 0 : index
    %c0_17 = arith.constant 0 : index
    %66 = vector.load %arg3[%c0_16, %c0_17] : memref<220x1xf32, #tpu.memory_space<vmem>>, vector<220x1xf32>
    %c0_18 = arith.constant 0 : index
    %c0_19 = arith.constant 0 : index
    %67 = vector.load %arg4[%c0_18, %c0_19] : memref<220x1xf32, #tpu.memory_space<vmem>>, vector<220x1xf32>
    %68 = vector.extract_strided_slice %66 {offsets = [0, 0], sizes = [176, 1], strides = [1, 1]} : vector<220x1xf32> to vector<176x1xf32>
    %69 = arith.mulf %44, %68 : vector<176x1xf32>
    %70 = arith.truncf %69 : vector<176x1xf32> to vector<176x1xbf16>
    %71 = vector.extract_strided_slice %66 {offsets = [176, 0], sizes = [44, 1], strides = [1, 1]} : vector<220x1xf32> to vector<44x1xf32>
    %72 = arith.mulf %65, %71 : vector<44x1xf32>
    %73 = arith.truncf %72 : vector<44x1xf32> to vector<44x1xbf16>
    %74 = vector.extract_strided_slice %67 {offsets = [0, 0], sizes = [176, 1], strides = [1, 1]} : vector<220x1xf32> to vector<176x1xf32>
    %75 = arith.truncf %74 : vector<176x1xf32> to vector<176x1xbf16>
    %76 = vector.extract_strided_slice %67 {offsets = [176, 0], sizes = [44, 1], strides = [1, 1]} : vector<220x1xf32> to vector<44x1xf32>
    %77 = arith.truncf %76 : vector<44x1xf32> to vector<44x1xbf16>
    %c0_20 = arith.constant 0 : index
    %c0_21 = arith.constant 0 : index
    %c0_22 = arith.constant 0 : index
    %78 = vector.load %arg1[%c0_20, %c0_21, %c0_22] : memref<1x176x4xbf16, #tpu.memory_space<vmem>>, vector<1x176x4xbf16>
    %79 = vector.shape_cast %78 : vector<1x176x4xbf16> to vector<176x4xbf16>
    %80 = vector.broadcast %70 : vector<176x1xbf16> to vector<176x4xbf16>
    %81 = arith.mulf %79, %80 : vector<176x4xbf16>
    %82 = vector.broadcast %75 : vector<176x1xbf16> to vector<176x4xbf16>
    %83 = arith.addf %81, %82 : vector<176x4xbf16>
    %cst_23 = arith.constant 0.000000e+00 : bf16
    %84 = vector.broadcast %cst_23 : bf16 to vector<176x4xbf16>
    %85 = arith.maximumf %83, %84 : vector<176x4xbf16>
    %c0_24 = arith.constant 0 : index
    %c0_25 = arith.constant 0 : index
    %c0_26 = arith.constant 0 : index
    %86 = vector.load %arg7[%c0_24, %c0_25, %c0_26] : memref<1x220x4xbf16, #tpu.memory_space<vmem>>, vector<1x176x4xbf16>
    %87 = vector.shape_cast %86 : vector<1x176x4xbf16> to vector<176x4xbf16>
    %88 = vector.shape_cast %85 : vector<176x4xbf16> to vector<1x176x4xbf16>
    tpu.vector_store %arg7[%c0_24, %c0_25, %c0_26], %88 {strides = array<i32>} : memref<1x220x4xbf16, #tpu.memory_space<vmem>>, vector<1x176x4xbf16>,
    %c0_27 = arith.constant 0 : index
    %c0_28 = arith.constant 0 : index
    %c0_29 = arith.constant 0 : index
    %89 = vector.load %arg2[%c0_27, %c0_28, %c0_29] : memref<1x44x4xbf16, #tpu.memory_space<vmem>>, vector<1x44x4xbf16>
    %90 = vector.shape_cast %89 : vector<1x44x4xbf16> to vector<44x4xbf16>
    %91 = vector.broadcast %73 : vector<44x1xbf16> to vector<44x4xbf16>
    %92 = arith.mulf %90, %91 : vector<44x4xbf16>
    %93 = vector.broadcast %77 : vector<44x1xbf16> to vector<44x4xbf16>
    %94 = arith.addf %92, %93 : vector<44x4xbf16>
    %cst_30 = arith.constant 0.000000e+00 : bf16
    %95 = vector.broadcast %cst_30 : bf16 to vector<44x4xbf16>
    %96 = arith.maximumf %94, %95 : vector<44x4xbf16>
    %c0_31 = arith.constant 0 : index
    %c176 = arith.constant 176 : index
    %c0_32 = arith.constant 0 : index
    %97 = vector.load %arg7[%c0_31, %c176, %c0_32] : memref<1x220x4xbf16, #tpu.memory_space<vmem>>, vector<1x44x4xbf16>
    %98 = vector.shape_cast %97 : vector<1x44x4xbf16> to vector<44x4xbf16>
    %99 = vector.shape_cast %96 : vector<44x4xbf16> to vector<1x44x4xbf16>
    tpu.vector_store %arg7[%c0_31, %c176, %c0_32], %99 {strides = array<i32>} : memref<1x220x4xbf16, #tpu.memory_space<vmem>>, vector<1x44x4xbf16>,
    return
  }
  func.func @transform_0(%arg0: i32) -> (i32, i32, i32) {
    %c0_i32 = arith.constant 0 : i32
    %c0_i32_0 = arith.constant 0 : i32
    %c0_i32_1 = arith.constant 0 : i32
    return %arg0, %c0_i32, %c0_i32_0 : i32, i32, i32
  }
  func.func @transform_1(%arg0: i32) -> (i32, i32, i32) {
    %c0_i32 = arith.constant 0 : i32
    %c0_i32_0 = arith.constant 0 : i32
    %c0_i32_1 = arith.constant 0 : i32
    return %arg0, %c0_i32, %c0_i32_0 : i32, i32, i32
  }
  func.func @transform_2(%arg0: i32) -> (i32, i32) {
    %c0_i32 = arith.constant 0 : i32
    %c0_i32_0 = arith.constant 0 : i32
    %c0_i32_1 = arith.constant 0 : i32
    return %c0_i32, %c0_i32_0 : i32, i32
  }
  func.func @transform_3(%arg0: i32) -> (i32, i32) {
    %c0_i32 = arith.constant 0 : i32
    %c0_i32_0 = arith.constant 0 : i32
    %c0_i32_1 = arith.constant 0 : i32
    return %c0_i32, %c0_i32_0 : i32, i32
  }
  func.func @transform_4(%arg0: i32) -> i32 {
    %c0_i32 = arith.constant 0 : i32
    %c0_i32_0 = arith.constant 0 : i32
    return %c0_i32 : i32
  }
  func.func @transform_5(%arg0: i32) -> i32 {
    %c0_i32 = arith.constant 0 : i32
    %c0_i32_0 = arith.constant 0 : i32
    return %c0_i32 : i32
  }
  func.func @transform_6(%arg0: i32) -> (i32, i32, i32) {
    %c0_i32 = arith.constant 0 : i32
    %c0_i32_0 = arith.constant 0 : i32
    %c0_i32_1 = arith.constant 0 : i32
    return %arg0, %c0_i32, %c0_i32_0 : i32, i32, i32
  }
}

</mosaic_0001>

<bundles_post_ra>
// kernel: ir_encoder_forward.3
= control target key start
LH: loop header
LB: loop body
LE: loop exit
PB: predicated region body
PF: predicated region fallthrough
CT: control target
= control target key end

     0   :  { %11 = vsyncpa [#allocation3], 0  ;;  %s1578_s0 = inlined_call_operand.vmem [shape: bf16[2,48,64], index: 0, kind: input, shape index: {}]   ;;  %s1579_s1 = inlined_call_operand.vmem [shape: bf16[2,12,64], index: 1, kind: input, shape index: {}]   ;;  %s1580_s2 = inlined_call_operand.vmem [shape: f32[60,1], index: 2, kind: input, shape index: {}]   ;;  %s1581_s3 = inlined_call_operand.vmem [shape: f32[60,1], index: 3, kind: input, shape index: {}]   ;;  %s1582_s4 = inlined_call_operand.vmem [shape: f32[3], index: 4, kind: input, shape index: {}]   ;;  %s1583_s5 = inlined_call_operand.vmem [shape: f32[3], index: 5, kind: input, shape index: {}]   ;;  %s1584_s6 = inlined_call_operand.vmem [shape: bf16[2,60,64], index: 6, kind: output, shape index: {}]  }
   0x1   :  { %12 = vsyncpa [#allocation5], 0  ;;  %s1222_s21 = smov 0  }
   0x2 LB: > { %s1026_s22 = sadd.s32 4294967295, %s1181_s21   ;;  %p1028_p0 = scmp.ge.s32.totalorder %s1181_s21, 1  ;;  %s1181_s21 = sphi %s1222_s21, %s18_s21  }
   0x3   : > { %p185_p1 = scmp.lt.s32.totalorder %s1181_s21, 3  ;;  %s203_s25 = sshll.u32 %s1582_s4, 4  ;;  %s204_s25 = int_to_ptr.vmem [resolvable:$true] %s203_s25 }
   0x4   : > { %p1086_p3 = scmp.eq.s32.totalorder %s1026_s22, 0  ;;  %s213_s28 = sshll.u32 %s1583_s5, 4  ;;  %s214_s28 = int_to_ptr.vmem [resolvable:$true] %s213_s28 }
   0x5   : > { %p186_p2 = pnand %p1028_p0, %p185_p1  ;;  %s1183_s29 = smov [#allocation2]  }
   0x6   : > { %s1184_s30 = smov [#allocation4]  }
   0x7   : > { %p1079_p4 = pneg %p186_p2 }
   0x8   : > { %242 = sbr.rel (%p186_p2) target bundleno = 357 (0x165), region = 44 }
   0x9   : > { %p1080_p5 = pnand %p1086_p3, %p1079_p4 }
   0xb   : > { %1082 = dma.vmem_to_smem (!%p1080_p5), %s204_s25, 16, %s1183_s29, [#allocation3]  }
   0xc   : > { %1085 = dma.vmem_to_smem (!%p1080_p5), %s214_s28, 16, %s1184_s30, [#allocation5]  }
   0xd   : > { %1172 = dma.done.wait (%p1086_p3), [#allocation3], 16  }
   0xe   : > { %1174 = vsyncadd (%p1086_p3), [#allocation3], 4294967280 }
   0xf   : > { %1176 = dma.done.wait (%p1086_p3), [#allocation5], 16  }
  0x10   : > { %1178 = vsyncadd (%p1086_p3), [#allocation5], 4294967280 }
  0x11   : > { %254 = sfence }
  0x12   : > { %p284_p6 = scmp.lt.s32.totalorder %s1026_s22, 1  ;;  %vm311_vm0 = vcmask 523264   ;;  %vm343_vm1 = vcmask 519168   ;;  %s1287_s15 = sld [smem:[#allocation4 + $0x1]]  ;;  %vm355_vm2 = vcmask 1040384   ;;  %v668_v38 = vld [vmem:[%s1581_s3] sm:$0xff] }
  0x13   : > { %s1289_s16 = sld [smem:[#allocation4 + $0x2]]  ;;  %v692_v41 = vpack.c.bf16 %v668_v38, %v668_v38  ;;  %vm400_vm3 = vcmask 1046528   ;;  %v1185_v43 = vmov 0   ;;  %vm590_vm4 = vcmask 1044480  }
  0x14   : > { %s1594_s22 = smov (!%p284_p6, %s1026_s22), 1  ;;  %s1291_s17 = sld [smem:[#allocation4]]  ;;  %1102 = vset.pattern.permute.xlu2 %v1185_v43  ;;  %1104 = vset.pattern.permute.xlu0 %v1185_v43  ;;  %vm442_vm5 = vcmask 1045504  }
  0x15   : > { %s1054_s7 = sshll.u32 %s1594_s22, 3  ;;  %s1070_s11 = smul.u32 24, %s1594_s22  ;;  %1103 = vset.pattern.permute.xlu1 %v1185_v43 }
  0x16   : > { %s1247_s10 = scalar_lea.vmem %s1579_s1, %s1054_s7  ;;  %s1040_s18 = sld [smem:[#allocation2 + $0x1]] }
  0x17   : > { %v336_v0 = vld [vmem:[%s1247_s10] sm:$0xf]  ;;  %s288_s14 = scalar_lea.vmem %s1578_s0, %s1070_s11  ;;  %v337_v2 = vld [vmem:[%s1247_s10 + $0x4] sm:$0x3]  ;;  %s1041_s19 = sld [smem:[#allocation2 + $0x2]] }
  0x18   : > { %v338_v1 = vunpack.c.l.bf16 %v336_v0  ;;  %v1256_v4 = vld [vmem:[%s288_s14 + $0x8] sm:$0xff]   ;;  %v1258_v5 = vld [vmem:[%s288_s14] sm:$0xff]   ;;  %v339_v8 = vunpack.c.l.bf16 %v337_v2  ;;  %v1271_v14 = vld [vmem:[%s288_s14 + $0x10] sm:$0xff]   ;;  %s376_s20 = sld [smem:[#allocation2]]  ;;  %v597_v27 = vstv %s1287_s15  ;;  %s1055_s11 = sshll.u32 %s1594_s22, 5 }
  0x19   : > { %v1062_v6 = vunpack.c.l.bf16 %v1256_v4  ;;  %v1058_v7 = vunpack.c.l.bf16 %v1258_v5  ;;  %v1063_v11 = vunpack.c.h.bf16 %v1256_v4  ;;  %v1059_v12 = vunpack.c.h.bf16 %v1258_v5  ;;  %s1532_s14 = scalar_lea.vmem %s1584_s6, %s1055_s11 }
  0x1a   : > { %v340_v3 = vsel %vm311_vm0, %v338_v1, 0.0  ;;  %v344_v13 = vsel %vm343_vm1, %v339_v8, 0.0  ;;  %v1066_v17 = vunpack.c.l.bf16 %v1271_v14  ;;  %v1067_v18 = vunpack.c.h.bf16 %v1271_v14 }
  0x1b   : > { %341 = vadd.xlane.f32.xlu0 %v340_v3  ;;  %v318_v9 = vsel %vm311_vm0, %v1062_v6, 0.0  ;;  %v312_v10 = vsel %vm311_vm0, %v1058_v7, 0.0  ;;  %v321_v15 = vsel %vm311_vm0, %v1063_v11, 0.0  ;;  %v315_v16 = vsel %vm311_vm0, %v1059_v12, 0.0 }
  0x1c   : > { %319 = vadd.xlane.f32.xlu2 %v318_v9  ;;  %313 = vadd.xlane.f32.xlu1 %v312_v10  ;;  %v324_v19 = vsel %vm311_vm0, %v1066_v17, 0.0  ;;  %v327_v20 = vsel %vm311_vm0, %v1067_v18, 0.0  ;;  %v610_v28 = vstv %s1289_s16  ;;  %v593_v30 = vstv %s1291_s17 }
  0x1d   : > { %v1297_v31 = vstv %s1040_s18  ;;  %v1299_v36 = vstv %s1041_s19 }
  0x1e   : > { %v1305_v42 = vstv %s376_s20 }
  0x23   : > { %345 = vadd.xlane.f32.xlu0 %v344_v13 }
  0x24   : > { %322 = vadd.xlane.f32.xlu2 %v321_v15  ;;  %316 = vadd.xlane.f32.xlu1 %v315_v16 }
  0x2b   : > { %325 = vadd.xlane.f32.xlu0 %v324_v19 }
  0x2c   : > { %328 = vadd.xlane.f32.xlu1 %v327_v20 }
  0x3c   : > { %774 = vperm.xlu2 %1102, %v692_v41  }
  0x8e   : > { %v342_v21 = vpop.xlane.xlu0 %341 }
  0x8f   : > { %v347_v22 = vmul.f32 0.015625, %v342_v21  ;;  %v320_v24 = vpop.xlane.xlu2 %319  ;;  %v314_v25 = vpop.xlane.xlu1 %313 }
  0x90   : > { %v330_v26 = vmul.f32 0.015625, %v314_v25  ;;  %v332_v35 = vmul.f32 0.015625, %v320_v24 }
  0x91   : > { %v584_v23 = vrot.slane %v347_v22, 7 }
  0x92   : > { %v356_v32 = vrot.slane %v330_v26, 7  ;;  %v359_v54 = vrot.slane %v332_v35, 7 }
  0x93   : > { %v589_v29 = vsel %vm355_vm2, 0.0, %v584_v23 }
  0x94   : > { %v598_v33 = vmul.f32 %v597_v27, %v589_v29  ;;  %v611_v34 = vmul.f32 %v610_v28, %v589_v29  ;;  %v374_v39 = vsel %vm355_vm2, 0.0, %v356_v32  ;;  %v594_v49 = vmul.f32 %v593_v30, %v589_v29 }
  0x95   : > { %v386_v44 = vmul.f32 %v1297_v31, %v374_v39  ;;  %v1309_v45 = vmul.f32 %v1299_v36, %v374_v39  ;;  %v378_v56 = vmul.f32 %v1305_v42, %v374_v39 }
  0x96   : > { %v346_v37 = vpop.xlane.xlu0 %345  ;;  %v602_v52 = vrot.slane %v598_v33, 1  ;;  %v615_v53 = vrot.slane %v611_v34, 2 }
  0x97   : > { %v348_v40 = vmul.f32 0.015625, %v346_v37  ;;  %v323_v47 = vpop.xlane.xlu2 %322  ;;  %v317_v48 = vpop.xlane.xlu1 %316  ;;  %v401_v60 = vrot.slane %v386_v44, 1  ;;  %v443_v61 = vrot.slane %v1309_v45, 2 }
  0x98   : > { %v1311_v50 = vmul.f32 0.015625, %v323_v47  ;;  %v331_v51 = vmul.f32 0.015625, %v317_v48 }
  0x99   : > { %v585_v46 = vrot.slane %v348_v40, 7 }
  0x9a   : > { %v361_v58 = vrot.slane %v1311_v50, 7  ;;  %v357_v59 = vrot.slane %v331_v51, 7 }
  0x9b   : > { %v586_v55 = vsel %vm355_vm2, %v584_v23, %v585_v46 }
  0x9c   : > { %v591_v57 = vsel %vm590_vm4, %v586_v55, 0.0  ;;  %v362_v1 = vsel %vm355_vm2, %v359_v54, %v361_v58  ;;  %v358_v2 = vsel %vm355_vm2, %v356_v32, %v357_v59  ;;  %v360_v3 = vsel %vm355_vm2, %v357_v59, %v359_v54 }
  0x9d   : > { %v599_v62 = vmul.f32 %v597_v27, %v591_v57  ;;  %v612_v63 = vmul.f32 %v610_v28, %v591_v57  ;;  %v595_v0 = vmul.f32 %v593_v30, %v591_v57  ;;  %v1321_v10 = vmul.f32 %v1305_v42, %v362_v1 }
  0x9e   : > { %v1324_v13 = vmul.f32 %v1297_v31, %v362_v1  ;;  %v1327_v15 = vmul.f32 %v1299_v36, %v362_v1  ;;  %v379_v16 = vmul.f32 %v1305_v42, %v358_v2  ;;  %v380_v19 = vmul.f32 %v1305_v42, %v360_v3  ;;  %v326_v21 = vpop.xlane.xlu0 %325 }
  0x9f   : > { %v603_v8 = vrot.slane %v599_v62, 1  ;;  %v616_v9 = vrot.slane %v612_v63, 2  ;;  %v387_v20 = vmul.f32 %v1297_v31, %v358_v2  ;;  %v329_v26 = vpop.xlane.xlu1 %328  ;;  %v388_v29 = vmul.f32 %v1297_v31, %v360_v3 }
  0xa0   : > { %v406_v25 = vrot.slane %v1324_v13, 1  ;;  %v448_v28 = vrot.slane %v1327_v15, 2  ;;  %v429_v33 = vmul.f32 %v1299_v36, %v358_v2  ;;  %v430_v34 = vmul.f32 %v1299_v36, %v360_v3 }
  0xa1   : > { %v604_v22 = vsel %vm400_vm3, %v602_v52, %v603_v8  ;;  %v608_v23 = vadd.f32 %v603_v8, %v595_v0  ;;  %v617_v24 = vsel %vm442_vm5, %v615_v53, %v616_v9  ;;  %v402_v30 = vrot.slane %v387_v20, 1 }
  0xa2   : > { %v607_v27 = vadd.f32 %v604_v22, %v594_v49  ;;  %v334_v35 = vmul.f32 0.015625, %v326_v21  ;;  %v404_v39 = vrot.slane %v388_v29, 1  ;;  %v335_v40 = vmul.f32 0.015625, %v329_v26  ;;  %v669_v21 = vld [vmem:[%s1581_s3 + $0x8] sm:$0xff] }
  0xa3   : > { %v621_v32 = vadd.f32 %v616_v9, %v608_v23  ;;  %v403_v38 = vsel %vm400_vm3, %v401_v60, %v402_v30  ;;  %v444_v44 = vrot.slane %v429_v33, 2  ;;  %v446_v45 = vrot.slane %v430_v34, 2  ;;  %v671_v34 = vld [vmem:[%s1581_s3 + $0x18] sm:$0xff] }
  0xa4   : > { %v620_v37 = vadd.f32 %v617_v24, %v607_v27  ;;  %v420_v43 = vadd.f32 %v403_v38, %v378_v56  ;;  %v405_v47 = vsel %vm400_vm3, %v402_v30, %v404_v39  ;;  %v407_v48 = vsel %vm400_vm3, %v404_v39, %v406_v25 }
  0xa5   : > { %v1051_v41 = vmul.f32 -1.442695, %v621_v32  ;;  %v363_v49 = vrot.slane %v334_v35, 7  ;;  %v421_v50 = vadd.f32 %v405_v47, %v379_v16  ;;  %v422_v51 = vadd.f32 %v407_v48, %v380_v19 }
  0xa6   : > { %v1050_v46 = vmul.f32 -1.442695, %v620_v37  ;;  %v445_v52 = vsel %vm442_vm5, %v443_v61, %v444_v44  ;;  %v447_v53 = vsel %vm442_vm5, %v444_v44, %v446_v45  ;;  %v449_v54 = vsel %vm442_vm5, %v446_v45, %v448_v28 }
  0xa7   : > { %1105 = vpow2.f32 %v1051_v41  ;;  %v462_v55 = vadd.f32 %v445_v52, %v420_v43  ;;  %v463_v56 = vadd.f32 %v447_v53, %v421_v50  ;;  %v464_v57 = vadd.f32 %v449_v54, %v422_v51 }
  0xa8   : > { %1107 = vpow2.f32 %v1050_v46  ;;  %v364_v59 = vsel %vm355_vm2, %v361_v58, %v363_v49  ;;  %v365_v60 = vrot.slane %v335_v40, 7  ;;  %v693_v33 = vpack.c.bf16 %v669_v21, %v669_v21  ;;  %v672_v46 = vld [vmem:[%s1581_s3 + $0x20] sm:$0xff] }
  0xa9   : > { %v1042_v62 = vmul.f32 -1.442695, %v462_v55  ;;  %v382_v63 = vmul.f32 %v1305_v42, %v364_v59  ;;  %v390_v0 = vmul.f32 %v1297_v31, %v364_v59  ;;  %v432_v1 = vmul.f32 %v1299_v36, %v364_v59 }
  0xaa   : > { %v1043_v2 = vmul.f32 -1.442695, %v463_v56  ;;  %v1044_v61 = vmul.f32 -1.442695, %v464_v57  ;;  %v366_v3 = vsel %vm355_vm2, %v363_v49, %v365_v60  ;;  %v375_v8 = vsel %vm355_vm2, %v365_v60, 0.0  ;;  %783 = vperm.xlu2 %1102, %v693_v33  }
  0xab   : > { %1109 = vpow2.f32 %v1042_v62  ;;  %v408_v9 = vrot.slane %v390_v0, 1  ;;  %v450_v13 = vrot.slane %v432_v1, 2  ;;  %v383_v15 = vmul.f32 %v1305_v42, %v366_v3 }
  0xac   : > { %1111 = vpow2.f32 %v1043_v2  ;;  %v391_v16 = vmul.f32 %v1297_v31, %v366_v3  ;;  %v392_v19 = vmul.f32 %v1297_v31, %v375_v8  ;;  %v433_v20 = vmul.f32 %v1299_v36, %v366_v3 }
  0xad   : > { %v1106_v58 = vpop.eup %1105  ;;  %1113 = vpow2.f32 %v1044_v61  ;;  %v409_v24 = vsel %vm400_vm3, %v406_v25, %v408_v9  ;;  %v451_v42 = vsel %vm442_vm5, %v448_v28, %v450_v13  ;;  %v434_v30 = vmul.f32 %v1299_v36, %v375_v8 }
  0xae   : > { %v1108_v22 = vpop.eup %1107  ;;  %v1358_v23 = vadd.f32 1.0, %v1106_v58  ;;  %v423_v27 = vadd.f32 %v409_v24, %v1321_v10  ;;  %v410_v29 = vrot.slane %v391_v16, 1  ;;  %v412_v31 = vrot.slane %v392_v19, 1  ;;  %v670_v10 = vld [vmem:[%s1581_s3 + $0x10] sm:$0xff]  ;;  %v667_v24 = vld [vmem:[%s1580_s2 + $0x38] sm:$0xf] }
  0xaf   : > { %v1362_v26 = vadd.f32 1.0, %v1108_v22  ;;  %v452_v32 = vrot.slane %v433_v20, 2  ;;  %v454_v39 = vrot.slane %v434_v30, 2  ;;  %v695_v45 = vpack.c.bf16 %v671_v34, %v671_v34 }
  0xb0   : > { %1115 = vrcp.f32 %v1358_v23  ;;  %v465_v35 = vadd.f32 %v451_v42, %v423_v27  ;;  %v411_v25 = vsel %vm400_vm3, %v408_v9, %v410_v29  ;;  %v413_v28 = vsel %vm400_vm3, %v410_v29, %v412_v31 }
  0xb1   : > { %v1110_v37 = vpop.eup %1109  ;;  %1117 = vrcp.f32 %v1362_v26  ;;  %v424_v38 = vadd.f32 %v411_v25, %v382_v63  ;;  %v425_v36 = vadd.f32 %v413_v28, %v383_v15  ;;  %v453_v44 = vsel %vm442_vm5, %v450_v13, %v452_v32  ;;  %801 = vperm.xlu0 %1104, %v695_v45   ;;  %v660_v45 = vld [vmem:[%s1580_s2] sm:$0xff] }
  0xb2   : > { %v1112_v40 = vpop.eup %1111  ;;  %v1376_v41 = vadd.f32 1.0, %v1110_v37  ;;  %v1045_v43 = vmul.f32 -1.442695, %v465_v35  ;;  %v455_v49 = vsel %vm442_vm5, %v452_v32, %v454_v39  ;;  %v694_v51 = vpack.c.bf16 %v670_v10, %v670_v10 }
  0xb3   : > { %v1114_v47 = vpop.eup %1113  ;;  %v1382_v48 = vadd.f32 1.0, %v1112_v40  ;;  %v466_v50 = vadd.f32 %v453_v44, %v424_v38  ;;  %v467_v53 = vadd.f32 %v455_v49, %v425_v36  ;;  %v696_v56 = vpack.c.bf16 %v672_v46, %v672_v46 }
  0xb4   : > { %v1385_v52 = vadd.f32 1.0, %v1114_v47  ;;  %1119 = vrcp.f32 %v1376_v41  ;;  %792 = vperm.xlu1 %1103, %v694_v51   ;;  %v654_v57 = vand.u32 2147483647, %v1358_v23  ;;  %v656_v62 = vand.u32 2147483648, %v1358_v23  ;;  %v661_v51 = vld [vmem:[%s1580_s2 + $0x8] sm:$0xff] }
  0xb5   : > { %1121 = vrcp.f32 %v1382_v48  ;;  %v1046_v55 = vmul.f32 -1.442695, %v466_v50  ;;  %v1047_v59 = vmul.f32 -1.442695, %v467_v53  ;;  %810 = vperm.xlu2 %1102, %v696_v56   ;;  %vm650_vm6 = vweird.f32 %v1358_v23  ;;  %v662_v53 = vld [vmem:[%s1580_s2 + $0x10] sm:$0xff] }
  0xb6   : > { %v1116_v54 = vpop.eup %1115  ;;  %1123 = vrcp.f32 %v1385_v52  ;;  %vm1396_vm8 = vcmp.eq.f32.partialorder %v654_v57, 8.507059e+37  ;;  %v657_v3 = vor.u32 1.1754944e-38, %v656_v62  ;;  %v531_v8 = vand.u32 2147483647, %v1385_v52 }
  0xb7   : > { %v646_v60 = vmul.f32 %v1116_v54, %v1358_v23  ;;  %v1393_v63 = vpop.eup %1117  ;;  %1125 = vpow2.f32 %v1045_v43  ;;  %vm651_vm7 = vweird.f32 %v1116_v54  ;;  %v533_v9 = vand.u32 2147483648, %v1385_v52 }
  0xb8   : > { %1127 = vpow2.f32 %v1046_v55  ;;  %vm527_vm9 = vweird.f32 %v1385_v52  ;;  %vm497_vm10 = vweird.f32 %v1376_v41  ;;  %v501_v58 = vand.u32 2147483647, %v1376_v41  ;;  %vm652_vm13 = vmor %vm650_vm6, %vm651_vm7 }
  0xb9   : > { %v647_v0 = vsub.f32 1.0, %v646_v60  ;;  %1129 = vpow2.f32 %v1047_v59  ;;  %v503_v16 = vand.u32 2147483648, %v1376_v41  ;;  %vm512_vm12 = vweird.f32 %v1382_v48 }
  0xba   : > { %v1120_v2 = vpop.eup %1119  ;;  %v516_v29 = vand.u32 2147483647, %v1382_v48  ;;  %v518_v34 = vand.u32 2147483648, %v1382_v48  ;;  %vm502_vm2 = vcmp.eq.f32.partialorder %v501_v58, 8.507059e+37  ;;  %vm532_vm6 = vcmp.eq.f32.partialorder %v531_v8, 8.507059e+37 }
  0xbb   : > { %v648_v61 = vmul.f32 %v1116_v54, %v647_v0  ;;  %v1122_v13 = vpop.eup %1121  ;;  %v493_v15 = vmul.f32 %v1120_v2, %v1376_v41  ;;  %vm498_vm11 = vweird.f32 %v1120_v2  ;;  %v504_v44 = vor.u32 1.1754944e-38, %v503_v16 }
  0xbc   : > { %v1124_v19 = vpop.eup %1123  ;;  %v508_v21 = vmul.f32 %v1122_v13, %v1382_v48  ;;  %vm513_vm14 = vweird.f32 %v1122_v13  ;;  %vm499_vm0 = vmor %vm497_vm10, %vm498_vm11  ;;  %v519_v50 = vor.u32 1.1754944e-38, %v518_v34  ;;  %v534_v41 = vor.u32 1.1754944e-38, %v533_v9 }
  0xbd   : > { %v649_v20 = vadd.f32 %v1116_v54, %v648_v61  ;;  %v1126_v22 = vpop.eup %1125  ;;  %v523_v42 = vmul.f32 %v1124_v19, %v1385_v52  ;;  %v494_v27 = vsub.f32 1.0, %v493_v15  ;;  %vm528_vm15 = vweird.f32 %v1124_v19  ;;  %vm514_vm3 = vmor %vm512_vm12, %vm513_vm14 }
  0xbe   : > { %v1128_v31 = vpop.eup %1127  ;;  %v1417_v30 = vadd.f32 1.0, %v1126_v22  ;;  %v509_v33 = vsub.f32 1.0, %v508_v21  ;;  %vm529_vm4 = vmor %vm527_vm9, %vm528_vm15  ;;  %vm517_vm5 = vcmp.eq.f32.partialorder %v516_v29, 8.507059e+37  ;;  %v674_v22 = vld [vmem:[%s1581_s3 + $0x30] sm:$0xff] }
  0xbf   : > { %v653_v32 = vsel %vm652_vm13, %v1116_v54, %v649_v20  ;;  %v1130_v35 = vpop.eup %1129  ;;  %v1420_v23 = vadd.f32 1.0, %v1128_v31  ;;  %v524_v28 = vsub.f32 1.0, %v523_v42  ;;  %v495_v10 = vmul.f32 %v1120_v2, %v494_v27 }
  0xc0   : > { %v658_v25 = vsel %vm1396_vm8, %v657_v3, %v653_v32  ;;  %1131 = vrcp.f32 %v1417_v30  ;;  %v1425_v37 = vadd.f32 1.0, %v1130_v35  ;;  %v510_v36 = vmul.f32 %v1122_v13, %v509_v33 }
  0xc1   : > { %v689_v38 = vmul.f32 %v667_v24, %v658_v25  ;;  %1133 = vrcp.f32 %v1420_v23  ;;  %v525_v39 = vmul.f32 %v1124_v19, %v524_v28  ;;  %v496_v40 = vadd.f32 %v1120_v2, %v495_v10  ;;  %v663_v28 = vld [vmem:[%s1580_s2 + $0x18] sm:$0xff] }
  0xc2   : > { %1135 = vrcp.f32 %v1425_v37  ;;  %v511_v46 = vadd.f32 %v1122_v13, %v510_v36  ;;  %v546_v0 = vand.u32 2147483647, %v1417_v30  ;;  %v548_v3 = vand.u32 2147483648, %v1417_v30 }
  0xc3   : > { %v691_v43 = vpack.c.bf16 %v689_v38, %v689_v38  ;;  %v526_v47 = vadd.f32 %v1124_v19, %v525_v39  ;;  %v500_v49 = vsel %vm499_vm0, %v1120_v2, %v496_v40  ;;  %vm542_vm7 = vweird.f32 %v1417_v30 }
  0xc4   : > { %v505_v54 = vsel %vm502_vm2, %v504_v44, %v500_v49  ;;  %v515_v55 = vsel %vm514_vm3, %v1122_v13, %v511_v46  ;;  %v576_v8 = vand.u32 2147483647, %v1425_v37  ;;  %vm572_vm8 = vweird.f32 %v1425_v37 }
  0xc5   : > { %887 = vperm.xlu0 %1104, %v691_v43   ;;  %v530_v48 = vsel %vm529_vm4, %v1124_v19, %v526_v47  ;;  %v676_v56 = vmul.f32 %v660_v45, %v505_v54  ;;  %v520_v57 = vsel %vm517_vm5, %v519_v50, %v515_v55  ;;  %vm1458_vm9 = vcmp.eq.f32.partialorder %v546_v0, 8.507059e+37  ;;  %v665_v45 = vld [vmem:[%s1580_s2 + $0x28] sm:$0xff] }
  0xc6   : > { %v1132_v59 = vpop.eup %1131  ;;  %v535_v60 = vsel %vm532_vm6, %v534_v41, %v530_v48  ;;  %v677_v62 = vmul.f32 %v661_v51, %v520_v57  ;;  %v578_v21 = vand.u32 2147483648, %v1425_v37  ;;  %v549_v27 = vor.u32 1.1754944e-38, %v548_v3  ;;  %v664_v57 = vld [vmem:[%s1580_s2 + $0x20] sm:$0xff]  ;;  %v675_v3 = vld [vmem:[%s1581_s3 + $0x38] sm:$0xf] }
  0xc7   : > { %v1448_v1 = vpop.eup %1133  ;;  %v678_v52 = vmul.f32 %v662_v53, %v535_v60  ;;  %v682_v2 = vpack.c.bf16 %v676_v56, %v676_v56  ;;  %v538_v61 = vmul.f32 %v1132_v59, %v1417_v30  ;;  %vm543_vm10 = vweird.f32 %v1132_v59 }
  0xc8   : > { %v1136_v9 = vpop.eup %1135  ;;  %v553_v13 = vmul.f32 %v1448_v1, %v1420_v23  ;;  %v683_v19 = vpack.c.bf16 %v677_v62, %v677_v62  ;;  %vm1466_vm12 = vcmp.eq.f32.partialorder %v576_v8, 8.507059e+37  ;;  %v631_v33 = vmul.f32 %v1393_v63, %v1362_v26  ;;  %vm544_vm14 = vmor %vm542_vm7, %vm543_vm10 }
  0xc9   : > { %v684_v15 = vpack.c.bf16 %v678_v52, %v678_v52  ;;  %702 = vperm.xlu2 %1102, %v682_v2   ;;  %v539_v58 = vsub.f32 1.0, %v538_v61  ;;  %v568_v16 = vmul.f32 %v1136_v9, %v1425_v37  ;;  %vm573_vm11 = vweird.f32 %v1136_v9 }
  0xca   : > { %v554_v24 = vsub.f32 1.0, %v553_v13  ;;  %v698_v25 = vpack.c.bf16 %v674_v22, %v674_v22  ;;  %vm558_vm13 = vweird.f32 %v1448_v1  ;;  %v579_v10 = vor.u32 1.1754944e-38, %v578_v21  ;;  %vm574_vm15 = vmor %vm572_vm8, %vm573_vm11  ;;  %v775_v13 = vpop.permute.xlu2 %774 }
  0xcb   : > { %720 = vperm.xlu1 %1103, %v684_v15   ;;  %v540_v42 = vmul.f32 %v1132_v59, %v539_v58  ;;  %v569_v29 = vsub.f32 1.0, %v568_v16  ;;  %v563_v36 = vand.u32 2147483648, %v1420_v23  ;;  %v632_v39 = vsub.f32 1.0, %v631_v33 }
  0xcc   : > { %v555_v32 = vmul.f32 %v1448_v1, %v554_v24  ;;  %vm557_vm0 = vweird.f32 %v1420_v23  ;;  %v561_v30 = vand.u32 2147483647, %v1420_v23  ;;  %vm636_vm3 = vweird.f32 %v1393_v63 }
  0xcd   : > { %711 = vperm.xlu0 %1104, %v683_v19   ;;  %v541_v34 = vadd.f32 %v1132_v59, %v540_v42  ;;  %v570_v35 = vmul.f32 %v1136_v9, %v569_v29  ;;  %vm1491_vm2 = vmor %vm557_vm0, %vm558_vm13  ;;  %v633_v47 = vmul.f32 %v1393_v63, %v632_v39  ;;  %v641_v37 = vand.u32 2147483648, %v1362_v26 }
  0xce   : > { %v556_v38 = vadd.f32 %v1448_v1, %v555_v32  ;;  %v639_v51 = vand.u32 2147483647, %v1362_v26  ;;  %v564_v53 = vor.u32 1.1754944e-38, %v563_v36  ;;  %vm635_vm4 = vweird.f32 %v1362_v26  ;;  %v666_v26 = vld [vmem:[%s1580_s2 + $0x30] sm:$0xff] }
  0xcf   : > { %v545_v40 = vsel %vm544_vm14, %v1132_v59, %v541_v34  ;;  %v571_v43 = vadd.f32 %v1136_v9, %v570_v35  ;;  %v634_v54 = vadd.f32 %v1393_v63, %v633_v47  ;;  %vm562_vm5 = vcmp.eq.f32.partialorder %v561_v30, 8.507059e+37  ;;  %vm637_vm6 = vmor %vm635_vm4, %vm636_vm3 }
  0xd0   : > { %v550_v44 = vsel %vm1458_vm9, %v549_v27, %v545_v40  ;;  %v560_v23 = vsel %vm1491_vm2, %v1448_v1, %v556_v38  ;;  %v642_v60 = vor.u32 1.1754944e-38, %v641_v37  ;;  %vm640_vm7 = vcmp.eq.f32.partialorder %v639_v51, 8.507059e+37  ;;  %v875_v40 = vld [vmem:[%s1247_s10 + $0x4] sm:$0x3] }
  0xd1   : > { %v679_v49 = vmul.f32 %v663_v28, %v550_v44  ;;  %v575_v50 = vsel %vm574_vm15, %v1136_v9, %v571_v43  ;;  %v565_v56 = vsel %vm562_vm5, %v564_v53, %v560_v23  ;;  %v638_v59 = vsel %vm637_vm6, %v1393_v63, %v634_v54  ;;  %v673_v63 = vld [vmem:[%s1581_s3 + $0x28] sm:$0xff] }
  0xd2   : > { %v580_v41 = vsel %vm1466_vm12, %v579_v10, %v575_v50  ;;  %v643_v0 = vsel %vm640_vm7, %v642_v60, %v638_v59  ;;  %v680_v1 = vmul.f32 %v664_v57, %v565_v56  ;;  %v699_v9 = vpack.c.bf16 %v675_v3, %v675_v3 }
  0xd3   : > { %v685_v55 = vpack.c.bf16 %v679_v49, %v679_v49  ;;  %v681_v48 = vmul.f32 %v665_v45, %v580_v41  ;;  %v688_v52 = vmul.f32 %v666_v26, %v643_v0  ;;  %v697_v8 = vpack.c.bf16 %v673_v63, %v673_v63 }
  0xd4   : > { %v686_v2 = vpack.c.bf16 %v680_v1, %v680_v1  ;;  %v1186_v16 = vmov 839922192   ;;  %v895_v46 = vunpack.c.l.bf16 %v875_v40  ;;  %vm935_vm8 = vcmask 517120  }
  0xd5   : > { %904 = vperm.xlu0 %1104, %v698_v25   ;;  %729 = vperm.xlu2 %1102, %v685_v55   ;;  %v687_v62 = vpack.c.bf16 %v681_v48, %v681_v48  ;;  %v690_v61 = vpack.c.bf16 %v688_v52, %v688_v52  ;;  %v706_v19 = vunpack.c.l.s4 %v1186_v16 }
  0xd7   : > { %747 = vperm.xlu1 %1103, %v687_v62   ;;  %v1521_v20 = vunpack.c.0.s8 %v706_v19 }
  0xd9   : > { %v780_v42 = vperm.slane %v775_v13, %v1521_v20 }
  0xdb   : > { %v832_v31 = vunpack.c.l.bf16 %v780_v42 }
  0xdd   : > { %738 = vperm.xlu2 %1102, %v686_v2  }
  0xdf   : > { %878 = vperm.xlu1 %1103, %v690_v61  }
  0xe5   : > { %913 = vperm.xlu2 %1102, %v699_v9  }
  0xe7   : > { %819 = vperm.xlu1 %1103, %v697_v8  }
 0x104   : > { %v1519_v15 = vpop.permute.xlu2 %783 }
 0x105   : > { %v789_v13 = vperm.slane %v1519_v15, %v1521_v20 }
 0x10f   : > { %v811_v58 = vpop.permute.xlu2 %810 }
 0x110   : > { %v816_v41 = vperm.slane %v811_v58, %v1521_v20 }
 0x112   : > { %v836_v62 = vunpack.c.l.bf16 %v816_v41 }
 0x123   : > { %v703_v21 = vpop.permute.xlu2 %702  ;;  %v802_v33 = vpop.permute.xlu0 %801 }
 0x124   : > { %v708_v22 = vperm.slane %v703_v21, %v1521_v20 }
 0x126   : > { %v754_v24 = vunpack.c.l.bf16 %v708_v22  ;;  %v793_v36 = vpop.permute.xlu1 %792 }
 0x127   : > { %v798_v63 = vperm.slane %v793_v36, %v1521_v20 }
 0x128   : > { %v760_v27 = vmul.f32 %v1058_v7, %v754_v24  ;;  %v807_v7 = vperm.slane %v802_v33, %v1521_v20 }
 0x129   : > { %v834_v42 = vunpack.c.l.bf16 %v798_v63 }
 0x12a   : > { %v766_v29 = vpack.c.bf16 %v760_v27, %v760_v27  ;;  %v835_v30 = vunpack.c.l.bf16 %v807_v7 }
 0x12c   : > { %v826_v32 = vunpack.c.l.bf16 %v766_v29 }
 0x12e   : > { %v838_v34 = vadd.f32 %v832_v31, %v826_v32  ;;  %v833_v31 = vunpack.c.l.bf16 %v789_v13 }
 0x12f   : > { %v730_v35 = vpop.permute.xlu2 %729 }
 0x130   : > { %v856_v25 = vmax.f32 %v838_v34, 0.0  ;;  %v735_v28 = vperm.slane %v730_v35, %v1521_v20 }
 0x132   : > { %v862_v10 = vpack.c.bf16 %v856_v25, %v856_v25  ;;  %v757_v38 = vunpack.c.l.bf16 %v735_v28  ;;  %v874_v28 = vld [vmem:[%s1247_s10] sm:$0xf] }
 0x133   : > { %v894_v7 = vunpack.c.l.bf16 %v874_v28 }
 0x134   : > { %868 = vst.msk [vmem:[%s1532_s14] sm:$0xf] %vm343_vm1, %v862_v10  ;;  %v763_v39 = vmul.f32 %v1063_v11, %v757_v38 }
 0x136   : > { %v769_v43 = vpack.c.bf16 %v763_v39, %v763_v39 }
 0x137   : > { %v888_v44 = vpop.permute.xlu0 %887  ;;  %v739_v45 = vpop.permute.xlu2 %738 }
 0x138   : > { %v893_v47 = vperm.slane %v888_v44, %v1521_v20  ;;  %v829_v37 = vunpack.c.l.bf16 %v769_v43  ;;  %v744_v49 = vperm.slane %v739_v45, %v1521_v20 }
 0x13a   : > { %v897_v50 = vunpack.c.l.bf16 %v893_v47  ;;  %v841_v23 = vadd.f32 %v835_v30, %v829_v37  ;;  %v758_v51 = vunpack.c.l.bf16 %v744_v49 }
 0x13c   : > { %v899_v53 = vmul.f32 %v897_v50, %v895_v46  ;;  %v859_v54 = vmax.f32 %v841_v23, 0.0  ;;  %v764_v11 = vmul.f32 %v1066_v17, %v758_v51 }
 0x13d   : > { %v721_v48 = vpop.permute.xlu1 %720 }
 0x13e   : > { %v901_v55 = vpack.c.bf16 %v899_v53, %v899_v53  ;;  %v865_v56 = vpack.c.bf16 %v859_v54, %v859_v54  ;;  %v770_v57 = vpack.c.bf16 %v764_v11, %v764_v11  ;;  %v726_v59 = vperm.slane %v721_v48, %v1521_v20 }
 0x13f   : > { %v712_v60 = vpop.permute.xlu0 %711  ;;  %v914_v0 = vpop.permute.xlu2 %913 }
 0x140   : > { %v717_v26 = vperm.slane %v712_v60, %v1521_v20  ;;  %871 = vst.msk [vmem:[%s1532_s14 + $0xc] sm:$0xf] %vm343_vm1, %v865_v56  ;;  %v830_v1 = vunpack.c.l.bf16 %v770_v57  ;;  %v921_v52 = vunpack.c.l.bf16 %v901_v55  ;;  %v919_v2 = vperm.slane %v914_v0, %v1521_v20 }
 0x141   : > { %v756_v61 = vunpack.c.l.bf16 %v726_v59 }
 0x142   : > { %v755_v3 = vunpack.c.l.bf16 %v717_v26  ;;  %v842_v17 = vadd.f32 %v836_v62, %v830_v1  ;;  %v923_v9 = vunpack.c.l.bf16 %v919_v2 }
 0x143   : > { %v762_v8 = vmul.f32 %v1062_v6, %v756_v61 }
 0x144   : > { %v761_v58 = vmul.f32 %v1059_v12, %v755_v3  ;;  %v860_v16 = vmax.f32 %v842_v17, 0.0  ;;  %v925_v19 = vadd.f32 %v923_v9, %v921_v52 }
 0x145   : > { %v768_v21 = vpack.c.bf16 %v762_v8, %v762_v8 }
 0x146   : > { %v767_v22 = vpack.c.bf16 %v761_v58, %v761_v58  ;;  %v866_v24 = vpack.c.bf16 %v860_v16, %v860_v16  ;;  %v931_v27 = vmax.f32 %v925_v19, 0.0 }
 0x147   : > { %v828_v29 = vunpack.c.l.bf16 %v768_v21  ;;  %v905_v39 = vpop.permute.xlu0 %904 }
 0x148   : > { %v827_v4 = vunpack.c.l.bf16 %v767_v22  ;;  %872 = vst.msk [vmem:[%s1532_s14 + $0x10] sm:$0xf] %vm343_vm1, %v866_v24  ;;  %v933_v6 = vpack.c.bf16 %v931_v27, %v931_v27  ;;  %v910_v30 = vperm.slane %v905_v39, %v1521_v20 }
 0x149   : > { %v840_v5 = vadd.f32 %v834_v42, %v828_v29  ;;  %v748_v15 = vpop.permute.xlu1 %747 }
 0x14a   : > { %v839_v12 = vadd.f32 %v833_v31, %v827_v4  ;;  %936 = vst.msk [vmem:[%s1532_s14 + $0x1c] sm:$0x3] %vm935_vm8, %v933_v6  ;;  %v753_v35 = vperm.slane %v748_v15, %v1521_v20  ;;  %v922_v37 = vunpack.c.l.bf16 %v910_v30 }
 0x14b   : > { %v858_v32 = vmax.f32 %v840_v5, 0.0 }
 0x14c   : > { %v857_v33 = vmax.f32 %v839_v12, 0.0  ;;  %v759_v10 = vunpack.c.l.bf16 %v753_v35 }
 0x14d   : > { %v864_v34 = vpack.c.bf16 %v858_v32, %v858_v32 }
 0x14e   : > { %v863_v25 = vpack.c.bf16 %v857_v33, %v857_v33  ;;  %v765_v40 = vmul.f32 %v1067_v18, %v759_v10 }
 0x14f   : > { %870 = vst.msk [vmem:[%s1532_s14 + $0x8] sm:$0xf] %vm343_vm1, %v864_v34 }
 0x150   : > { %869 = vst.msk [vmem:[%s1532_s14 + $0x4] sm:$0xf] %vm343_vm1, %v863_v25  ;;  %v771_v45 = vpack.c.bf16 %v765_v40, %v765_v40 }
 0x151   : > { %v879_v38 = vpop.permute.xlu1 %878 }
 0x152   : > { %v884_v36 = vperm.slane %v879_v38, %v1521_v20  ;;  %v831_v23 = vunpack.c.l.bf16 %v771_v45 }
 0x154   : > { %v896_v43 = vunpack.c.l.bf16 %v884_v36 }
 0x156   : > { %v898_v44 = vmul.f32 %v896_v43, %v894_v7 }
 0x158   : > { %v900_v46 = vpack.c.bf16 %v898_v44, %v898_v44 }
 0x159   : > { %v820_v47 = vpop.permute.xlu1 %819 }
 0x15a   : > { %v920_v49 = vunpack.c.l.bf16 %v900_v46  ;;  %v825_v50 = vperm.slane %v820_v47, %v1521_v20 }
 0x15c   : > { %v924_v51 = vadd.f32 %v922_v37, %v920_v49  ;;  %v837_v41 = vunpack.c.l.bf16 %v825_v50 }
 0x15e   : > { %v930_v53 = vmax.f32 %v924_v51, 0.0  ;;  %v843_v54 = vadd.f32 %v837_v41, %v831_v23 }
 0x160   : > { %v932_v14 = vpack.c.bf16 %v930_v53, %v930_v53  ;;  %v861_v18 = vmax.f32 %v843_v54, 0.0 }
 0x162   : > { %934 = vst.msk [vmem:[%s1532_s14 + $0x18] sm:$0xf] %vm343_vm1, %v932_v14  ;;  %v867_v11 = vpack.c.bf16 %v861_v18, %v861_v18 }
 0x164   : > { %873 = vst.msk [vmem:[%s1532_s14 + $0x14] sm:$0xf] %vm343_vm1, %v867_v11 }
 0x165 PF: > { %s18_s21 = sadd.s32 1, %s1181_s21  }
 0x166   : > { %p15_p7 = scmp.ge.s32.totalorder %s18_s21, 4  }
 0x168   :  { %17 = sbr.rel (!%p15_p7) target bundleno = 2 (0x2), region = 86 }
 0x16d   :  { %958 = vsyncpa [#allocation3], 1 }
 0x16e   :  { %960 = vsyncpa [#allocation3 + $0x1], 1 }
 0x16f   :  { %961 = vsyncpa [#allocation5], 1 }

// kernel: ir_encoder_forward.4
= control target key start
LH: loop header
LB: loop body
LE: loop exit
PB: predicated region body
PF: predicated region fallthrough
CT: control target
= control target key end

     0   :  { %11 = vsyncpa [#allocation3], 0  ;;  %s2583_s0 = inlined_call_operand.vmem [shape: bf16[2,96,16], index: 0, kind: input, shape index: {}]   ;;  %s2584_s1 = inlined_call_operand.vmem [shape: bf16[2,24,16], index: 1, kind: input, shape index: {}]   ;;  %s2585_s2 = inlined_call_operand.vmem [shape: f32[120,1], index: 2, kind: input, shape index: {}]   ;;  %s2586_s3 = inlined_call_operand.vmem [shape: f32[120,1], index: 3, kind: input, shape index: {}]   ;;  %s2587_s4 = inlined_call_operand.vmem [shape: f32[3], index: 4, kind: input, shape index: {}]   ;;  %s2588_s5 = inlined_call_operand.vmem [shape: f32[3], index: 5, kind: input, shape index: {}]   ;;  %s2589_s6 = inlined_call_operand.vmem [shape: bf16[2,120,16], index: 6, kind: output, shape index: {}]  }
   0x1   :  { %12 = vsyncpa [#allocation5], 0  ;;  %s1819_s21 = smov 0  }
   0x2 LB: > { %s1567_s22 = sadd.s32 4294967295, %s1778_s21   ;;  %p1569_p0 = scmp.ge.s32.totalorder %s1778_s21, 1  ;;  %s1778_s21 = sphi %s1819_s21, %s18_s21  }
   0x3   : > { %p185_p1 = scmp.lt.s32.totalorder %s1778_s21, 3  ;;  %s203_s25 = sshll.u32 %s2587_s4, 4  ;;  %s204_s25 = int_to_ptr.vmem [resolvable:$true] %s203_s25 }
   0x4   : > { %p1655_p3 = scmp.eq.s32.totalorder %s1567_s22, 0  ;;  %s213_s28 = sshll.u32 %s2588_s5, 4  ;;  %s214_s28 = int_to_ptr.vmem [resolvable:$true] %s213_s28 }
   0x5   : > { %p186_p2 = pnand %p1569_p0, %p185_p1  ;;  %s1780_s29 = smov [#allocation2]  }
   0x6   : > { %s1781_s30 = smov [#allocation4]  }
   0x7   : > { %p1648_p4 = pneg %p186_p2 }
   0x8   : > { %242 = sbr.rel (%p186_p2) target bundleno = 405 (0x195), region = 44 }
   0x9   : > { %p1649_p5 = pnand %p1655_p3, %p1648_p4 }
   0xb   : > { %1651 = dma.vmem_to_smem (!%p1649_p5), %s204_s25, 16, %s1780_s29, [#allocation3]  }
   0xc   : > { %1654 = dma.vmem_to_smem (!%p1649_p5), %s214_s28, 16, %s1781_s30, [#allocation5]  }
   0xd   : > { %1769 = dma.done.wait (%p1655_p3), [#allocation3], 16  }
   0xe   : > { %1771 = vsyncadd (%p1655_p3), [#allocation3], 4294967280 }
   0xf   : > { %1773 = dma.done.wait (%p1655_p3), [#allocation5], 16  }
  0x10   : > { %1775 = vsyncadd (%p1655_p3), [#allocation5], 4294967280 }
  0x11   : > { %254 = sfence }
  0x12   : > { %p284_p6 = scmp.lt.s32.totalorder %s1567_s22, 1  ;;  %vm323_vm0 = vcmask 130048   ;;  %v1782_v12 = vmov 0   ;;  %v976_v39 = vld [vmem:[%s2586_s3] sm:$0xff]  ;;  %v979_v41 = vld [vmem:[%s2586_s3 + $0x18] sm:$0xff]  ;;  %v977_v42 = vld [vmem:[%s2586_s3 + $0x8] sm:$0xff] }
  0x13   : > { %1671 = vset.pattern.permute.xlu1 %v1782_v12  ;;  %1672 = vset.pattern.permute.xlu0 %v1782_v12  ;;  %v1021_v40 = vpack.c.bf16 %v976_v39, %v976_v39  ;;  %v1024_v43 = vpack.c.bf16 %v979_v41, %v979_v41  ;;  %v1022_v44 = vpack.c.bf16 %v977_v42, %v977_v42  ;;  %v978_v45 = vld [vmem:[%s2586_s3 + $0x10] sm:$0xff]  ;;  %v980_v47 = vld [vmem:[%s2586_s3 + $0x20] sm:$0xff]  ;;  %s1579_s29 = sld [smem:[#allocation2 + $0x1]]  ;;  %v981_v53 = vld [vmem:[%s2586_s3 + $0x28] sm:$0xff]  ;;  %vm402_vm1 = vcmask 1040384  }
  0x14   : > { %s2601_s22 = smov (!%p284_p6, %s1567_s22), 1  ;;  %1673 = vset.pattern.permute.xlu2 %v1782_v12  ;;  %v982_v46 = vld [vmem:[%s2586_s3 + $0x30] sm:$0xff]  ;;  %v1023_v48 = vpack.c.bf16 %v978_v45, %v978_v45  ;;  %v1025_v50 = vpack.c.bf16 %v980_v47, %v980_v47  ;;  %s1580_s30 = sld [smem:[#allocation2 + $0x2]]  ;;  %v985_v54 = vld [vmem:[%s2586_s3 + $0x48] sm:$0xff]  ;;  %v983_v55 = vld [vmem:[%s2586_s3 + $0x38] sm:$0xff]  ;;  %v1026_v57 = vpack.c.bf16 %v981_v53, %v981_v53  ;;  %vm483_vm2 = vcmask 1046528  }
  0x15   : > { %s1637_s7 = smul.u32 48, %s2601_s22  ;;  %v1027_v49 = vpack.c.bf16 %v982_v46, %v982_v46  ;;  %v1030_v58 = vpack.c.bf16 %v985_v54, %v985_v54  ;;  %v1028_v60 = vpack.c.bf16 %v983_v55, %v983_v55  ;;  %vm561_vm3 = vcmask 1045504   ;;  %s2063_s15 = sld [smem:[#allocation4 + $0x1]] }
  0x16   : > { %s1638_s11 = smul.u32 12, %s2601_s22  ;;  %s2069_s16 = sld [smem:[#allocation4 + $0x2]] }
  0x17   : > { %s1844_s10 = scalar_lea.vmem %s2583_s0, %s1637_s7  ;;  %s441_s7 = sld [smem:[#allocation2]] }
  0x18   : > { %v1847_v0 = vld [vmem:[%s1844_s10 + $0x10] sm:$0xff]   ;;  %v1850_v1 = vld [vmem:[%s1844_s10 + $0x8] sm:$0xff]   ;;  %v1853_v2 = vld [vmem:[%s1844_s10] sm:$0xff]   ;;  %s1907_s14 = scalar_lea.vmem %s2584_s1, %s1638_s11  ;;  %s2077_s17 = sld [smem:[#allocation4]] }
  0x19   : > { %v1610_v3 = vunpack.c.l.bf16 %v1847_v0  ;;  %v1606_v4 = vunpack.c.l.bf16 %v1850_v1  ;;  %v1602_v5 = vunpack.c.l.bf16 %v1853_v2  ;;  %v1611_v9 = vunpack.c.h.bf16 %v1847_v0  ;;  %v1880_v16 = vld [vmem:[%s1844_s10 + $0x20] sm:$0xff]   ;;  %v1883_v17 = vld [vmem:[%s1844_s10 + $0x18] sm:$0xff]   ;;  %v1898_v24 = vld [vmem:[%s1844_s10 + $0x28] sm:$0xff]   ;;  %s1639_s18 = smul.u32 60, %s2601_s22 }
  0x1a   : > { %v1607_v10 = vunpack.c.h.bf16 %v1850_v1  ;;  %v1603_v11 = vunpack.c.h.bf16 %v1853_v2  ;;  %v1618_v18 = vunpack.c.l.bf16 %v1880_v16  ;;  %v1615_v19 = vunpack.c.h.bf16 %v1883_v17  ;;  %v374_v31 = vld [vmem:[%s1907_s14 + $0x8] sm:$0xf]  ;;  %v1625_v32 = vld [vmem:[%s1907_s14] sm:$0xff]  }
  0x1b   : > { %v336_v6 = vsel %vm323_vm0, %v1610_v3, 0.0  ;;  %v330_v7 = vsel %vm323_vm0, %v1606_v4, 0.0  ;;  %v324_v8 = vsel %vm323_vm0, %v1602_v5, 0.0  ;;  %v339_v13 = vsel %vm323_vm0, %v1611_v9, 0.0  ;;  %s2483_s23 = scalar_lea.vmem %s2589_s6, %s1639_s18 }
  0x1c   : > { %337 = vadd.xlane.f32.xlu2 %v336_v6  ;;  %331 = vadd.xlane.f32.xlu1 %v330_v7  ;;  %v333_v14 = vsel %vm323_vm0, %v1607_v10, 0.0  ;;  %v327_v15 = vsel %vm323_vm0, %v1603_v11, 0.0  ;;  %v1614_v20 = vunpack.c.l.bf16 %v1883_v17  ;;  %v348_v21 = vsel %vm323_vm0, %v1618_v18, 0.0 }
  0x1d   : > { %325 = vadd.xlane.f32.xlu0 %v324_v8  ;;  %v345_v22 = vsel %vm323_vm0, %v1615_v19, 0.0  ;;  %v1623_v25 = vunpack.c.h.bf16 %v1898_v24  ;;  %v1622_v26 = vunpack.c.l.bf16 %v1898_v24  ;;  %v2590_v27 = vunpack.c.h.bf16 %v1880_v16 }
  0x1e   : > { %v342_v23 = vsel %vm323_vm0, %v1614_v20, 0.0  ;;  %v377_v33 = vunpack.c.l.bf16 %v374_v31  ;;  %v1627_v34 = vunpack.c.h.bf16 %v1625_v32  ;;  %v1626_v35 = vunpack.c.l.bf16 %v1625_v32 }
  0x1f   : > { %v357_v28 = vsel %vm323_vm0, %v1623_v25, 0.0  ;;  %v354_v29 = vsel %vm323_vm0, %v1622_v26, 0.0  ;;  %v351_v30 = vsel %vm323_vm0, %v2590_v27, 0.0  ;;  %v1950_v6 = vstv %s1579_s29 }
  0x20   : > { %v384_v36 = vsel %vm323_vm0, %v377_v33, 0.0  ;;  %v381_v37 = vsel %vm323_vm0, %v1627_v34, 0.0  ;;  %v378_v38 = vsel %vm323_vm0, %v1626_v35, 0.0  ;;  %v1953_v8 = vstv %s1580_s30 }
  0x24   : > { %340 = vadd.xlane.f32.xlu2 %v339_v13  ;;  %334 = vadd.xlane.f32.xlu1 %v333_v14  ;;  %v1955_v13 = vstv %s441_s7 }
  0x25   : > { %328 = vadd.xlane.f32.xlu0 %v327_v15 }
  0x2c   : > { %349 = vadd.xlane.f32.xlu2 %v348_v21  ;;  %346 = vadd.xlane.f32.xlu1 %v345_v22 }
  0x2d   : > { %343 = vadd.xlane.f32.xlu0 %v342_v23 }
  0x34   : > { %358 = vadd.xlane.f32.xlu2 %v357_v28  ;;  %355 = vadd.xlane.f32.xlu1 %v354_v29 }
  0x35   : > { %352 = vadd.xlane.f32.xlu0 %v351_v30 }
  0x3c   : > { %385 = vadd.xlane.f32.xlu2 %v384_v36  ;;  %382 = vadd.xlane.f32.xlu1 %v381_v37 }
  0x3d   : > { %379 = vadd.xlane.f32.xlu0 %v378_v38 }
  0x51   : > { %1191 = vperm.xlu0 %1672, %v1022_v44  }
  0x54   : > { %1200 = vperm.xlu2 %1673, %v1023_v48  }
  0x55   : > { %1182 = vperm.xlu1 %1671, %v1021_v40  }
  0x59   : > { %1218 = vperm.xlu0 %1672, %v1025_v50  }
  0x5c   : > { %1227 = vperm.xlu2 %1673, %v1026_v57  }
  0x5d   : > { %1209 = vperm.xlu1 %1671, %v1024_v43  }
  0x61   : > { %1245 = vperm.xlu0 %1672, %v1028_v60  }
  0x65   : > { %1236 = vperm.xlu1 %1671, %v1027_v49  }
  0x6d   : > { %1263 = vperm.xlu1 %1671, %v1030_v58  }
  0x8f   : > { %v338_v51 = vpop.xlane.xlu2 %337  ;;  %v332_v52 = vpop.xlane.xlu1 %331 }
  0x90   : > { %v326_v56 = vpop.xlane.xlu0 %325  ;;  %v364_v61 = vmul.f32 0.0625, %v338_v51  ;;  %v362_v63 = vmul.f32 0.0625, %v332_v52 }
  0x91   : > { %v360_v59 = vmul.f32 0.0625, %v326_v56 }
  0x92   : > { %v410_v12 = vrot.slane %v364_v61, 7  ;;  %v406_v21 = vrot.slane %v362_v63, 7 }
  0x93   : > { %v403_v62 = vrot.slane %v360_v59, 7 }
  0x95   : > { %v439_v7 = vsel %vm402_vm1, 0.0, %v403_v62 }
  0x96   : > { %v457_v22 = vmul.f32 %v1950_v6, %v439_v7  ;;  %v535_v30 = vmul.f32 %v1953_v8, %v439_v7  ;;  %v443_v34 = vmul.f32 %v1955_v13, %v439_v7 }
  0x97   : > { %v341_v14 = vpop.xlane.xlu2 %340  ;;  %v335_v15 = vpop.xlane.xlu1 %334 }
  0x98   : > { %v1958_v23 = vmul.f32 0.0625, %v341_v14  ;;  %v363_v28 = vmul.f32 0.0625, %v335_v15  ;;  %v329_v29 = vpop.xlane.xlu0 %328  ;;  %v484_v36 = vrot.slane %v457_v22, 1  ;;  %v562_v40 = vrot.slane %v535_v30, 2 }
  0x99   : > { %v361_v31 = vmul.f32 0.0625, %v329_v29 }
  0x9a   : > { %v412_v32 = vrot.slane %v1958_v23, 7  ;;  %v408_v33 = vrot.slane %v363_v28, 7 }
  0x9b   : > { %v404_v35 = vrot.slane %v361_v31, 7 }
  0x9c   : > { %v1966_v37 = vsel %vm402_vm1, %v410_v12, %v412_v32  ;;  %v409_v38 = vsel %vm402_vm1, %v406_v21, %v408_v33  ;;  %v411_v39 = vsel %vm402_vm1, %v408_v33, %v410_v12 }
  0x9d   : > { %v1972_v41 = vmul.f32 %v1950_v6, %v1966_v37  ;;  %v1976_v42 = vmul.f32 %v1953_v8, %v1966_v37  ;;  %v446_v43 = vmul.f32 %v1955_v13, %v409_v38  ;;  %v447_v44 = vmul.f32 %v1955_v13, %v411_v39 }
  0x9e   : > { %v460_v45 = vmul.f32 %v1950_v6, %v409_v38  ;;  %v461_v46 = vmul.f32 %v1950_v6, %v411_v39  ;;  %v538_v47 = vmul.f32 %v1953_v8, %v409_v38  ;;  %v539_v50 = vmul.f32 %v1953_v8, %v411_v39 }
  0x9f   : > { %v493_v48 = vrot.slane %v1972_v41, 1  ;;  %v571_v49 = vrot.slane %v1976_v42, 2  ;;  %v405_v51 = vsel %vm402_vm1, %v403_v62, %v404_v35  ;;  %v350_v52 = vpop.xlane.xlu2 %349  ;;  %v407_v56 = vsel %vm402_vm1, %v404_v35, %v406_v21  ;;  %v347_v61 = vpop.xlane.xlu1 %346 }
  0xa0   : > { %v489_v53 = vrot.slane %v460_v45, 1  ;;  %v491_v54 = vrot.slane %v461_v46, 1  ;;  %v567_v55 = vrot.slane %v538_v47, 2  ;;  %v569_v57 = vrot.slane %v539_v50, 2  ;;  %v344_v47 = vpop.xlane.xlu0 %343 }
  0xa1   : > { %v444_v58 = vmul.f32 %v1955_v13, %v405_v51  ;;  %v445_v59 = vmul.f32 %v1955_v13, %v407_v56  ;;  %v458_v60 = vmul.f32 %v1950_v6, %v405_v51  ;;  %v459_v7 = vmul.f32 %v1950_v6, %v407_v56 }
  0xa2   : > { %v492_v63 = vsel %vm483_vm2, %v489_v53, %v491_v54  ;;  %v494_v62 = vsel %vm483_vm2, %v491_v54, %v493_v48  ;;  %v536_v12 = vmul.f32 %v1953_v8, %v405_v51  ;;  %v570_v21 = vsel %vm561_vm3, %v567_v55, %v569_v57 }
  0xa3   : > { %v524_v14 = vadd.f32 %v492_v63, %v446_v43  ;;  %v525_v15 = vadd.f32 %v494_v62, %v447_v44  ;;  %v572_v22 = vsel %vm561_vm3, %v569_v57, %v571_v49  ;;  %v485_v28 = vrot.slane %v458_v60, 1 }
  0xa4   : > { %v487_v29 = vrot.slane %v459_v7, 1  ;;  %v537_v30 = vmul.f32 %v1953_v8, %v407_v56  ;;  %v563_v31 = vrot.slane %v536_v12, 2  ;;  %v2002_v38 = vmul.f32 0.0625, %v350_v52 }
  0xa5   : > { %v602_v33 = vadd.f32 %v570_v21, %v524_v14  ;;  %v603_v35 = vadd.f32 %v572_v22, %v525_v15  ;;  %v367_v39 = vmul.f32 0.0625, %v347_v61  ;;  %v486_v45 = vsel %vm483_vm2, %v484_v36, %v485_v28 }
  0xa6   : > { %v488_v43 = vsel %vm483_vm2, %v485_v28, %v487_v29  ;;  %v490_v44 = vsel %vm483_vm2, %v487_v29, %v489_v53  ;;  %v564_v46 = vsel %vm561_vm3, %v562_v40, %v563_v31  ;;  %v521_v54 = vadd.f32 %v486_v45, %v443_v34 }
  0xa7   : > { %v1584_v50 = vmul.f32 -1.442695, %v602_v33  ;;  %v1585_v51 = vmul.f32 -1.442695, %v603_v35  ;;  %v522_v57 = vadd.f32 %v488_v43, %v444_v58  ;;  %v359_v56 = vpop.xlane.xlu2 %358  ;;  %v523_v60 = vadd.f32 %v490_v44, %v445_v59  ;;  %v356_v15 = vpop.xlane.xlu1 %355 }
  0xa8   : > { %v565_v63 = vrot.slane %v537_v30, 2  ;;  %v418_v52 = vrot.slane %v2002_v38, 7  ;;  %v416_v62 = vrot.slane %v367_v39, 7  ;;  %v599_v61 = vadd.f32 %v564_v46, %v521_v54 }
  0xa9   : > { %1674 = vpow2.f32 %v1584_v50  ;;  %v366_v36 = vmul.f32 0.0625, %v344_v47  ;;  %v2009_v7 = vmul.f32 0.0625, %v359_v56  ;;  %v448_v58 = vmul.f32 %v1955_v13, %v1966_v37 }
  0xaa   : > { %1676 = vpow2.f32 %v1585_v51  ;;  %v566_v53 = vsel %vm561_vm3, %v563_v31, %v565_v63  ;;  %v568_v40 = vsel %vm561_vm3, %v565_v63, %v567_v55  ;;  %v419_v34 = vsel %vm402_vm1, %v416_v62, %v418_v52 }
  0xab   : > { %v600_v59 = vadd.f32 %v566_v53, %v522_v57  ;;  %v601_v12 = vadd.f32 %v568_v40, %v523_v60  ;;  %v1581_v14 = vmul.f32 -1.442695, %v599_v61  ;;  %v2019_v21 = vmul.f32 %v1955_v13, %v419_v34  ;;  %v353_v61 = vpop.xlane.xlu0 %352 }
  0xac   : > { %v2022_v22 = vmul.f32 %v1950_v6, %v419_v34  ;;  %v2025_v28 = vmul.f32 %v1953_v8, %v419_v34  ;;  %v414_v55 = vrot.slane %v366_v36, 7  ;;  %v424_v31 = vrot.slane %v2009_v7, 7 }
  0xad   : > { %1678 = vpow2.f32 %v1581_v14  ;;  %v1582_v29 = vmul.f32 -1.442695, %v600_v59  ;;  %v1583_v30 = vmul.f32 -1.442695, %v601_v12  ;;  %v2033_v39 = vmul.f32 0.0625, %v356_v15 }
  0xae   : > { %v499_v37 = vrot.slane %v2022_v22, 1  ;;  %v415_v33 = vsel %vm402_vm1, %v412_v32, %v414_v55  ;;  %v417_v35 = vsel %vm402_vm1, %v414_v55, %v416_v62  ;;  %v577_v43 = vrot.slane %v2025_v28, 2 }
  0xaf   : > { %v1675_v45 = vpop.eup %1674  ;;  %1680 = vpow2.f32 %v1582_v29  ;;  %v450_v44 = vmul.f32 %v1955_v13, %v417_v35  ;;  %v463_v46 = vmul.f32 %v1950_v6, %v415_v33  ;;  %v464_v23 = vmul.f32 %v1950_v6, %v417_v35 }
  0xb0   : > { %v1677_v47 = vpop.eup %1676  ;;  %v2038_v50 = vadd.f32 1.0, %v1675_v45  ;;  %1682 = vpow2.f32 %v1583_v30  ;;  %v541_v32 = vmul.f32 %v1953_v8, %v415_v33  ;;  %v542_v57 = vmul.f32 %v1953_v8, %v417_v35 }
  0xb1   : > { %v2042_v51 = vadd.f32 1.0, %v1677_v47  ;;  %v495_v54 = vrot.slane %v463_v46, 1  ;;  %v440_v56 = vsel %vm402_vm1, %v424_v31, 0.0  ;;  %v449_v60 = vmul.f32 %v1955_v13, %v415_v33  ;;  %v984_v47 = vld [vmem:[%s2586_s3 + $0x40] sm:$0xff] }
  0xb2   : > { %1684 = vrcp.f32 %v2038_v50  ;;  %v497_v63 = vrot.slane %v464_v23, 1  ;;  %v573_v62 = vrot.slane %v541_v32, 2  ;;  %v575_v40 = vrot.slane %v542_v57, 2  ;;  %v986_v23 = vld [vmem:[%s2586_s3 + $0x50] sm:$0xff] }
  0xb3   : > { %v1679_v36 = vpop.eup %1678  ;;  %1686 = vrcp.f32 %v2042_v51  ;;  %v496_v53 = vsel %vm483_vm2, %v493_v48, %v495_v54  ;;  %v2055_v34 = vmul.f32 %v1950_v6, %v440_v56  ;;  %v547_v30 = vmul.f32 %v1953_v8, %v440_v56 }
  0xb4   : > { %v2057_v59 = vadd.f32 1.0, %v1679_v36  ;;  %v498_v12 = vsel %vm483_vm2, %v495_v54, %v497_v63  ;;  %v500_v14 = vsel %vm483_vm2, %v497_v63, %v499_v37  ;;  %v526_v15 = vadd.f32 %v496_v53, %v448_v58 }
  0xb5   : > { %v1681_v55 = vpop.eup %1680  ;;  %v527_v29 = vadd.f32 %v498_v12, %v449_v60  ;;  %v528_v41 = vadd.f32 %v500_v14, %v450_v44  ;;  %v574_v48 = vsel %vm561_vm3, %v571_v49, %v573_v62  ;;  %v576_v45 = vsel %vm561_vm3, %v573_v62, %v575_v40  ;;  %v386_v14 = vpop.xlane.xlu2 %385 }
  0xb6   : > { %v1683_v33 = vpop.eup %1682  ;;  %v2071_v35 = vadd.f32 1.0, %v1681_v55  ;;  %v578_v58 = vsel %vm561_vm3, %v575_v40, %v577_v43  ;;  %v604_v46 = vadd.f32 %v574_v48, %v526_v15  ;;  %1688 = vrcp.f32 %v2057_v59  ;;  %v383_v55 = vpop.xlane.xlu1 %382 }
  0xb7   : > { %v2079_v44 = vadd.f32 1.0, %v1683_v33  ;;  %v605_v42 = vadd.f32 %v576_v45, %v527_v29  ;;  %v606_v49 = vadd.f32 %v578_v58, %v528_v41  ;;  %v507_v57 = vrot.slane %v2055_v34, 1 }
  0xb8   : > { %v2088_v32 = vpop.eup %1684  ;;  %1690 = vrcp.f32 %v2071_v35  ;;  %v1586_v54 = vmul.f32 -1.442695, %v604_v46  ;;  %v422_v56 = vrot.slane %v2033_v39, 7  ;;  %v369_v36 = vmul.f32 0.0625, %v353_v61 }
  0xb9   : > { %v2093_v60 = vpop.eup %1686  ;;  %1692 = vrcp.f32 %v2079_v44  ;;  %v1587_v63 = vmul.f32 -1.442695, %v605_v42  ;;  %v1588_v62 = vmul.f32 -1.442695, %v606_v49  ;;  %v1029_v40 = vpack.c.bf16 %v984_v47, %v984_v47 }
  0xba   : > { %1694 = vpow2.f32 %v1586_v54  ;;  %v425_v53 = vsel %vm402_vm1, %v422_v56, %v424_v31  ;;  %v1031_v12 = vpack.c.bf16 %v986_v23, %v986_v23  ;;  %v585_v34 = vrot.slane %v547_v30, 2  ;;  %v380_v31 = vpop.xlane.xlu0 %379 }
  0xbb   : > { %1696 = vpow2.f32 %v1587_v63  ;;  %v468_v39 = vmul.f32 %v1950_v6, %v425_v53  ;;  %v546_v15 = vmul.f32 %v1953_v8, %v425_v53  ;;  %v454_v61 = vmul.f32 %v1955_v13, %v425_v53  ;;  %1254 = vperm.xlu2 %1673, %v1029_v40  }
  0xbc   : > { %1698 = vpow2.f32 %v1588_v62  ;;  %v420_v29 = vrot.slane %v369_v36, 7  ;;  %1272 = vperm.xlu0 %1672, %v1031_v12   ;;  %v2103_v7 = vstv %s2063_s15  ;;  %v2105_v41 = vpop.eup %1688  ;;  %v2108_v30 = vstv %s2069_s16 }
  0xbd   : > { %v505_v48 = vrot.slane %v468_v39, 1  ;;  %v583_v33 = vrot.slane %v546_v15, 2  ;;  %v389_v45 = vmul.f32 0.0625, %v386_v14  ;;  %v2116_v49 = vmul.f32 0.0625, %v383_v55 }
  0xbe   : > { %v2110_v58 = vpop.eup %1690  ;;  %v421_v46 = vsel %vm402_vm1, %v418_v52, %v420_v29  ;;  %v423_v42 = vsel %vm402_vm1, %v420_v29, %v422_v56  ;;  %v2119_v47 = vstv %s2077_s17  ;;  %v2126_v36 = vmul.f32 0.0625, %v380_v31 }
  0xbf   : > { %v2121_v23 = vpop.eup %1692  ;;  %v508_v54 = vsel %vm483_vm2, %v505_v48, %v507_v57  ;;  %v586_v63 = vsel %vm561_vm3, %v583_v33, %v585_v34  ;;  %v452_v62 = vmul.f32 %v1955_v13, %v421_v46  ;;  %v466_v52 = vmul.f32 %v1950_v6, %v421_v46 }
  0xc0   : > { %v1695_v53 = vpop.eup %1694  ;;  %v532_v38 = vadd.f32 %v508_v54, %v454_v61  ;;  %v467_v56 = vmul.f32 %v1950_v6, %v423_v42  ;;  %v544_v40 = vmul.f32 %v1953_v8, %v421_v46  ;;  %v453_v39 = vmul.f32 %v1955_v13, %v423_v42 }
  0xc1   : > { %v1697_v12 = vpop.eup %1696  ;;  %v2131_v14 = vadd.f32 1.0, %v1695_v53  ;;  %v545_v57 = vmul.f32 %v1953_v8, %v423_v42  ;;  %v845_v34 = vrot.slane %v389_v45, 7  ;;  %v501_v31 = vrot.slane %v466_v52, 1 }
  0xc2   : > { %v1699_v15 = vpop.eup %1698  ;;  %v2135_v55 = vadd.f32 1.0, %v1697_v12  ;;  %v610_v29 = vadd.f32 %v586_v63, %v532_v38  ;;  %v503_v61 = vrot.slane %v467_v56, 1  ;;  %v579_v27 = vrot.slane %v544_v40, 2 }
  0xc3   : > { %v2137_v54 = vadd.f32 1.0, %v1699_v15  ;;  %v581_v6 = vrot.slane %v545_v57, 2  ;;  %v843_v46 = vrot.slane %v2116_v49, 7  ;;  %1700 = vrcp.f32 %v2131_v14 }
  0xc4   : > { %v1592_v53 = vmul.f32 -1.442695, %v610_v29  ;;  %v502_v8 = vsel %vm483_vm2, %v499_v37, %v501_v31  ;;  %v504_v13 = vsel %vm483_vm2, %v501_v31, %v503_v61  ;;  %1702 = vrcp.f32 %v2135_v55 }
  0xc5   : > { %v506_v45 = vsel %vm483_vm2, %v503_v61, %v505_v48  ;;  %v529_v42 = vadd.f32 %v502_v8, %v2019_v21  ;;  %v530_v63 = vadd.f32 %v504_v13, %v452_v62  ;;  %v580_v49 = vsel %vm561_vm3, %v577_v43, %v579_v27 }
  0xc6   : > { %1704 = vpow2.f32 %v1592_v53  ;;  %v531_v38 = vadd.f32 %v506_v45, %v453_v39  ;;  %v582_v52 = vsel %vm561_vm3, %v579_v27, %v581_v6  ;;  %v584_v22 = vsel %vm561_vm3, %v581_v6, %v583_v33  ;;  %v987_v27 = vld [vmem:[%s2586_s3 + $0x58] sm:$0xff] }
  0xc7   : > { %v607_v37 = vadd.f32 %v580_v49, %v529_v42  ;;  %v608_v56 = vadd.f32 %v582_v52, %v530_v63  ;;  %v852_v40 = vsel %vm402_vm1, %v845_v34, 0.0  ;;  %v846_v62 = vsel %vm402_vm1, %v843_v46, %v845_v34 }
  0xc8   : > { %v609_v12 = vadd.f32 %v584_v22, %v531_v38  ;;  %v863_v48 = vmul.f32 %v2103_v7, %v852_v40  ;;  %v886_v21 = vmul.f32 %v2108_v30, %v852_v40  ;;  %v862_v28 = vmul.f32 %v2103_v7, %v846_v62 }
  0xc9   : > { %v1589_v39 = vmul.f32 -1.442695, %v607_v37  ;;  %v1590_v57 = vmul.f32 -1.442695, %v608_v56  ;;  %v885_v43 = vmul.f32 %v2108_v30, %v846_v62  ;;  %v2162_v33 = vpop.eup %1700  ;;  %v857_v61 = vmul.f32 %v2119_v47, %v846_v62 }
  0xca   : > { %v1591_v15 = vmul.f32 -1.442695, %v609_v12  ;;  %v873_v29 = vrot.slane %v863_v48, 1  ;;  %v896_v31 = vrot.slane %v886_v21, 2  ;;  %v2165_v6 = vpop.eup %1702  ;;  %v871_v34 = vrot.slane %v862_v28, 1 }
  0xcb   : > { %1706 = vpow2.f32 %v1589_v39  ;;  %v894_v53 = vrot.slane %v885_v43, 2  ;;  %v842_v8 = vrot.slane %v2126_v36, 7  ;;  %v1032_v45 = vpack.c.bf16 %v987_v27, %v987_v27 }
  0xcc   : > { %v1705_v13 = vpop.eup %1704  ;;  %1708 = vpow2.f32 %v1590_v57  ;;  %v690_v42 = vmul.f32 %v2121_v23, %v2079_v44  ;;  %v874_v38 = vsel %vm483_vm2, %v871_v34, %v873_v29  ;;  %vm694_vm4 = vweird.f32 %v2079_v44 }
  0xcd   : > { %1710 = vpow2.f32 %v1591_v15  ;;  %v897_v63 = vsel %vm561_vm3, %v894_v53, %v896_v31  ;;  %v880_v49 = vadd.f32 %v874_v38, %v857_v61  ;;  %v844_v52 = vsel %vm402_vm1, %v842_v8, %v843_v46  ;;  %1281 = vperm.xlu2 %1673, %v1032_v45  }
  0xce   : > { %v851_v22 = vsel %vm402_vm1, 0.0, %v842_v8  ;;  %v691_v37 = vsub.f32 1.0, %v690_v42  ;;  %1712 = vrcp.f32 %v2137_v54  ;;  %v2175_v36 = vadd.f32 1.0, %v1705_v13 }
  0xcf   : > { %v860_v56 = vmul.f32 %v2103_v7, %v851_v22  ;;  %v903_v40 = vadd.f32 %v897_v63, %v880_v49  ;;  %v861_v12 = vmul.f32 %v2103_v7, %v844_v52  ;;  %v883_v48 = vmul.f32 %v2108_v30, %v851_v22 }
  0xd0   : > { %v884_v21 = vmul.f32 %v2108_v30, %v844_v52  ;;  %v855_v62 = vmul.f32 %v2119_v47, %v851_v22  ;;  %v856_v39 = vmul.f32 %v2119_v47, %v844_v52  ;;  %v692_v28 = vmul.f32 %v2121_v23, %v691_v37  ;;  %v961_v22 = vld [vmem:[%s2585_s2] sm:$0xff] }
  0xd1   : > { %v1707_v46 = vpop.eup %1706  ;;  %v868_v57 = vrot.slane %v860_v56, 1  ;;  %v869_v15 = vrot.slane %v861_v12, 1  ;;  %v891_v29 = vrot.slane %v883_v48, 2  ;;  %vm695_vm5 = vweird.f32 %v2121_v23 }
  0xd2   : > { %v1709_v43 = vpop.eup %1708  ;;  %v2185_v27 = vadd.f32 1.0, %v1707_v46  ;;  %1714 = vrcp.f32 %v2175_v36  ;;  %v1597_v31 = vmul.f32 -1.442695, %v903_v40  ;;  %v892_v30 = vrot.slane %v884_v21, 2  ;;  %vm2204_vm6 = vmor %vm694_vm4, %vm695_vm5  ;;  %v963_v46 = vld [vmem:[%s2585_s2 + $0x10] sm:$0xff] }
  0xd3   : > { %v1711_v7 = vpop.eup %1710  ;;  %v693_v61 = vadd.f32 %v2121_v23, %v692_v28  ;;  %v2190_v8 = vadd.f32 1.0, %v1709_v43  ;;  %v870_v47 = vsel %vm483_vm2, %v868_v57, %v869_v15  ;;  %v872_v13 = vsel %vm483_vm2, %v869_v15, %v871_v34 }
  0xd4   : > { %v698_v45 = vand.u32 2147483647, %v2079_v44  ;;  %v2195_v42 = vpop.eup %1712  ;;  %v2197_v63 = vadd.f32 1.0, %v1711_v7  ;;  %v878_v38 = vadd.f32 %v870_v47, %v855_v62  ;;  %v879_v49 = vadd.f32 %v872_v13, %v856_v39 }
  0xd5   : > { %v893_v52 = vsel %vm561_vm3, %v891_v29, %v892_v30  ;;  %1716 = vrcp.f32 %v2185_v27  ;;  %v895_v34 = vsel %vm561_vm3, %v892_v30, %v894_v53  ;;  %v697_v37 = vsel %vm2204_vm6, %v2121_v23, %v693_v61 }
  0xd6   : > { %v700_v56 = vand.u32 2147483648, %v2079_v44  ;;  %1718 = vpow2.f32 %v1597_v31  ;;  %v901_v40 = vadd.f32 %v893_v52, %v878_v38  ;;  %v902_v12 = vadd.f32 %v895_v34, %v879_v49 }
  0xd7   : > { %v660_v48 = vmul.f32 %v2105_v41, %v2057_v59  ;;  %1720 = vrcp.f32 %v2190_v8  ;;  %v668_v53 = vand.u32 2147483647, %v2057_v59  ;;  %vm699_vm7 = vcmp.eq.f32.partialorder %v698_v45, 8.507059e+37 }
  0xd8   : > { %v701_v21 = vor.u32 1.1754944e-38, %v700_v56  ;;  %v2221_v62 = vpop.eup %1714  ;;  %1722 = vrcp.f32 %v2197_v63  ;;  %v1596_v44 = vmul.f32 -1.442695, %v902_v12  ;;  %vm664_vm8 = vweird.f32 %v2057_v59 }
  0xd9   : > { %v661_v23 = vsub.f32 1.0, %v660_v48  ;;  %v670_v57 = vand.u32 2147483648, %v2057_v59  ;;  %v675_v28 = vmul.f32 %v2110_v58, %v2071_v35  ;;  %v1595_v43 = vmul.f32 -1.442695, %v901_v40 }
  0xda   : > { %v702_v39 = vsel %vm699_vm7, %v701_v21, %v697_v37  ;;  %vm665_vm9 = vweird.f32 %v2105_v41  ;;  %1724 = vpow2.f32 %v1596_v44  ;;  %vm2232_vm10 = vcmp.eq.f32.partialorder %v668_v53, 8.507059e+37 }
  0xdb   : > { %v993_v15 = vmul.f32 %v963_v46, %v702_v39  ;;  %v662_v29 = vmul.f32 %v2105_v41, %v661_v23  ;;  %v2230_v7 = vpop.eup %1716  ;;  %v676_v30 = vsub.f32 1.0, %v675_v28  ;;  %vm679_vm11 = vweird.f32 %v2071_v35  ;;  %vm666_vm12 = vmor %vm664_vm8, %vm665_vm9  ;;  %v962_v23 = vld [vmem:[%s2585_s2 + $0x8] sm:$0xff] }
  0xdc   : > { %v1719_v61 = vpop.eup %1718  ;;  %v685_v45 = vand.u32 2147483648, %v2071_v35  ;;  %v705_v38 = vmul.f32 %v2088_v32, %v2038_v50  ;;  %v671_v52 = vor.u32 1.1754944e-38, %v670_v57  ;;  %vm680_vm13 = vweird.f32 %v2110_v58 }
  0xdd   : > { %v1005_v47 = vpack.c.bf16 %v993_v15, %v993_v15  ;;  %v663_v13 = vadd.f32 %v2105_v41, %v662_v29  ;;  %v2241_v49 = vpop.eup %1720  ;;  %v677_v34 = vmul.f32 %v2110_v58, %v676_v30  ;;  %v683_v37 = vand.u32 2147483647, %v2071_v35  ;;  %vm681_vm15 = vmor %vm679_vm11, %vm680_vm13 }
  0xde   : > { %v2251_v56 = vpop.eup %1722  ;;  %v2253_v40 = vadd.f32 1.0, %v1719_v61  ;;  %v686_v59 = vor.u32 1.1754944e-38, %v685_v45  ;;  %v706_v48 = vsub.f32 1.0, %v705_v38  ;;  %vm710_vm14 = vweird.f32 %v2088_v32 }
  0xdf   : > { %1056 = vperm.xlu2 %1673, %v1005_v47   ;;  %v667_v12 = vsel %vm666_vm12, %v2105_v41, %v663_v13  ;;  %v678_v46 = vadd.f32 %v2110_v58, %v677_v34  ;;  %v713_v53 = vand.u32 2147483647, %v2038_v50  ;;  %v715_v39 = vand.u32 2147483648, %v2038_v50 }
  0xe0   : > { %v672_v21 = vsel %vm2232_vm10, %v671_v52, %v667_v12  ;;  %v707_v41 = vmul.f32 %v2088_v32, %v706_v48  ;;  %v720_v57 = vmul.f32 %v2093_v60, %v2042_v51  ;;  %v1725_v28 = vpop.eup %1724  ;;  %1726 = vpow2.f32 %v1595_v43 }
  0xe1   : > { %v991_v44 = vmul.f32 %v961_v22, %v672_v21  ;;  %v682_v15 = vsel %vm681_vm15, %v2110_v58, %v678_v46  ;;  %vm684_vm0 = vcmp.eq.f32.partialorder %v683_v37, 8.507059e+37  ;;  %vm709_vm1 = vweird.f32 %v2038_v50  ;;  %v964_v58 = vld [vmem:[%s2585_s2 + $0x18] sm:$0xff] }
  0xe2   : > { %v2272_v35 = vadd.f32 1.0, %v1725_v28  ;;  %v687_v31 = vsel %vm684_vm0, %v686_v59, %v682_v15  ;;  %v708_v30 = vadd.f32 %v2088_v32, %v707_v41  ;;  %1728 = vrcp.f32 %v2253_v40  ;;  %vm711_vm2 = vmor %vm709_vm1, %vm710_vm14 }
  0xe3   : > { %v1003_v29 = vpack.c.bf16 %v991_v44, %v991_v44  ;;  %v992_v61 = vmul.f32 %v962_v23, %v687_v31  ;;  %v716_v47 = vor.u32 1.1754944e-38, %v715_v39  ;;  %v721_v43 = vsub.f32 1.0, %v720_v57 }
  0xe4   : > { %v712_v50 = vsel %vm711_vm2, %v2088_v32, %v708_v30  ;;  %vm714_vm3 = vcmp.eq.f32.partialorder %v713_v53, 8.507059e+37  ;;  %vm725_vm4 = vweird.f32 %v2093_v60  ;;  %v728_v13 = vand.u32 2147483647, %v2042_v51 }
  0xe5   : > { %1038 = vperm.xlu0 %1672, %v1003_v29   ;;  %v1004_v45 = vpack.c.bf16 %v992_v61, %v992_v61  ;;  %v717_v38 = vsel %vm714_vm3, %v716_v47, %v712_v50  ;;  %v722_v52 = vmul.f32 %v2093_v60, %v721_v43  ;;  %v730_v22 = vand.u32 2147483648, %v2042_v51 }
  0xe6   : > { %1730 = vrcp.f32 %v2272_v35  ;;  %v994_v34 = vmul.f32 %v964_v58, %v717_v38  ;;  %vm724_vm5 = vweird.f32 %v2042_v51  ;;  %v765_v37 = vmul.f32 %v2195_v42, %v2137_v54  ;;  %v2290_v32 = vpop.eup %1726  ;;  %v965_v51 = vld [vmem:[%s2585_s2 + $0x20] sm:$0xff] }
  0xe7   : > { %1047 = vperm.xlu1 %1671, %v1004_v45   ;;  %v723_v12 = vadd.f32 %v2093_v60, %v722_v52  ;;  %vm729_vm6 = vcmp.eq.f32.partialorder %v728_v13, 8.507059e+37  ;;  %v731_v59 = vor.u32 1.1754944e-38, %v730_v22  ;;  %v773_v48 = vand.u32 2147483647, %v2137_v54  ;;  %vm726_vm7 = vmor %vm724_vm5, %vm725_vm4  ;;  %v968_v13 = vld [vmem:[%s2585_s2 + $0x38] sm:$0xff] }
  0xe8   : > { %v1006_v21 = vpack.c.bf16 %v994_v34, %v994_v34  ;;  %v766_v46 = vsub.f32 1.0, %v765_v37  ;;  %v775_v53 = vand.u32 2147483648, %v2137_v54  ;;  %v735_v44 = vmul.f32 %v2162_v33, %v2131_v14  ;;  %v2302_v23 = vpop.eup %1728 }
  0xe9   : > { %v727_v41 = vsel %vm726_vm7, %v2093_v60, %v723_v12  ;;  %vm769_vm8 = vweird.f32 %v2137_v54  ;;  %vm770_vm9 = vweird.f32 %v2195_v42  ;;  %vm2307_vm10 = vcmp.eq.f32.partialorder %v773_v48, 8.507059e+37 }
  0xea   : > { %1065 = vperm.xlu2 %1673, %v1006_v21   ;;  %v732_v57 = vsel %vm729_vm6, %v731_v59, %v727_v41  ;;  %v767_v28 = vmul.f32 %v2195_v42, %v766_v46  ;;  %v736_v15 = vsub.f32 1.0, %v735_v44  ;;  %vm739_vm11 = vweird.f32 %v2131_v14  ;;  %vm771_vm13 = vmor %vm769_vm8, %vm770_vm9 }
  0xeb   : > { %v995_v29 = vmul.f32 %v965_v51, %v732_v57  ;;  %vm740_vm12 = vweird.f32 %v2162_v33  ;;  %v745_v60 = vand.u32 2147483648, %v2131_v14  ;;  %v750_v31 = vmul.f32 %v2165_v6, %v2135_v55 }
  0xec   : > { %v2317_v30 = vpop.eup %1730  ;;  %v768_v61 = vadd.f32 %v2195_v42, %v767_v28  ;;  %v776_v47 = vor.u32 1.1754944e-38, %v775_v53  ;;  %v737_v58 = vmul.f32 %v2162_v33, %v736_v15  ;;  %v743_v43 = vand.u32 2147483647, %v2131_v14  ;;  %vm741_vm0 = vmor %vm739_vm11, %vm740_vm12 }
  0xed   : > { %v1007_v50 = vpack.c.bf16 %v995_v29, %v995_v29  ;;  %v751_v45 = vsub.f32 1.0, %v750_v31  ;;  %vm754_vm14 = vweird.f32 %v2135_v55  ;;  %vm755_vm15 = vweird.f32 %v2165_v6 }
  0xee   : > { %v772_v38 = vsel %vm771_vm13, %v2195_v42, %v768_v61  ;;  %v738_v52 = vadd.f32 %v2162_v33, %v737_v58  ;;  %v758_v22 = vand.u32 2147483647, %v2135_v55  ;;  %v760_v34 = vand.u32 2147483648, %v2135_v55  ;;  %v966_v42 = vld [vmem:[%s2585_s2 + $0x28] sm:$0xff]  ;;  %vm756_vm3 = vmor %vm754_vm14, %vm755_vm15 }
  0xef   : > { %1074 = vperm.xlu1 %1671, %v1007_v50   ;;  %v777_v54 = vsel %vm2307_vm10, %v776_v47, %v772_v38  ;;  %v746_v37 = vor.u32 1.1754944e-38, %v745_v60  ;;  %v752_v12 = vmul.f32 %v2165_v6, %v751_v45  ;;  %v810_v59 = vmul.f32 %v2251_v56, %v2197_v63 }
  0xf0   : > { %v998_v48 = vmul.f32 %v968_v13, %v777_v54  ;;  %v742_v21 = vsel %vm741_vm0, %v2162_v33, %v738_v52  ;;  %vm744_vm1 = vcmp.eq.f32.partialorder %v743_v43, 8.507059e+37  ;;  %vm2348_vm2 = vcmp.eq.f32.partialorder %v758_v22, 8.507059e+37  ;;  %v967_v33 = vld [vmem:[%s2585_s2 + $0x30] sm:$0xff] }
  0xf1   : > { %v747_v14 = vsel %vm744_vm1, %v746_v37, %v742_v21  ;;  %v753_v46 = vadd.f32 %v2165_v6, %v752_v12  ;;  %v761_v53 = vor.u32 1.1754944e-38, %v760_v34  ;;  %v811_v44 = vsub.f32 1.0, %v810_v59  ;;  %v969_v12 = vld [vmem:[%s2585_s2 + $0x40] sm:$0xff] }
  0xf2   : > { %v1010_v41 = vpack.c.bf16 %v998_v48, %v998_v48  ;;  %v996_v39 = vmul.f32 %v966_v42, %v747_v14  ;;  %v818_v57 = vand.u32 2147483647, %v2197_v63  ;;  %v820_v28 = vand.u32 2147483648, %v2197_v63 }
  0xf3   : > { %v757_v15 = vsel %vm756_vm3, %v2165_v6, %v753_v46  ;;  %v812_v29 = vmul.f32 %v2251_v56, %v811_v44  ;;  %vm815_vm4 = vweird.f32 %v2251_v56  ;;  %v780_v60 = vmul.f32 %v2230_v7, %v2185_v27 }
  0xf4   : > { %v2368_v55 = vadd.f32 1.0, %v2290_v32  ;;  %1101 = vperm.xlu0 %1672, %v1010_v41   ;;  %v1008_v31 = vpack.c.bf16 %v996_v39, %v996_v39  ;;  %v762_v61 = vsel %vm2348_vm2, %v761_v53, %v757_v15  ;;  %vm814_vm5 = vweird.f32 %v2197_v63  ;;  %v971_v32 = vld [vmem:[%s2585_s2 + $0x50] sm:$0xff]  ;;  %v970_v39 = vld [vmem:[%s2585_s2 + $0x48] sm:$0xff] }
  0xf5   : > { %v997_v47 = vmul.f32 %v967_v33, %v762_v61  ;;  %v813_v6 = vadd.f32 %v2251_v56, %v812_v29  ;;  %vm819_vm6 = vcmp.eq.f32.partialorder %v818_v57, 8.507059e+37  ;;  %v781_v58 = vsub.f32 1.0, %v780_v60  ;;  %vm816_vm7 = vmor %vm814_vm5, %vm815_vm4 }
  0xf6   : > { %1083 = vperm.xlu2 %1673, %v1008_v31   ;;  %v821_v43 = vor.u32 1.1754944e-38, %v820_v28  ;;  %vm785_vm8 = vweird.f32 %v2230_v7  ;;  %v790_v50 = vand.u32 2147483648, %v2185_v27  ;;  %v795_v13 = vmul.f32 %v2241_v49, %v2190_v8 }
  0xf7   : > { %v1009_v63 = vpack.c.bf16 %v997_v47, %v997_v47  ;;  %v817_v45 = vsel %vm816_vm7, %v2251_v56, %v813_v6  ;;  %v782_v38 = vmul.f32 %v2230_v7, %v781_v58  ;;  %v788_v52 = vand.u32 2147483647, %v2185_v27  ;;  %v974_v58 = vld [vmem:[%s2585_s2 + $0x68] sm:$0xff] }
  0xf8   : > { %1732 = vrcp.f32 %v2368_v55  ;;  %v822_v22 = vsel %vm819_vm6, %v821_v43, %v817_v45  ;;  %vm784_vm9 = vweird.f32 %v2185_v27  ;;  %v796_v34 = vsub.f32 1.0, %v795_v13 }
  0xf9   : > { %1092 = vperm.xlu1 %1671, %v1009_v63   ;;  %v1001_v54 = vmul.f32 %v971_v32, %v822_v22  ;;  %v783_v37 = vadd.f32 %v2230_v7, %v782_v38  ;;  %vm800_vm10 = vweird.f32 %v2241_v49  ;;  %v805_v42 = vand.u32 2147483648, %v2190_v8  ;;  %vm786_vm11 = vmor %vm784_vm9, %vm785_vm8 }
  0xfa   : > { %v791_v56 = vor.u32 1.1754944e-38, %v790_v50  ;;  %v797_v59 = vmul.f32 %v2241_v49, %v796_v34  ;;  %v803_v27 = vand.u32 2147483647, %v2190_v8  ;;  %v932_v48 = vmul.f32 %v2317_v30, %v2272_v35  ;;  %v972_v34 = vld [vmem:[%s2585_s2 + $0x58] sm:$0xff] }
  0xfb   : > { %v1013_v21 = vpack.c.bf16 %v1001_v54, %v1001_v54  ;;  %v787_v51 = vsel %vm786_vm11, %v2230_v7, %v783_v37  ;;  %vm789_vm12 = vcmp.eq.f32.partialorder %v788_v52, 8.507059e+37  ;;  %vm799_vm13 = vweird.f32 %v2190_v8 }
  0xfc   : > { %v792_v14 = vsel %vm789_vm12, %v791_v56, %v787_v51  ;;  %v798_v46 = vadd.f32 %v2241_v49, %v797_v59  ;;  %v933_v53 = vsub.f32 1.0, %v932_v48  ;;  %vm937_vm14 = vweird.f32 %v2317_v30  ;;  %vm801_vm15 = vmor %vm799_vm13, %vm800_vm10  ;;  %v973_v51 = vld [vmem:[%s2585_s2 + $0x60] sm:$0xff] }
  0xfd   : > { %1128 = vperm.xlu0 %1672, %v1013_v21   ;;  %v999_v44 = vmul.f32 %v969_v12, %v792_v14  ;;  %v806_v41 = vor.u32 1.1754944e-38, %v805_v42  ;;  %v942_v7 = vand.u32 2147483648, %v2272_v35  ;;  %v825_v8 = vmul.f32 %v2221_v62, %v2175_v36 }
  0xfe   : > { %v1733_v33 = vpop.eup %1732  ;;  %v802_v57 = vsel %vm801_vm15, %v2241_v49, %v798_v46  ;;  %vm804_vm0 = vcmp.eq.f32.partialorder %v803_v27, 8.507059e+37  ;;  %v934_v28 = vmul.f32 %v2317_v30, %v933_v53  ;;  %v940_v15 = vand.u32 2147483647, %v2272_v35 }
  0xff   : > { %v1011_v29 = vpack.c.bf16 %v999_v44, %v999_v44  ;;  %v807_v60 = vsel %vm804_vm0, %v806_v41, %v802_v57  ;;  %vm936_vm1 = vweird.f32 %v2272_v35  ;;  %v826_v31 = vsub.f32 1.0, %v825_v8  ;;  %v975_v57 = vld [vmem:[%s2585_s2 + $0x70] sm:$0xff] }
 0x100   : > { %v1000_v61 = vmul.f32 %v970_v39, %v807_v60  ;;  %v935_v47 = vadd.f32 %v2317_v30, %v934_v28  ;;  %vm830_vm2 = vweird.f32 %v2221_v62  ;;  %v835_v6 = vand.u32 2147483648, %v2175_v36  ;;  %vm938_vm3 = vmor %vm936_vm1, %vm937_vm14 }
 0x101   : > { %1110 = vperm.xlu2 %1673, %v1011_v29   ;;  %v943_v49 = vor.u32 1.1754944e-38, %v942_v7  ;;  %v827_v43 = vmul.f32 %v2221_v62, %v826_v31  ;;  %v833_v35 = vand.u32 2147483647, %v2175_v36  ;;  %v917_v32 = vmul.f32 %v1733_v33, %v2368_v55 }
 0x102   : > { %v1012_v50 = vpack.c.bf16 %v1000_v61, %v1000_v61  ;;  %v939_v13 = vsel %vm938_vm3, %v2317_v30, %v935_v47  ;;  %vm941_vm4 = vcmp.eq.f32.partialorder %v940_v15, 8.507059e+37  ;;  %vm829_vm5 = vweird.f32 %v2175_v36  ;;  %v1201_v61 = vpop.permute.xlu2 %1200 }
 0x103   : > { %v944_v63 = vsel %vm941_vm4, %v943_v49, %v939_v13  ;;  %v828_v45 = vadd.f32 %v2221_v62, %v827_v43  ;;  %v918_v38 = vsub.f32 1.0, %v917_v32  ;;  %vm922_vm6 = vweird.f32 %v1733_v33  ;;  %vm831_vm7 = vmor %vm829_vm5, %vm830_vm2  ;;  %v2464_v43 = vpop.permute.xlu0 %1191  ;;  %v1183_v13 = vpop.permute.xlu1 %1182 }
 0x104   : > { %1119 = vperm.xlu1 %1671, %v1012_v50   ;;  %v1016_v52 = vmul.f32 %v974_v58, %v944_v63  ;;  %v836_v22 = vor.u32 1.1754944e-38, %v835_v6  ;;  %v927_v30 = vand.u32 2147483648, %v2368_v55  ;;  %v947_v36 = vmul.f32 %v2302_v23, %v2253_v40  ;;  %v990_v6 = vld [vmem:[%s2586_s3 + $0x70] sm:$0xff] }
 0x105   : > { %v832_v54 = vsel %vm831_vm7, %v2221_v62, %v828_v45  ;;  %vm834_vm8 = vcmp.eq.f32.partialorder %v833_v35, 8.507059e+37  ;;  %v919_v37 = vmul.f32 %v1733_v33, %v918_v38  ;;  %v925_v42 = vand.u32 2147483647, %v2368_v55 }
 0x106   : > { %v1019_v56 = vpack.c.bf16 %v1016_v52, %v1016_v52  ;;  %v837_v12 = vsel %vm834_vm8, %v836_v22, %v832_v54  ;;  %v948_v59 = vsub.f32 1.0, %v947_v36  ;;  %vm921_vm9 = vweird.f32 %v2368_v55  ;;  %v989_v55 = vld [vmem:[%s2586_s3 + $0x68] sm:$0xff] }
 0x107   : > { %v1002_v27 = vmul.f32 %v972_v34, %v837_v12  ;;  %v920_v48 = vadd.f32 %v1733_v33, %v919_v37  ;;  %v928_v21 = vor.u32 1.1754944e-38, %v927_v30  ;;  %vm923_vm10 = vmor %vm921_vm9, %vm922_vm6  ;;  %vm952_vm11 = vweird.f32 %v2302_v23 }
 0x108   : > { %1399 = vperm.xlu0 %1672, %v1019_v56   ;;  %v949_v62 = vmul.f32 %v2302_v23, %v948_v59  ;;  %v955_v14 = vand.u32 2147483647, %v2253_v40  ;;  %v957_v46 = vand.u32 2147483648, %v2253_v40  ;;  %vm926_vm12 = vcmp.eq.f32.partialorder %v925_v42, 8.507059e+37 }
 0x109   : > { %v1014_v53 = vpack.c.bf16 %v1002_v27, %v1002_v27  ;;  %v924_v44 = vsel %vm923_vm10, %v1733_v33, %v920_v48  ;;  %vm951_vm13 = vweird.f32 %v2253_v40  ;;  %v1034_v28 = vpack.c.bf16 %v989_v55, %v989_v55  ;;  %v988_v40 = vld [vmem:[%s2586_s3 + $0x60] sm:$0xff] }
 0x10a   : > { %v929_v41 = vsel %vm926_vm12, %v928_v21, %v924_v44  ;;  %v950_v39 = vadd.f32 %v2302_v23, %v949_v62  ;;  %vm953_vm14 = vmor %vm951_vm13, %vm952_vm11  ;;  %v958_v8 = vor.u32 1.1754944e-38, %v957_v46  ;;  %vm956_vm15 = vcmp.eq.f32.partialorder %v955_v14, 8.507059e+37  ;;  %v1228_v49 = vpop.permute.xlu2 %1227 }
 0x10b   : > { %1137 = vperm.xlu2 %1673, %v1014_v53   ;;  %v1015_v7 = vmul.f32 %v973_v51, %v929_v41  ;;  %v1033_v47 = vpack.c.bf16 %v988_v40, %v988_v40  ;;  %v1783_v32 = vmov 839922192   ;;  %v2471_v52 = vpop.permute.xlu0 %1218  ;;  %v1210_v30 = vpop.permute.xlu1 %1209  ;;  %vm1372_vm0 = vcmask 125952  }
 0x10c   : > { %v954_v33 = vsel %vm953_vm14, %v2302_v23, %v950_v39  ;;  %v1035_v23 = vpack.c.bf16 %v990_v6, %v990_v6  ;;  %v1042_v50 = vunpack.c.l.s4 %v1783_v32 }
 0x10d   : > { %v1018_v15 = vpack.c.bf16 %v1015_v7, %v1015_v7  ;;  %v959_v29 = vsel %vm956_vm15, %v958_v8, %v954_v33 }
 0x10e   : > { %v1017_v60 = vmul.f32 %v975_v57, %v959_v29  ;;  %v2468_v63 = vunpack.c.0.s8 %v1042_v50 }
 0x10f   : > { %1390 = vperm.xlu1 %1671, %v1018_v15  }
 0x110   : > { %1438 = vperm.xlu0 %1672, %v1034_v28   ;;  %v1020_v31 = vpack.c.bf16 %v1017_v60, %v1017_v60  ;;  %v1206_v34 = vperm.slane %v1201_v61, %v2468_v63  ;;  %v1215_v62 = vperm.slane %v1210_v30, %v2468_v63  ;;  %v1233_v15 = vperm.slane %v1228_v49, %v2468_v63 }
 0x112   : > { %v1302_v37 = vunpack.c.l.bf16 %v1206_v34  ;;  %v1303_v53 = vunpack.c.l.bf16 %v1215_v62  ;;  %v1305_v40 = vunpack.c.l.bf16 %v1233_v15  ;;  %v1197_v34 = vperm.slane %v2464_v43, %v2468_v63 }
 0x113   : > { %1408 = vperm.xlu2 %1673, %v1020_v31   ;;  %v2477_v12 = vpop.permute.xlu0 %1245  ;;  %v2485_v21 = vpop.permute.xlu1 %1236 }
 0x115   : > { %v2462_v58 = vpop.permute.xlu2 %1254 }
 0x117   : > { %1429 = vperm.xlu1 %1671, %v1033_v47  }
 0x11b   : > { %1447 = vperm.xlu2 %1673, %v1035_v23   ;;  %v2494_v7 = vpop.permute.xlu1 %1263  ;;  %v1188_v23 = vperm.slane %v1183_v13, %v2468_v63 }
 0x127   : > { %v2466_v35 = vpop.permute.xlu2 %1281 }
 0x12e   : > { %v2492_v55 = vpop.permute.xlu0 %1272 }
 0x12f   : > { %v1278_v17 = vperm.slane %v2492_v55, %v2468_v63 }
 0x139   : > { %v1057_v45 = vpop.permute.xlu2 %1056 }
 0x13a   : > { %v1062_v38 = vperm.slane %v1057_v45, %v2468_v63 }
 0x13c   : > { %v1146_v22 = vunpack.c.l.bf16 %v1062_v38 }
 0x13e   : > { %v1158_v36 = vmul.f32 %v1606_v4, %v1146_v22 }
 0x140   : > { %v1170_v54 = vpack.c.bf16 %v1158_v36, %v1158_v36 }
 0x142   : > { %v1290_v42 = vunpack.c.l.bf16 %v1170_v54  ;;  %v1300_v54 = vunpack.c.l.bf16 %v1188_v23 }
 0x144   : > { %v1314_v56 = vadd.f32 %v1302_v37, %v1290_v42  ;;  %v1066_v59 = vpop.permute.xlu2 %1065  ;;  %v1260_v42 = vperm.slane %v2462_v58, %v2468_v63  ;;  %v1224_v58 = vperm.slane %v2471_v52, %v2468_v63 }
 0x145   : > { %v1071_v48 = vperm.slane %v1066_v59, %v2468_v63 }
 0x146   : > { %v1350_v27 = vmax.f32 %v1314_v56, 0.0 }
 0x147   : > { %v1147_v51 = vunpack.c.l.bf16 %v1071_v48  ;;  %v1301_v48 = vunpack.c.l.bf16 %v1197_v34 }
 0x148   : > { %v1362_v4 = vpack.c.bf16 %v1350_v27, %v1350_v27 }
 0x149   : > { %v1159_v14 = vmul.f32 %v1607_v10, %v1147_v51  ;;  %v1308_v51 = vunpack.c.l.bf16 %v1260_v42 }
 0x14a   : > { %1375 = vst.msk [vmem:[%s2483_s23 + $0x8] sm:$0xf] %vm1372_vm0, %v1362_v4 }
 0x14b   : > { %v1171_v46 = vpack.c.bf16 %v1159_v14, %v1159_v14 }
 0x14d   : > { %v1291_v44 = vunpack.c.l.bf16 %v1171_v46 }
 0x14f   : > { %v1315_v41 = vadd.f32 %v1303_v53, %v1291_v44 }
 0x150   : > { %v1084_v39 = vpop.permute.xlu2 %1083 }
 0x151   : > { %v1351_v8 = vmax.f32 %v1315_v41, 0.0  ;;  %v1089_v57 = vperm.slane %v1084_v39, %v2468_v63 }
 0x153   : > { %v1363_v28 = vpack.c.bf16 %v1351_v8, %v1351_v8  ;;  %v1149_v33 = vunpack.c.l.bf16 %v1089_v57 }
 0x155   : > { %1376 = vst.msk [vmem:[%s2483_s23 + $0xc] sm:$0xf] %vm1372_vm0, %v1363_v28  ;;  %v1161_v1 = vmul.f32 %v1611_v9, %v1149_v33 }
 0x157   : > { %v1039_v10 = vpop.permute.xlu0 %1038  ;;  %v1173_v29 = vpack.c.bf16 %v1161_v1, %v1161_v1 }
 0x158   : > { %v1044_v60 = vperm.slane %v1039_v10, %v2468_v63  ;;  %v1287_v10 = vperm.slane %v2466_v35, %v2468_v63 }
 0x159   : > { %v1293_v31 = vunpack.c.l.bf16 %v1173_v29  ;;  %v1048_v61 = vpop.permute.xlu1 %1047 }
 0x15a   : > { %v1144_v47 = vunpack.c.l.bf16 %v1044_v60  ;;  %v1053_v6 = vperm.slane %v1048_v61, %v2468_v63  ;;  %v1304_v60 = vunpack.c.l.bf16 %v1224_v58  ;;  %v1251_v61 = vperm.slane %v2477_v12, %v2468_v63 }
 0x15b   : > { %v1317_v32 = vadd.f32 %v1305_v40, %v1293_v31  ;;  %v1111_v49 = vpop.permute.xlu2 %1110  ;;  %v1387_v31 = vld [vmem:[%s1907_s14 + $0x8] sm:$0xf] }
 0x15c   : > { %v1156_v50 = vmul.f32 %v1602_v5, %v1144_v47  ;;  %v1145_v45 = vunpack.c.l.bf16 %v1053_v6  ;;  %v1116_v9 = vperm.slane %v1111_v49, %v2468_v63  ;;  %v1311_v49 = vunpack.c.l.bf16 %v1287_v10 }
 0x15d   : > { %v1353_v38 = vmax.f32 %v1317_v32, 0.0  ;;  %v1307_v34 = vunpack.c.l.bf16 %v1251_v61  ;;  %v2599_v10 = vunpack.c.h.bf16 %v1880_v16 }
 0x15e   : > { %v1168_v22 = vpack.c.bf16 %v1156_v50, %v1156_v50  ;;  %v1157_v30 = vmul.f32 %v1603_v11, %v1145_v45  ;;  %v1152_v36 = vunpack.c.l.bf16 %v1116_v9  ;;  %v1417_v45 = vunpack.c.l.bf16 %v1387_v31 }
 0x15f   : > { %v1365_v13 = vpack.c.bf16 %v1353_v38, %v1353_v38 }
 0x160   : > { %v1288_v37 = vunpack.c.l.bf16 %v1168_v22  ;;  %v1169_v56 = vpack.c.bf16 %v1157_v30, %v1157_v30  ;;  %v1164_v5 = vmul.f32 %v1618_v18, %v1152_v36 }
 0x161   : > { %1378 = vst.msk [vmem:[%s2483_s23 + $0x14] sm:$0xf] %vm1372_vm0, %v1365_v13  ;;  %v1075_v27 = vpop.permute.xlu1 %1074 }
 0x162   : > { %v1312_v59 = vadd.f32 %v1300_v54, %v1288_v37  ;;  %v1289_v43 = vunpack.c.l.bf16 %v1169_v56  ;;  %v1176_v2 = vpack.c.bf16 %v1164_v5, %v1164_v5  ;;  %v1080_v11 = vperm.slane %v1075_v27, %v2468_v63 }
 0x164   : > { %v1348_v4 = vmax.f32 %v1312_v59, 0.0  ;;  %v1313_v62 = vadd.f32 %v1301_v48, %v1289_v43  ;;  %v1296_v14 = vunpack.c.l.bf16 %v1176_v2  ;;  %v1148_v46 = vunpack.c.l.bf16 %v1080_v11 }
 0x165   : > { %v1138_v18 = vpop.permute.xlu2 %1137 }
 0x166   : > { %v1360_v53 = vpack.c.bf16 %v1348_v4, %v1348_v4  ;;  %v1349_v44 = vmax.f32 %v1313_v62, 0.0  ;;  %v1320_v41 = vadd.f32 %v1308_v51, %v1296_v14  ;;  %v1160_v39 = vmul.f32 %v1610_v3, %v1148_v46  ;;  %v1102_v57 = vpop.permute.xlu0 %1101 }
 0x167   : > { %v1143_v8 = vperm.slane %v1138_v18, %v2468_v63  ;;  %v1107_v28 = vperm.slane %v1102_v57, %v2468_v63  ;;  %v1310_v57 = vunpack.c.l.bf16 %v1278_v17 }
 0x168   : > { %1373 = vst.msk [vmem:[%s2483_s23] sm:$0xf] %vm1372_vm0, %v1360_v53  ;;  %v1361_v33 = vpack.c.bf16 %v1349_v44, %v1349_v44  ;;  %v1356_v15 = vmax.f32 %v1320_v41, 0.0  ;;  %v1172_v52 = vpack.c.bf16 %v1160_v39, %v1160_v39 }
 0x169   : > { %v1155_v1 = vunpack.c.l.bf16 %v1143_v8  ;;  %v1151_v29 = vunpack.c.l.bf16 %v1107_v28  ;;  %v1629_v8 = vld [vmem:[%s1907_s14] sm:$0xff]   ;;  %v1269_v28 = vperm.slane %v2494_v7, %v2468_v63 }
 0x16a   : > { %1374 = vst.msk [vmem:[%s2483_s23 + $0x4] sm:$0xf] %vm1372_vm0, %v1361_v33  ;;  %v1368_v0 = vpack.c.bf16 %v1356_v15, %v1356_v15  ;;  %v1292_v3 = vunpack.c.l.bf16 %v1172_v52 }
 0x16b   : > { %v1167_v40 = vmul.f32 %v1623_v25, %v1155_v1  ;;  %v1163_v47 = vmul.f32 %v1615_v19, %v1151_v29  ;;  %v1093_v6 = vpop.permute.xlu1 %1092  ;;  %v1242_v19 = vperm.slane %v2485_v21, %v2468_v63  ;;  %v1309_v7 = vunpack.c.l.bf16 %v1269_v28 }
 0x16c   : > { %1381 = vst.msk [vmem:[%s2483_s23 + $0x20] sm:$0xf] %vm1372_vm0, %v1368_v0  ;;  %v1316_v35 = vadd.f32 %v1304_v60, %v1292_v3  ;;  %v1098_v32 = vperm.slane %v1093_v6, %v2468_v63  ;;  %v1631_v60 = vunpack.c.h.bf16 %v1629_v8 }
 0x16d   : > { %v1179_v23 = vpack.c.bf16 %v1167_v40, %v1167_v40  ;;  %v1175_v50 = vpack.c.bf16 %v1163_v47, %v1163_v47  ;;  %v1409_v9 = vpop.permute.xlu2 %1408  ;;  %v1306_v2 = vunpack.c.l.bf16 %v1242_v19 }
 0x16e   : > { %v1352_v25 = vmax.f32 %v1316_v35, 0.0  ;;  %v1150_v22 = vunpack.c.l.bf16 %v1098_v32  ;;  %v1414_v12 = vperm.slane %v1409_v9, %v2468_v63 }
 0x16f   : > { %v1299_v38 = vunpack.c.l.bf16 %v1179_v23  ;;  %v1295_v30 = vunpack.c.l.bf16 %v1175_v50  ;;  %v1129_v36 = vpop.permute.xlu0 %1128  ;;  %v1630_v50 = vunpack.c.l.bf16 %v1629_v8 }
 0x170   : > { %v1364_v54 = vpack.c.bf16 %v1352_v25, %v1352_v25  ;;  %v1162_v37 = vmul.f32 %v1614_v20, %v1150_v22  ;;  %v1420_v42 = vunpack.c.l.bf16 %v1414_v12  ;;  %v1134_v5 = vperm.slane %v1129_v36, %v2468_v63 }
 0x171   : > { %v1323_v13 = vadd.f32 %v1311_v49, %v1299_v38  ;;  %v1319_v56 = vadd.f32 %v1307_v34, %v1295_v30 }
 0x172   : > { %1377 = vst.msk [vmem:[%s2483_s23 + $0x10] sm:$0xf] %vm1372_vm0, %v1364_v54  ;;  %v1174_v27 = vpack.c.bf16 %v1162_v37, %v1162_v37  ;;  %v1423_v48 = vmul.f32 %v1420_v42, %v1417_v45  ;;  %v1154_v43 = vunpack.c.l.bf16 %v1134_v5 }
 0x173   : > { %v1359_v59 = vmax.f32 %v1323_v13, 0.0  ;;  %v1355_v21 = vmax.f32 %v1319_v56, 0.0 }
 0x174   : > { %v1294_v4 = vunpack.c.l.bf16 %v1174_v27  ;;  %v1426_v51 = vpack.c.bf16 %v1423_v48, %v1423_v48  ;;  %v1166_v62 = vmul.f32 %v1622_v26, %v1154_v43 }
 0x175   : > { %v1371_v11 = vpack.c.bf16 %v1359_v59, %v1359_v59  ;;  %v1367_v20 = vpack.c.bf16 %v1355_v21, %v1355_v21  ;;  %v1448_v14 = vpop.permute.xlu2 %1447 }
 0x176   : > { %v1318_v46 = vadd.f32 %v1306_v2, %v1294_v4  ;;  %v1453_v58 = vperm.slane %v1448_v14, %v2468_v63  ;;  %v1120_v53 = vpop.permute.xlu1 %1119  ;;  %v1178_v18 = vpack.c.bf16 %v1166_v62, %v1166_v62  ;;  %v1456_v39 = vunpack.c.l.bf16 %v1426_v51 }
 0x177   : > { %1384 = vst.msk [vmem:[%s2483_s23 + $0x2c] sm:$0xf] %vm1372_vm0, %v1371_v11  ;;  %v1125_v44 = vperm.slane %v1120_v53, %v2468_v63 }
 0x178   : > { %1380 = vst.msk [vmem:[%s2483_s23 + $0x1c] sm:$0xf] %vm1372_vm0, %v1367_v20  ;;  %v1354_v41 = vmax.f32 %v1318_v46, 0.0  ;;  %v1459_v55 = vunpack.c.l.bf16 %v1453_v58  ;;  %v1298_v24 = vunpack.c.l.bf16 %v1178_v18 }
 0x179   : > { %v1153_v26 = vunpack.c.l.bf16 %v1125_v44 }
 0x17a   : > { %v1366_v33 = vpack.c.bf16 %v1354_v41, %v1354_v41  ;;  %v1462_v15 = vadd.f32 %v1459_v55, %v1456_v39  ;;  %v1400_v52 = vpop.permute.xlu0 %1399  ;;  %v1322_v1 = vadd.f32 %v1310_v57, %v1298_v24 }
 0x17b   : > { %v1165_v29 = vmul.f32 %v2599_v10, %v1153_v26  ;;  %v1405_v0 = vperm.slane %v1400_v52, %v2468_v63 }
 0x17c   : > { %1379 = vst.msk [vmem:[%s2483_s23 + $0x18] sm:$0xf] %vm1372_vm0, %v1366_v33  ;;  %v1471_v3 = vmax.f32 %v1462_v15, 0.0  ;;  %v1358_v40 = vmax.f32 %v1322_v1, 0.0 }
 0x17d   : > { %v1177_v31 = vpack.c.bf16 %v1165_v29, %v1165_v29  ;;  %v1419_v61 = vunpack.c.l.bf16 %v1405_v0 }
 0x17e   : > { %v1474_v47 = vpack.c.bf16 %v1471_v3, %v1471_v3  ;;  %v1370_v6 = vpack.c.bf16 %v1358_v40, %v1358_v40 }
 0x17f   : > { %v1297_v35 = vunpack.c.l.bf16 %v1177_v31  ;;  %v1422_v23 = vmul.f32 %v1631_v60, %v1419_v61 }
 0x180   : > { %1477 = vst.msk [vmem:[%s2483_s23 + $0x38] sm:$0xf] %vm1372_vm0, %v1474_v47 }
 0x181   : > { %1383 = vst.msk [vmem:[%s2483_s23 + $0x28] sm:$0xf] %vm1372_vm0, %v1370_v6  ;;  %v1321_v16 = vadd.f32 %v1309_v7, %v1297_v35  ;;  %v1425_v32 = vpack.c.bf16 %v1422_v23, %v1422_v23  ;;  %v1391_v49 = vpop.permute.xlu1 %1390 }
 0x182   : > { %v1396_v45 = vperm.slane %v1391_v49, %v2468_v63  ;;  %v1439_v9 = vpop.permute.xlu0 %1438 }
 0x183   : > { %v1357_v25 = vmax.f32 %v1321_v16, 0.0  ;;  %v1444_v38 = vperm.slane %v1439_v9, %v2468_v63  ;;  %v1455_v19 = vunpack.c.l.bf16 %v1425_v32 }
 0x184   : > { %v1418_v22 = vunpack.c.l.bf16 %v1396_v45 }
 0x185   : > { %v1369_v12 = vpack.c.bf16 %v1357_v25, %v1357_v25  ;;  %v1458_v34 = vunpack.c.l.bf16 %v1444_v38 }
 0x186   : > { %v1421_v30 = vmul.f32 %v1630_v50, %v1418_v22 }
 0x187   : > { %1382 = vst.msk [vmem:[%s2483_s23 + $0x24] sm:$0xf] %vm1372_vm0, %v1369_v12  ;;  %v1461_v36 = vadd.f32 %v1458_v34, %v1455_v19 }
 0x188   : > { %v1424_v54 = vpack.c.bf16 %v1421_v30, %v1421_v30 }
 0x189   : > { %v1470_v13 = vmax.f32 %v1461_v36, 0.0  ;;  %v1430_v37 = vpop.permute.xlu1 %1429 }
 0x18a   : > { %v1435_v42 = vperm.slane %v1430_v37, %v2468_v63  ;;  %v1454_v5 = vunpack.c.l.bf16 %v1424_v54 }
 0x18b   : > { %v1473_v56 = vpack.c.bf16 %v1470_v13, %v1470_v13 }
 0x18c   : > { %v1457_v59 = vunpack.c.l.bf16 %v1435_v42 }
 0x18d   : > { %1476 = vst.msk [vmem:[%s2483_s23 + $0x34] sm:$0xf] %vm1372_vm0, %v1473_v56 }
 0x18e   : > { %v1460_v27 = vadd.f32 %v1457_v59, %v1454_v5 }
 0x190   : > { %v1469_v48 = vmax.f32 %v1460_v27, 0.0 }
 0x192   : > { %v1472_v21 = vpack.c.bf16 %v1469_v48, %v1469_v48 }
 0x194   : > { %1475 = vst.msk [vmem:[%s2483_s23 + $0x30] sm:$0xf] %vm1372_vm0, %v1472_v21 }
 0x195 PF: > { %s18_s21 = sadd.s32 1, %s1778_s21  }
 0x196   : > { %p15_p7 = scmp.ge.s32.totalorder %s18_s21, 4  }
 0x198   :  { %17 = sbr.rel (!%p15_p7) target bundleno = 2 (0x2), region = 86 }
 0x19d   :  { %1499 = vsyncpa [#allocation3], 1 }
 0x19e   :  { %1501 = vsyncpa [#allocation3 + $0x1], 1 }
 0x19f   :  { %1502 = vsyncpa [#allocation5], 1 }

// kernel: ir_encoder_forward.5
= control target key start
LH: loop header
LB: loop body
LE: loop exit
PB: predicated region body
PF: predicated region fallthrough
CT: control target
= control target key end

     0   :  { %11 = vsyncpa [#allocation3], 0  ;;  %s4975_s0 = inlined_call_operand.vmem [shape: bf16[2,176,4], index: 0, kind: input, shape index: {}]   ;;  %s4976_s1 = inlined_call_operand.vmem [shape: bf16[2,44,4], index: 1, kind: input, shape index: {}]   ;;  %s4977_s2 = inlined_call_operand.vmem [shape: f32[220,1], index: 2, kind: input, shape index: {}]   ;;  %s4978_s3 = inlined_call_operand.vmem [shape: f32[220,1], index: 3, kind: input, shape index: {}]   ;;  %s4979_s4 = inlined_call_operand.vmem [shape: f32[5], index: 4, kind: input, shape index: {}]   ;;  %s4980_s5 = inlined_call_operand.vmem [shape: f32[3], index: 5, kind: input, shape index: {}]   ;;  %s4981_s6 = inlined_call_operand.vmem [shape: bf16[2,220,4], index: 6, kind: output, shape index: {}]  }
   0x1   :  { %12 = vsyncpa [#allocation5], 0  ;;  %s3184_s21 = smov 0  }
   0x2 LB: > { %s2830_s22 = sadd.s32 4294967295, %s3143_s21   ;;  %p2832_p0 = scmp.ge.s32.totalorder %s3143_s21, 1  ;;  %s3143_s21 = sphi %s3184_s21, %s18_s21  }
   0x3   : > { %p185_p1 = scmp.lt.s32.totalorder %s3143_s21, 3  ;;  %s203_s25 = sshll.u32 %s4979_s4, 4  ;;  %s204_s25 = int_to_ptr.vmem [resolvable:$true] %s203_s25 }
   0x4   : > { %p2968_p3 = scmp.eq.s32.totalorder %s2830_s22, 0  ;;  %s213_s28 = sshll.u32 %s4980_s5, 4  ;;  %s214_s28 = int_to_ptr.vmem [resolvable:$true] %s213_s28 }
   0x5   : > { %p186_p2 = pnand %p2832_p0, %p185_p1  ;;  %s3145_s29 = smov [#allocation2]  }
   0x6   : > { %s3146_s30 = smov [#allocation4]  }
   0x7   : > { %p2961_p4 = pneg %p186_p2 }
   0x8   : > { %242 = sbr.rel (%p186_p2) target bundleno = 582 (0x246), region = 44 }
   0x9   : > { %p2962_p5 = pnand %p2968_p3, %p2961_p4 }
   0xb   : > { %2964 = dma.vmem_to_smem (!%p2962_p5), %s204_s25, 16, %s3145_s29, [#allocation3]  }
   0xc   : > { %2967 = dma.vmem_to_smem (!%p2962_p5), %s214_s28, 16, %s3146_s30, [#allocation5]  }
   0xd   : > { %3134 = dma.done.wait (%p2968_p3), [#allocation3], 16  }
   0xe   : > { %3136 = vsyncadd (%p2968_p3), [#allocation3], 4294967280 }
   0xf   : > { %3138 = dma.done.wait (%p2968_p3), [#allocation5], 16  }
  0x10   : > { %3140 = vsyncadd (%p2968_p3), [#allocation5], 4294967280 }
  0x11   : > { %254 = sfence }
  0x12   : > { %p284_p6 = scmp.lt.s32.totalorder %s2830_s22, 1  ;;  %vm343_vm0 = vcmask 31744   ;;  %vm459_vm1 = vcmask 27648   ;;  %s2842_s19 = sld [smem:[#allocation2 + $0x1]]  ;;  %vm491_vm2 = vcmask 1041408   ;;  %vm632_vm3 = vcmask 1046528  }
  0x13   : > { %s2843_s20 = sld [smem:[#allocation2 + $0x2]]  ;;  %vm770_vm4 = vcmask 1045504   ;;  %vm908_vm5 = vcmask 1044480   ;;  %vm1046_vm6 = vcmask 1043456  }
  0x14   : > { %s5164_s22 = smov (!%p284_p6, %s2830_s22), 1  ;;  %s2844_s23 = sld [smem:[#allocation2 + $0x3]] }
  0x15   : > { %s2950_s7 = smul.u32 88, %s5164_s22  ;;  %s560_s24 = sld [smem:[#allocation2]] }
  0x16   : > { %s2951_s11 = smul.u32 24, %s5164_s22  ;;  %s2845_s25 = sld [smem:[#allocation2 + $0x4]] }
  0x17   : > { %s3209_s10 = scalar_lea.vmem %s4975_s0, %s2950_s7  ;;  %s4070_s29 = sld [smem:[#allocation4]] }
  0x18   : > { %v3212_v0 = vld [vmem:[%s3209_s10 + $0x10] sm:$0xff]   ;;  %v3215_v1 = vld [vmem:[%s3209_s10 + $0x8] sm:$0xff]   ;;  %v3218_v2 = vld [vmem:[%s3209_s10] sm:$0xff]   ;;  %s3323_s14 = scalar_lea.vmem %s4976_s1, %s2951_s11  ;;  %s4074_s30 = sld [smem:[#allocation4 + $0x1]] }
  0x19   : > { %5049 = vst [vmem:[#allocation8_spill] sm:$0xff] %v3212_v0  ;;  %v4998_v3 = vunpack.c.l.bf16 %v3212_v0  ;;  %v4999_v4 = vunpack.c.l.bf16 %v3215_v1  ;;  %v5000_v5 = vunpack.c.l.bf16 %v3218_v2  ;;  %v5001_v9 = vunpack.c.h.bf16 %v3212_v0  ;;  %v3245_v15 = vld [vmem:[%s3209_s10 + $0x20] sm:$0xff]   ;;  %v3248_v16 = vld [vmem:[%s3209_s10 + $0x18] sm:$0xff]   ;;  %v3263_v23 = vld [vmem:[%s3209_s10 + $0x28] sm:$0xff]   ;;  %s4078_s7 = sld [smem:[#allocation4 + $0x2]] }
  0x1a   : > { %5050 = vst [vmem:[#allocation9_spill] sm:$0xff] %v3215_v1  ;;  %v5002_v10 = vunpack.c.h.bf16 %v3215_v1  ;;  %v5003_v11 = vunpack.c.h.bf16 %v3218_v2  ;;  %v4993_v17 = vunpack.c.l.bf16 %v3245_v15  ;;  %v4997_v18 = vunpack.c.h.bf16 %v3248_v16  ;;  %v3278_v30 = vld [vmem:[%s3209_s10 + $0x38] sm:$0xff]   ;;  %v3281_v31 = vld [vmem:[%s3209_s10 + $0x30] sm:$0xff]   ;;  %v3296_v38 = vld [vmem:[%s3209_s10 + $0x40] sm:$0xff]  }
  0x1b   : > { %5051 = vst [vmem:[#allocation10_spill] sm:$0xff] %v3218_v2  ;;  %v356_v6 = vsel %vm343_vm0, %v4998_v3, 0.0  ;;  %v350_v7 = vsel %vm343_vm0, %v4999_v4, 0.0  ;;  %v344_v8 = vsel %vm343_vm0, %v5000_v5, 0.0  ;;  %v359_v12 = vsel %vm343_vm0, %v5001_v9, 0.0  ;;  %v3311_v45 = vld [vmem:[%s3209_s10 + $0x50] sm:$0xff]  }
  0x1c   : > { %357 = vadd.xlane.f32.xlu2 %v356_v6  ;;  %351 = vadd.xlane.f32.xlu1 %v350_v7  ;;  %v353_v13 = vsel %vm343_vm0, %v5002_v10, 0.0  ;;  %v347_v14 = vsel %vm343_vm0, %v5003_v11, 0.0  ;;  %5052 = vst [vmem:[#allocation11_spill] sm:$0xff] %v3245_v15  ;;  %v4996_v19 = vunpack.c.l.bf16 %v3248_v16  ;;  %v368_v20 = vsel %vm343_vm0, %v4993_v17, 0.0  ;;  %v3314_v46 = vld [vmem:[%s3209_s10 + $0x48] sm:$0xff]   ;;  %v2923_v53 = vld [vmem:[%s3323_s14] sm:$0xff]  }
  0x1d   : > { %345 = vadd.xlane.f32.xlu0 %v344_v8  ;;  %5053 = vst [vmem:[#allocation12_spill] sm:$0xff] %v3248_v16  ;;  %v365_v21 = vsel %vm343_vm0, %v4997_v18, 0.0  ;;  %v4989_v24 = vunpack.c.h.bf16 %v3263_v23  ;;  %v4994_v25 = vunpack.c.l.bf16 %v3263_v23  ;;  %v4995_v26 = vunpack.c.h.bf16 %v3245_v15  ;;  %v2948_v60 = vld [vmem:[%s3323_s14 + $0x8] sm:$0xff]   ;;  %v436_v61 = vld [vmem:[%s3323_s14 + $0x10] sm:$0xf] }
  0x1e   : > { %v362_v22 = vsel %vm343_vm0, %v4996_v19, 0.0  ;;  %5054 = vst [vmem:[#allocation13_spill] sm:$0xff] %v3263_v23  ;;  %v4986_v32 = vunpack.c.l.bf16 %v3278_v30  ;;  %v4987_v33 = vunpack.c.h.bf16 %v3281_v31  ;;  %v4992_v34 = vunpack.c.l.bf16 %v3281_v31 }
  0x1f   : > { %v377_v27 = vsel %vm343_vm0, %v4989_v24, 0.0  ;;  %v374_v28 = vsel %vm343_vm0, %v4994_v25, 0.0  ;;  %v371_v29 = vsel %vm343_vm0, %v4995_v26, 0.0  ;;  %5055 = vst [vmem:[#allocation14_spill] sm:$0xff] %v3278_v30  ;;  %v4984_v39 = vunpack.c.h.bf16 %v3296_v38 }
  0x20   : > { %5056 = vst [vmem:[#allocation15_spill] sm:$0xff] %v3281_v31  ;;  %v386_v35 = vsel %vm343_vm0, %v4986_v32, 0.0  ;;  %v383_v36 = vsel %vm343_vm0, %v4987_v33, 0.0  ;;  %v380_v37 = vsel %vm343_vm0, %v4992_v34, 0.0  ;;  %v4985_v40 = vunpack.c.l.bf16 %v3296_v38 }
  0x21   : > { %5057 = vst [vmem:[#allocation16_spill] sm:$0xff] %v3296_v38  ;;  %v4991_v41 = vunpack.c.h.bf16 %v3278_v30  ;;  %v395_v42 = vsel %vm343_vm0, %v4984_v39, 0.0  ;;  %v4982_v47 = vunpack.c.l.bf16 %v3311_v45  ;;  %v4983_v48 = vunpack.c.h.bf16 %v3314_v46 }
  0x22   : > { %v392_v43 = vsel %vm343_vm0, %v4985_v40, 0.0  ;;  %5058 = vst [vmem:[#allocation17_spill] sm:$0xff] %v3311_v45  ;;  %v4990_v49 = vunpack.c.l.bf16 %v3314_v46  ;;  %v2925_v54 = vunpack.c.h.bf16 %v2923_v53  ;;  %v2924_v55 = vunpack.c.l.bf16 %v2923_v53 }
  0x23   : > { %v389_v44 = vsel %vm343_vm0, %v4991_v41, 0.0  ;;  %5059 = vst [vmem:[#allocation18_spill] sm:$0xff] %v3314_v46  ;;  %v404_v50 = vsel %vm343_vm0, %v4982_v47, 0.0  ;;  %v401_v51 = vsel %vm343_vm0, %v4983_v48, 0.0  ;;  %v4988_v56 = vunpack.c.h.bf16 %v3311_v45 }
  0x24   : > { %360 = vadd.xlane.f32.xlu2 %v359_v12  ;;  %354 = vadd.xlane.f32.xlu1 %v353_v13  ;;  %v398_v52 = vsel %vm343_vm0, %v4990_v49, 0.0  ;;  %v447_v57 = vsel %vm343_vm0, %v2925_v54, 0.0  ;;  %v444_v58 = vsel %vm343_vm0, %v2924_v55, 0.0  ;;  %v442_v62 = vunpack.c.l.bf16 %v436_v61  ;;  %v437_v13 = vld [vmem:[%s3323_s14 + $0x14] sm:$0x3] }
  0x25   : > { %348 = vadd.xlane.f32.xlu0 %v347_v14  ;;  %v407_v59 = vsel %vm343_vm0, %v4988_v56, 0.0  ;;  %v2929_v63 = vunpack.c.h.bf16 %v2948_v60  ;;  %v2928_v6 = vunpack.c.l.bf16 %v2948_v60  ;;  %v443_v14 = vunpack.c.l.bf16 %v437_v13 }
  0x26   : > { %v456_v7 = vsel %vm343_vm0, %v442_v62, 0.0  ;;  %v3362_v53 = vstv %s2844_s23  ;;  %v3370_v62 = vstv %s2845_s25 }
  0x27   : > { %v453_v8 = vsel %vm343_vm0, %v2929_v63, 0.0  ;;  %v450_v12 = vsel %vm343_vm0, %v2928_v6, 0.0 }
  0x2c   : > { %369 = vadd.xlane.f32.xlu2 %v368_v20  ;;  %366 = vadd.xlane.f32.xlu1 %v365_v21  ;;  %v460_v20 = vsel %vm459_vm1, %v443_v14, 0.0  ;;  %v1805_v21 = vld [vmem:[%s4978_s3 + $0x8] sm:$0xff] }
  0x2d   : > { %363 = vadd.xlane.f32.xlu0 %v362_v22  ;;  %v1889_v22 = vpack.c.bf16 %v1805_v21, %v1805_v21 }
  0x34   : > { %378 = vadd.xlane.f32.xlu2 %v377_v27  ;;  %375 = vadd.xlane.f32.xlu1 %v374_v28  ;;  %v3147_v27 = vmov 0   ;;  %v1808_v28 = vld [vmem:[%s4978_s3 + $0x20] sm:$0xff] }
  0x35   : > { %372 = vadd.xlane.f32.xlu0 %v371_v29  ;;  %2985 = vset.pattern.permute.xlu1 %v3147_v27  ;;  %v1892_v29 = vpack.c.bf16 %v1808_v28, %v1808_v28 }
  0x36   : > { %2984 = vset.pattern.permute.xlu2 %v3147_v27  ;;  %2986 = vset.pattern.permute.xlu0 %v3147_v27 }
  0x3c   : > { %387 = vadd.xlane.f32.xlu2 %v386_v35  ;;  %384 = vadd.xlane.f32.xlu1 %v383_v36 }
  0x3d   : > { %381 = vadd.xlane.f32.xlu0 %v380_v37 }
  0x44   : > { %396 = vadd.xlane.f32.xlu2 %v395_v42  ;;  %393 = vadd.xlane.f32.xlu1 %v392_v43 }
  0x45   : > { %390 = vadd.xlane.f32.xlu0 %v389_v44 }
  0x4c   : > { %405 = vadd.xlane.f32.xlu2 %v404_v50  ;;  %402 = vadd.xlane.f32.xlu1 %v401_v51  ;;  %v3357_v50 = vstv %s2842_s19  ;;  %v3359_v51 = vstv %s2843_s20 }
  0x4d   : > { %399 = vadd.xlane.f32.xlu0 %v398_v52 }
  0x54   : > { %448 = vadd.xlane.f32.xlu2 %v447_v57  ;;  %445 = vadd.xlane.f32.xlu1 %v444_v58 }
  0x55   : > { %408 = vadd.xlane.f32.xlu0 %v407_v59  ;;  %v3366_v59 = vstv %s560_s24 }
  0x5c   : > { %457 = vadd.xlane.f32.xlu2 %v456_v7  ;;  %454 = vadd.xlane.f32.xlu1 %v453_v8 }
  0x5d   : > { %451 = vadd.xlane.f32.xlu0 %v450_v12 }
  0x65   : > { %461 = vadd.xlane.f32.xlu0 %v460_v20 }
  0x75   : > { %2191 = vperm.xlu1 %2985, %v1889_v22  }
  0x7d   : > { %2218 = vperm.xlu1 %2985, %v1892_v29  }
  0x8f   : > { %v358_v35 = vpop.xlane.xlu2 %357  ;;  %v352_v36 = vpop.xlane.xlu1 %351 }
  0x90   : > { %v346_v37 = vpop.xlane.xlu0 %345  ;;  %v414_v44 = vmul.f32 0.25, %v358_v35  ;;  %v3364_v58 = vmul.f32 0.25, %v352_v36 }
  0x91   : > { %v3354_v42 = vmul.f32 0.25, %v346_v37 }
  0x92   : > { %v499_v57 = vrot.slane %v414_v44, 6  ;;  %v495_v20 = vrot.slane %v3364_v58, 6 }
  0x93   : > { %v492_v43 = vrot.slane %v3354_v42, 6 }
  0x95   : > { %v558_v52 = vsel %vm491_vm2, 0.0, %v492_v43 }
  0x96   : > { %v3373_v63 = vmul.f32 %v3357_v50, %v558_v52  ;;  %v3376_v6 = vmul.f32 %v3359_v51, %v558_v52  ;;  %v3379_v8 = vmul.f32 %v3362_v53, %v558_v52  ;;  %v3384_v21 = vmul.f32 %v3366_v59, %v558_v52 }
  0x97   : > { %v361_v54 = vpop.xlane.xlu2 %360  ;;  %v355_v55 = vpop.xlane.xlu1 %354  ;;  %v3387_v22 = vmul.f32 %v3370_v62, %v558_v52 }
  0x98   : > { %v3368_v60 = vmul.f32 0.25, %v361_v54  ;;  %v349_v61 = vpop.xlane.xlu0 %348  ;;  %v413_v7 = vmul.f32 0.25, %v355_v55  ;;  %v633_v28 = vrot.slane %v3373_v63, 1  ;;  %v771_v29 = vrot.slane %v3376_v6, 2  ;;  %v1804_v6 = vld [vmem:[%s4978_s3] sm:$0xff] }
  0x99   : > { %v411_v13 = vmul.f32 0.25, %v349_v61  ;;  %v909_v37 = vrot.slane %v3379_v8, 3  ;;  %v1811_v8 = vld [vmem:[%s4978_s3 + $0x38] sm:$0xff] }
  0x9a   : > { %v501_v12 = vrot.slane %v3368_v60, 6  ;;  %v497_v14 = vrot.slane %v413_v7, 6 }
  0x9b   : > { %v493_v52 = vrot.slane %v411_v13, 6 }
  0x9c   : > { %v3392_v27 = vsel %vm491_vm2, %v499_v57, %v501_v12  ;;  %v498_v42 = vsel %vm491_vm2, %v495_v20, %v497_v14  ;;  %v500_v44 = vsel %vm491_vm2, %v497_v14, %v499_v57 }
  0x9d   : > { %v3398_v35 = vmul.f32 %v3357_v50, %v3392_v27  ;;  %v3402_v36 = vmul.f32 %v3359_v51, %v3392_v27  ;;  %v3411_v58 = vmul.f32 %v3362_v53, %v3392_v27  ;;  %v3415_v61 = vmul.f32 %v3370_v62, %v3392_v27 }
  0x9e   : > { %v565_v63 = vmul.f32 %v3366_v59, %v498_v42  ;;  %v566_v7 = vmul.f32 %v3366_v59, %v500_v44  ;;  %v589_v47 = vmul.f32 %v3357_v50, %v498_v42  ;;  %v590_v57 = vmul.f32 %v3357_v50, %v500_v44 }
  0x9f   : > { %v5006_v54 = vrot.slane %v3398_v35, 1  ;;  %v5005_v55 = vrot.slane %v3402_v36, 2  ;;  %v727_v13 = vmul.f32 %v3359_v51, %v498_v42  ;;  %v728_v14 = vmul.f32 %v3359_v51, %v500_v44 }
  0xa0   : > { %v3424_v48 = vmul.f32 %v3362_v53, %v498_v42  ;;  %v866_v39 = vmul.f32 %v3362_v53, %v500_v44  ;;  %v638_v40 = vrot.slane %v589_v47, 1  ;;  %v640_v32 = vrot.slane %v590_v57, 1 }
  0xa1   : > { %v3428_v33 = vmul.f32 %v3370_v62, %v498_v42  ;;  %v1004_v56 = vmul.f32 %v3370_v62, %v500_v44  ;;  %v776_v24 = vrot.slane %v727_v13, 2  ;;  %v778_v49 = vrot.slane %v728_v14, 2 }
  0xa2   : > { %v914_v41 = vrot.slane %v3424_v48, 3  ;;  %v916_v34 = vrot.slane %v866_v39, 3  ;;  %v5004_v17 = vrot.slane %v3411_v58, 3  ;;  %v641_v25 = vsel %vm632_vm3, %v638_v40, %v640_v32 }
  0xa3   : > { %v643_v26 = vsel %vm632_vm3, %v640_v32, %v5006_v54  ;;  %v494_v47 = vsel %vm491_vm2, %v492_v43, %v493_v52  ;;  %v703_v57 = vadd.f32 %v641_v25, %v565_v63  ;;  %v1052_v19 = vrot.slane %v3428_v33, 4 }
  0xa4   : > { %v704_v42 = vadd.f32 %v643_v26, %v566_v7  ;;  %v1054_v44 = vrot.slane %v1004_v56, 4  ;;  %v1047_v13 = vrot.slane %v3387_v22, 4  ;;  %v1056_v48 = vrot.slane %v3415_v61, 4 }
  0xa5   : > { %v779_v39 = vsel %vm770_vm4, %v776_v24, %v778_v49  ;;  %v781_v14 = vsel %vm770_vm4, %v778_v49, %v5005_v55  ;;  %v917_v32 = vsel %vm908_vm5, %v914_v41, %v916_v34  ;;  %v496_v25 = vsel %vm491_vm2, %v493_v52, %v495_v20  ;;  %v367_v55 = vpop.xlane.xlu1 %366 }
  0xa6   : > { %v841_v18 = vadd.f32 %v779_v39, %v703_v57  ;;  %v842_v3 = vadd.f32 %v781_v14, %v704_v42  ;;  %v919_v26 = vsel %vm908_vm5, %v916_v34, %v5004_v17  ;;  %v587_v56 = vmul.f32 %v3357_v50, %v494_v47 }
  0xa7   : > { %v588_v43 = vmul.f32 %v3357_v50, %v496_v25  ;;  %v725_v63 = vmul.f32 %v3359_v51, %v494_v47  ;;  %v1055_v49 = vsel %vm1046_vm6, %v1052_v19, %v1054_v44  ;;  %v726_v57 = vmul.f32 %v3359_v51, %v496_v25 }
  0xa8   : > { %v979_v7 = vadd.f32 %v917_v32, %v841_v18  ;;  %v863_v42 = vmul.f32 %v3362_v53, %v494_v47  ;;  %v980_v20 = vadd.f32 %v919_v26, %v842_v3  ;;  %v634_v52 = vrot.slane %v587_v56, 1 }
  0xa9   : > { %v636_v39 = vrot.slane %v588_v43, 1  ;;  %v772_v14 = vrot.slane %v725_v63, 2  ;;  %v563_v34 = vmul.f32 %v3366_v59, %v494_v47  ;;  %v564_v4 = vmul.f32 %v3366_v59, %v496_v25  ;;  %v370_v63 = vpop.xlane.xlu2 %369 }
  0xaa   : > { %v774_v5 = vrot.slane %v726_v57, 2  ;;  %v864_v9 = vmul.f32 %v3362_v53, %v496_v25  ;;  %v635_v18 = vsel %vm632_vm3, %v633_v28, %v634_v52  ;;  %v910_v11 = vrot.slane %v863_v42, 3 }
  0xab   : > { %v637_v32 = vsel %vm632_vm3, %v634_v52, %v636_v39  ;;  %v639_v10 = vsel %vm632_vm3, %v636_v39, %v638_v40  ;;  %v1057_v3 = vsel %vm1046_vm6, %v1054_v44, %v1056_v48  ;;  %v1117_v26 = vadd.f32 %v1055_v49, %v979_v7 }
  0xac   : > { %v700_v56 = vadd.f32 %v635_v18, %v3384_v21  ;;  %v701_v43 = vadd.f32 %v637_v32, %v563_v34  ;;  %v1118_v17 = vadd.f32 %v1057_v3, %v980_v20  ;;  %v702_v57 = vadd.f32 %v639_v10, %v564_v4  ;;  %v364_v10 = vpop.xlane.xlu0 %363 }
  0xad   : > { %v773_v28 = vsel %vm770_vm4, %v771_v29, %v772_v14  ;;  %v775_v52 = vsel %vm770_vm4, %v772_v14, %v774_v5  ;;  %v777_v40 = vsel %vm770_vm4, %v774_v5, %v776_v24  ;;  %v912_v54 = vrot.slane %v864_v9, 3 }
  0xae   : > { %v838_v42 = vadd.f32 %v773_v28, %v700_v56  ;;  %v839_v39 = vadd.f32 %v775_v52, %v701_v43  ;;  %v840_v44 = vadd.f32 %v777_v40, %v702_v57  ;;  %v911_v21 = vsel %vm908_vm5, %v909_v37, %v910_v11  ;;  %v376_v40 = vpop.xlane.xlu1 %375 }
  0xaf   : > { %v1001_v7 = vmul.f32 %v3370_v62, %v494_v47  ;;  %v1002_v4 = vmul.f32 %v3370_v62, %v496_v25  ;;  %v913_v29 = vsel %vm908_vm5, %v910_v11, %v912_v54  ;;  %v915_v5 = vsel %vm908_vm5, %v912_v54, %v914_v41 }
  0xb0   : > { %v976_v24 = vadd.f32 %v911_v21, %v838_v42  ;;  %v3483_v9 = vmul.f32 0.25, %v370_v63  ;;  %v977_v37 = vadd.f32 %v913_v29, %v839_v39  ;;  %v978_v47 = vadd.f32 %v915_v5, %v840_v44 }
  0xb1   : > { %v1048_v49 = vrot.slane %v1001_v7, 4  ;;  %v1050_v25 = vrot.slane %v1002_v4, 4  ;;  %v417_v14 = vmul.f32 0.25, %v367_v55  ;;  %v416_v34 = vmul.f32 0.25, %v364_v10 }
  0xb2   : > { %v507_v20 = vrot.slane %v3483_v9, 6  ;;  %v1888_v18 = vpack.c.bf16 %v1804_v6, %v1804_v6  ;;  %v2849_v32 = vmul.f32 -1.442695, %v1117_v26  ;;  %v1895_v54 = vpack.c.bf16 %v1811_v8, %v1811_v8 }
  0xb3   : > { %v1049_v11 = vsel %vm1046_vm6, %v1047_v13, %v1048_v49  ;;  %v1051_v41 = vsel %vm1046_vm6, %v1048_v49, %v1050_v25  ;;  %v2850_v3 = vmul.f32 -1.442695, %v1118_v17  ;;  %v505_v63 = vrot.slane %v417_v14, 6  ;;  %v379_v13 = vpop.xlane.xlu2 %378 }
  0xb4   : > { %v1114_v56 = vadd.f32 %v1049_v11, %v976_v24  ;;  %v1115_v43 = vadd.f32 %v1051_v41, %v977_v37  ;;  %2182 = vperm.xlu2 %2984, %v1888_v18   ;;  %v1053_v57 = vsel %vm1046_vm6, %v1050_v25, %v1052_v19  ;;  %v503_v55 = vrot.slane %v416_v34, 6  ;;  %2245 = vperm.xlu1 %2985, %v1895_v54  }
  0xb5   : > { %v1116_v28 = vadd.f32 %v1053_v57, %v978_v47  ;;  %v3499_v22 = vsel %vm491_vm2, %v505_v63, %v507_v20  ;;  %2987 = vpow2.f32 %v2849_v32  ;;  %v567_v19 = vmul.f32 %v3366_v59, %v3392_v27 }
  0xb6   : > { %v2846_v26 = vmul.f32 -1.442695, %v1114_v56  ;;  %v2847_v17 = vmul.f32 -1.442695, %v1115_v43  ;;  %v3503_v52 = vmul.f32 %v3357_v50, %v3499_v22  ;;  %2989 = vpow2.f32 %v2850_v3 }
  0xb7   : > { %v3509_v33 = vmul.f32 %v3359_v51, %v3499_v22  ;;  %v3513_v42 = vmul.f32 %v3362_v53, %v3499_v22  ;;  %v3517_v39 = vmul.f32 %v3370_v62, %v3499_v22  ;;  %v504_v44 = vsel %vm491_vm2, %v501_v12, %v503_v55 }
  0xb8   : > { %v506_v21 = vsel %vm491_vm2, %v503_v55, %v505_v63  ;;  %v3523_v27 = vmul.f32 0.25, %v379_v13  ;;  %2991 = vpow2.f32 %v2846_v26  ;;  %v2848_v7 = vmul.f32 -1.442695, %v1116_v28 }
  0xb9   : > { %v648_v4 = vrot.slane %v3503_v52, 1  ;;  %v3526_v10 = vmul.f32 0.25, %v376_v40  ;;  %2993 = vpow2.f32 %v2847_v17  ;;  %v786_v6 = vrot.slane %v3509_v33, 2 }
  0xba   : > { %v5009_v29 = vrot.slane %v3513_v42, 3  ;;  %v592_v5 = vmul.f32 %v3357_v50, %v504_v44  ;;  %v593_v60 = vmul.f32 %v3357_v50, %v506_v21  ;;  %v730_v12 = vmul.f32 %v3359_v51, %v504_v44 }
  0xbb   : > { %v731_v24 = vmul.f32 %v3359_v51, %v506_v21  ;;  %v868_v8 = vmul.f32 %v3362_v53, %v504_v44  ;;  %v2988_v37 = vpop.eup %2987  ;;  %v5008_v47 = vrot.slane %v3517_v39, 4  ;;  %v869_v25 = vmul.f32 %v3362_v53, %v506_v21 }
  0xbc   : > { %v644_v49 = vrot.slane %v592_v5, 1  ;;  %v1006_v14 = vmul.f32 %v3370_v62, %v504_v44  ;;  %v2990_v34 = vpop.eup %2989  ;;  %v646_v18 = vrot.slane %v593_v60, 1  ;;  %v782_v32 = vrot.slane %v730_v12, 2 }
  0xbd   : > { %v784_v11 = vrot.slane %v731_v24, 2  ;;  %v1007_v41 = vmul.f32 %v3370_v62, %v506_v21  ;;  %v568_v54 = vmul.f32 %v3366_v59, %v504_v44  ;;  %v569_v3 = vmul.f32 %v3366_v59, %v506_v21 }
  0xbe   : > { %v5060_v56 = vrot.slane %v3398_v35, 1  ;;  %v920_v63 = vrot.slane %v868_v8, 3  ;;  %v2992_v57 = vpop.eup %2991  ;;  %v647_v55 = vsel %vm632_vm3, %v644_v49, %v646_v18  ;;  %v649_v28 = vsel %vm632_vm3, %v646_v18, %v648_v4 }
  0xbf   : > { %v922_v13 = vrot.slane %v869_v25, 3  ;;  %v2994_v17 = vpop.eup %2993  ;;  %2995 = vpow2.f32 %v2848_v7  ;;  %v706_v40 = vadd.f32 %v647_v55, %v568_v54  ;;  %v707_v44 = vadd.f32 %v649_v28, %v569_v3  ;;  %v373_v54 = vpop.xlane.xlu0 %372 }
  0xc0   : > { %v645_v43 = vsel %vm632_vm3, %v5060_v56, %v644_v49  ;;  %v1058_v5 = vrot.slane %v1006_v14, 4  ;;  %v5061_v21 = vrot.slane %v3402_v36, 2  ;;  %v785_v60 = vsel %vm770_vm4, %v782_v32, %v784_v11  ;;  %v1806_v56 = vld [vmem:[%s4978_s3 + $0x10] sm:$0xff] }
  0xc1   : > { %v705_v26 = vadd.f32 %v645_v43, %v567_v19  ;;  %v787_v12 = vsel %vm770_vm4, %v784_v11, %v786_v6  ;;  %v1060_v24 = vrot.slane %v1007_v41, 4  ;;  %v3555_v8 = vadd.f32 1.0, %v2988_v37 }
  0xc2   : > { %v783_v35 = vsel %vm770_vm4, %v5061_v21, %v782_v32  ;;  %v844_v49 = vadd.f32 %v785_v60, %v706_v40  ;;  %v845_v25 = vadd.f32 %v787_v12, %v707_v44  ;;  %v3557_v7 = vadd.f32 1.0, %v2990_v34  ;;  %v1814_v34 = vld [vmem:[%s4978_s3 + $0x50] sm:$0xff] }
  0xc3   : > { %v843_v19 = vadd.f32 %v783_v35, %v705_v26  ;;  %v5062_v14 = vrot.slane %v3411_v58, 3  ;;  %v923_v18 = vsel %vm908_vm5, %v920_v63, %v922_v13  ;;  %v925_v32 = vsel %vm908_vm5, %v922_v13, %v5009_v29  ;;  %v1807_v58 = vld [vmem:[%s4978_s3 + $0x18] sm:$0xff] }
  0xc4   : > { %v982_v41 = vadd.f32 %v923_v18, %v844_v49  ;;  %v983_v37 = vadd.f32 %v925_v32, %v845_v25  ;;  %v1059_v3 = vsel %vm1046_vm6, %v1056_v48, %v1058_v5  ;;  %v1061_v43 = vsel %vm1046_vm6, %v1058_v5, %v1060_v24  ;;  %v388_v49 = vpop.xlane.xlu2 %387  ;;  %v385_v25 = vpop.xlane.xlu1 %384 }
  0xc5   : > { %v921_v36 = vsel %vm908_vm5, %v5062_v14, %v920_v63  ;;  %v1063_v61 = vsel %vm1046_vm6, %v1060_v24, %v5008_v47  ;;  %v5007_v48 = vrot.slane %v3523_v27, 6  ;;  %v511_v63 = vrot.slane %v3526_v10, 6  ;;  %v2996_v55 = vpop.eup %2995 }
  0xc6   : > { %v981_v11 = vadd.f32 %v921_v36, %v843_v19  ;;  %v1120_v26 = vadd.f32 %v1061_v43, %v982_v41  ;;  %v1121_v13 = vadd.f32 %v1063_v61, %v983_v37  ;;  %v419_v40 = vmul.f32 0.25, %v373_v54 }
  0xc7   : > { %v3587_v44 = vsel %vm491_vm2, %v511_v63, %v5007_v48  ;;  %v1891_v21 = vpack.c.bf16 %v1807_v58, %v1807_v58  ;;  %v1898_v5 = vpack.c.bf16 %v1814_v34, %v1814_v34  ;;  %v1890_v35 = vpack.c.bf16 %v1806_v56, %v1806_v56 }
  0xc8   : > { %v1119_v28 = vadd.f32 %v1059_v3, %v981_v11  ;;  %2997 = vrcp.f32 %v3555_v8  ;;  %v570_v60 = vmul.f32 %v3366_v59, %v3499_v22  ;;  %v3593_v10 = vadd.f32 1.0, %v2992_v57 }
  0xc9   : > { %2999 = vrcp.f32 %v3557_v7  ;;  %v3597_v24 = vmul.f32 %v3357_v50, %v3587_v44  ;;  %v3601_v19 = vmul.f32 %v3359_v51, %v3587_v44  ;;  %2209 = vperm.xlu2 %2984, %v1891_v21   ;;  %v3603_v14 = vadd.f32 1.0, %v2994_v17  ;;  %2272 = vperm.xlu1 %2985, %v1898_v5  }
  0xca   : > { %v2851_v12 = vmul.f32 -1.442695, %v1119_v28  ;;  %v3605_v36 = vadd.f32 1.0, %v2996_v55  ;;  %v2852_v22 = vmul.f32 -1.442695, %v1120_v26  ;;  %v509_v18 = vrot.slane %v419_v40, 6  ;;  %2200 = vperm.xlu0 %2986, %v1890_v35  }
  0xcb   : > { %v2853_v57 = vmul.f32 -1.442695, %v1121_v13  ;;  %v3609_v32 = vmul.f32 %v3362_v53, %v3587_v44  ;;  %v3613_v54 = vmul.f32 %v3370_v62, %v3587_v44  ;;  %v3619_v41 = vmul.f32 0.25, %v388_v49 }
  0xcc   : > { %3001 = vpow2.f32 %v2851_v12  ;;  %v510_v17 = vsel %vm491_vm2, %v507_v20, %v509_v18  ;;  %v512_v11 = vsel %vm491_vm2, %v509_v18, %v511_v63  ;;  %v3621_v37 = vmul.f32 0.25, %v385_v25 }
  0xcd   : > { %v654_v3 = vrot.slane %v3597_v24, 1  ;;  %v5012_v58 = vrot.slane %v3601_v19, 2  ;;  %v595_v34 = vmul.f32 %v3357_v50, %v510_v17  ;;  %v596_v56 = vmul.f32 %v3357_v50, %v512_v11 }
  0xce   : > { %v3627_v43 = vpop.eup %2997  ;;  %v733_v9 = vmul.f32 %v3359_v51, %v510_v17  ;;  %v734_v20 = vmul.f32 %v3359_v51, %v512_v11  ;;  %v871_v61 = vmul.f32 %v3362_v53, %v510_v17  ;;  %v872_v63 = vmul.f32 %v3362_v53, %v512_v11 }
  0xcf   : > { %v3633_v55 = vpop.eup %2999  ;;  %v571_v26 = vmul.f32 %v3366_v59, %v510_v17  ;;  %v650_v13 = vrot.slane %v595_v34, 1  ;;  %v652_v40 = vrot.slane %v596_v56, 1  ;;  %v572_v21 = vmul.f32 %v3366_v59, %v512_v11 }
  0xd0   : > { %v788_v5 = vrot.slane %v733_v9, 2  ;;  %v790_v35 = vrot.slane %v734_v20, 2  ;;  %v926_v12 = vrot.slane %v871_v61, 3  ;;  %v928_v47 = vrot.slane %v872_v63, 3 }
  0xd1   : > { %v651_v25 = vsel %vm632_vm3, %v648_v4, %v650_v13  ;;  %v653_v18 = vsel %vm632_vm3, %v650_v13, %v652_v40  ;;  %v655_v48 = vsel %vm632_vm3, %v652_v40, %v654_v3  ;;  %v1009_v29 = vmul.f32 %v3370_v62, %v510_v17  ;;  %v382_v17 = vpop.xlane.xlu0 %381 }
  0xd2   : > { %v3002_v49 = vpop.eup %3001  ;;  %v708_v28 = vadd.f32 %v651_v25, %v570_v60  ;;  %v709_v34 = vadd.f32 %v653_v18, %v571_v26  ;;  %v710_v56 = vadd.f32 %v655_v48, %v572_v21  ;;  %3003 = vpow2.f32 %v2852_v22 }
  0xd3   : > { %v789_v9 = vsel %vm770_vm4, %v786_v6, %v788_v5  ;;  %v791_v52 = vsel %vm770_vm4, %v788_v5, %v790_v35  ;;  %v1010_v4 = vmul.f32 %v3370_v62, %v512_v11  ;;  %3005 = vpow2.f32 %v2853_v57  ;;  %v1810_v57 = vld [vmem:[%s4978_s3 + $0x30] sm:$0xff]  ;;  %v1809_v11 = vld [vmem:[%s4978_s3 + $0x28] sm:$0xff] }
  0xd4   : > { %v793_v20 = vsel %vm770_vm4, %v790_v35, %v5012_v58  ;;  %v846_v61 = vadd.f32 %v789_v9, %v708_v28  ;;  %v847_v60 = vadd.f32 %v791_v52, %v709_v34  ;;  %v5011_v48 = vrot.slane %v3613_v54, 4 }
  0xd5   : > { %v848_v63 = vadd.f32 %v793_v20, %v710_v56  ;;  %v5063_v22 = vrot.slane %v3513_v42, 3  ;;  %v929_v6 = vsel %vm908_vm5, %v926_v12, %v928_v47  ;;  %v5064_v28 = vrot.slane %v3609_v32, 3 }
  0xd6   : > { %v985_v40 = vadd.f32 %v929_v6, %v847_v60  ;;  %v1064_v42 = vrot.slane %v1009_v29, 4  ;;  %v1066_v5 = vrot.slane %v1010_v4, 4  ;;  %v5010_v35 = vrot.slane %v3619_v41, 6 }
  0xd7   : > { %v927_v33 = vsel %vm908_vm5, %v5063_v22, %v926_v12  ;;  %v931_v26 = vsel %vm908_vm5, %v928_v47, %v5064_v28  ;;  %v517_v12 = vrot.slane %v3621_v37, 6  ;;  %v5065_v25 = vrot.slane %v3517_v39, 4 }
  0xd8   : > { %v984_v13 = vadd.f32 %v927_v33, %v846_v61  ;;  %v986_v21 = vadd.f32 %v931_v26, %v848_v63  ;;  %v422_v34 = vmul.f32 0.25, %v382_v17  ;;  %v1894_v56 = vpack.c.bf16 %v1810_v57, %v1810_v57  ;;  %v3004_v52 = vpop.eup %3003 }
  0xd9   : > { %v1065_v18 = vsel %vm1046_vm6, %v5065_v25, %v1064_v42  ;;  %v1893_v9 = vpack.c.bf16 %v1809_v11, %v1809_v11  ;;  %v1067_v20 = vsel %vm1046_vm6, %v1064_v42, %v1066_v5  ;;  %v1069_v29 = vsel %vm1046_vm6, %v1066_v5, %v5011_v48  ;;  %v3006_v37 = vpop.eup %3005 }
  0xda   : > { %v1122_v47 = vadd.f32 %v1065_v18, %v984_v13  ;;  %v3680_v4 = vsel %vm491_vm2, %v517_v12, %v5010_v35  ;;  %3007 = vrcp.f32 %v3593_v10  ;;  %v1123_v39 = vadd.f32 %v1067_v20, %v985_v40  ;;  %2236 = vperm.xlu2 %2984, %v1894_v56  }
  0xdb   : > { %v1124_v61 = vadd.f32 %v1069_v29, %v986_v21  ;;  %v3685_v60 = vmul.f32 %v3357_v50, %v3680_v4  ;;  %3009 = vrcp.f32 %v3603_v14  ;;  %v3690_v22 = vmul.f32 %v3359_v51, %v3680_v4  ;;  %2227 = vperm.xlu0 %2986, %v1893_v9  }
  0xdc   : > { %v2854_v63 = vmul.f32 -1.442695, %v1122_v47  ;;  %v3694_v33 = vmul.f32 %v3362_v53, %v3680_v4  ;;  %3011 = vrcp.f32 %v3605_v36  ;;  %v3697_v6 = vadd.f32 1.0, %v3002_v49 }
  0xdd   : > { %v573_v17 = vmul.f32 %v3366_v59, %v3587_v44  ;;  %v515_v57 = vrot.slane %v422_v34, 6  ;;  %v3701_v11 = vadd.f32 1.0, %v3004_v52  ;;  %v3703_v28 = vadd.f32 1.0, %v3006_v37  ;;  %v394_v44 = vpop.xlane.xlu1 %393 }
  0xde   : > { %v2855_v26 = vmul.f32 -1.442695, %v1123_v39  ;;  %v3707_v13 = vmul.f32 %v3370_v62, %v3680_v4  ;;  %v2856_v40 = vmul.f32 -1.442695, %v1124_v61  ;;  %v5017_v42 = vrot.slane %v3685_v60, 1 }
  0xdf   : > { %5066 = vst [vmem:[#allocation19_spill] sm:$0xff] %v3703_v28  ;;  %v5067_v21 = vrot.slane %v3523_v27, 6  ;;  %v518_v5 = vsel %vm491_vm2, %v515_v57, %v517_v12  ;;  %3013 = vpow2.f32 %v2854_v63  ;;  %v5068_v24 = vrot.slane %v3601_v19, 2 }
  0xe0   : > { %v3717_v34 = vpop.eup %3007  ;;  %v599_v56 = vmul.f32 %v3357_v50, %v518_v5  ;;  %v737_v52 = vmul.f32 %v3359_v51, %v518_v5  ;;  %3015 = vpow2.f32 %v2855_v26  ;;  %v875_v47 = vmul.f32 %v3362_v53, %v518_v5 }
  0xe1   : > { %v516_v49 = vsel %vm491_vm2, %v5067_v21, %v515_v57  ;;  %v3723_v20 = vpop.eup %3009  ;;  %v397_v21 = vpop.xlane.xlu2 %396  ;;  %v575_v35 = vmul.f32 %v3366_v59, %v518_v5  ;;  %v1013_v25 = vmul.f32 %v3370_v62, %v518_v5  ;;  %3017 = vpow2.f32 %v2856_v40 }
  0xe2   : > { %v598_v18 = vmul.f32 %v3357_v50, %v516_v49  ;;  %v736_v9 = vmul.f32 %v3359_v51, %v516_v49  ;;  %v874_v27 = vmul.f32 %v3362_v53, %v516_v49  ;;  %v574_v12 = vmul.f32 %v3366_v59, %v516_v49  ;;  %v3727_v37 = vpop.eup %3011 }
  0xe3   : > { %v658_v39 = vrot.slane %v599_v56, 1  ;;  %v796_v63 = vrot.slane %v737_v52, 2  ;;  %v1012_v57 = vmul.f32 %v3370_v62, %v516_v49  ;;  %v934_v52 = vrot.slane %v875_v47, 3 }
  0xe4   : > { %v656_v29 = vrot.slane %v598_v18, 1  ;;  %v794_v61 = vrot.slane %v736_v9, 2  ;;  %v932_v26 = vrot.slane %v874_v27, 3  ;;  %v3739_v45 = vmul.f32 0.25, %v397_v21 }
  0xe5   : > { %v661_v56 = vsel %vm632_vm3, %v658_v39, %v5017_v42  ;;  %v3014_v49 = vpop.eup %3013  ;;  %v5069_v27 = vrot.slane %v3690_v22, 2  ;;  %v1072_v40 = vrot.slane %v1013_v25, 4  ;;  %3019 = vrcp.f32 %v3697_v6 }
  0xe6   : > { %v657_v48 = vsel %vm632_vm3, %v654_v3, %v656_v29  ;;  %v659_v18 = vsel %vm632_vm3, %v656_v29, %v658_v39  ;;  %v713_v38 = vadd.f32 %v661_v56, %v575_v35  ;;  %v795_v3 = vsel %vm770_vm4, %v5068_v24, %v794_v61  ;;  %v391_v56 = vpop.xlane.xlu0 %390 }
  0xe7   : > { %v711_v9 = vadd.f32 %v657_v48, %v573_v17  ;;  %v712_v58 = vadd.f32 %v659_v18, %v574_v12  ;;  %v797_v5 = vsel %vm770_vm4, %v794_v61, %v796_v63  ;;  %v799_v29 = vsel %vm770_vm4, %v796_v63, %v5069_v27  ;;  %v3016_v48 = vpop.eup %3015 }
  0xe8   : > { %v1070_v39 = vrot.slane %v1012_v57, 4  ;;  %v851_v42 = vadd.f32 %v799_v29, %v713_v38  ;;  %v5019_v35 = vrot.slane %v3707_v13, 4  ;;  %v5070_v12 = vrot.slane %v3609_v32, 3  ;;  %v1813_v38 = vld [vmem:[%s4978_s3 + $0x48] sm:$0xff]  ;;  %v1812_v32 = vld [vmem:[%s4978_s3 + $0x40] sm:$0xff] }
  0xe9   : > { %v849_v17 = vadd.f32 %v795_v3, %v711_v9  ;;  %v850_v47 = vadd.f32 %v797_v5, %v712_v58  ;;  %v935_v21 = vsel %vm908_vm5, %v932_v26, %v934_v52  ;;  %v5071_v61 = vrot.slane %v3694_v33, 3  ;;  %v3018_v3 = vpop.eup %3017 }
  0xea   : > { %v933_v19 = vsel %vm908_vm5, %v5070_v12, %v932_v26  ;;  %v3763_v25 = vadd.f32 1.0, %v3014_v49  ;;  %v5073_v26 = vrot.slane %v3613_v54, 4  ;;  %v426_v24 = vmul.f32 0.25, %v394_v44 }
  0xeb   : > { %v937_v18 = vsel %vm908_vm5, %v934_v52, %v5071_v61  ;;  %v987_v63 = vadd.f32 %v933_v19, %v849_v17  ;;  %v988_v57 = vadd.f32 %v935_v21, %v850_v47  ;;  %v5018_v52 = vrot.slane %v3739_v45, 6  ;;  %v406_v21 = vpop.xlane.xlu2 %405  ;;  %v3782_v61 = vpop.eup %3019 }
  0xec   : > { %v989_v58 = vadd.f32 %v937_v18, %v851_v42  ;;  %5072 = vst [vmem:[#allocation20_spill] sm:$0xff] %v3763_v25  ;;  %v1071_v9 = vsel %vm1046_vm6, %v5073_v26, %v1070_v39  ;;  %v3769_v5 = vadd.f32 1.0, %v3016_v48  ;;  %v1073_v42 = vsel %vm1046_vm6, %v1070_v39, %v1072_v40 }
  0xed   : > { %v1125_v27 = vadd.f32 %v1071_v9, %v987_v63  ;;  %v425_v29 = vmul.f32 0.25, %v391_v56  ;;  %v1075_v17 = vsel %vm1046_vm6, %v1072_v40, %v5019_v35  ;;  %v523_v49 = vrot.slane %v426_v24, 6  ;;  %v403_v40 = vpop.xlane.xlu1 %402 }
  0xee   : > { %v1897_v47 = vpack.c.bf16 %v1813_v38, %v1813_v38  ;;  %v1896_v12 = vpack.c.bf16 %v1812_v32, %v1812_v32  ;;  %3021 = vrcp.f32 %v3701_v11  ;;  %v1126_v54 = vadd.f32 %v1073_v42, %v988_v57  ;;  %v400_v35 = vpop.xlane.xlu0 %399 }
  0xef   : > { %v1127_v19 = vadd.f32 %v1075_v17, %v989_v58  ;;  %3023 = vrcp.f32 %v3703_v28  ;;  %v2857_v44 = vmul.f32 -1.442695, %v1125_v27  ;;  %v3780_v39 = vsel %vm491_vm2, %v523_v49, %v5018_v52 }
  0xf0   : > { %v521_v48 = vrot.slane %v425_v29, 6  ;;  %2263 = vperm.xlu2 %2984, %v1897_v47   ;;  %2254 = vperm.xlu0 %2986, %v1896_v12   ;;  %3025 = vrcp.f32 %v3763_v25  ;;  %v576_v18 = vmul.f32 %v3366_v59, %v3680_v4  ;;  %v3789_v56 = vmul.f32 %v3357_v50, %v3780_v39 }
  0xf1   : > { %v3791_v63 = vadd.f32 1.0, %v3018_v3  ;;  %3027 = vrcp.f32 %v3769_v5  ;;  %v5075_v57 = vrot.slane %v3619_v41, 6  ;;  %v3797_v38 = vmul.f32 0.25, %v406_v21 }
  0xf2   : > { %v3799_v32 = vmul.f32 -1.442695, %v1126_v54  ;;  %v3801_v26 = vmul.f32 -1.442695, %v1127_v19  ;;  %v524_v4 = vsel %vm491_vm2, %v521_v48, %v523_v49  ;;  %v3804_v9 = vmul.f32 0.25, %v403_v40 }
  0xf3   : > { %5074 = vst [vmem:[#allocation21_spill] sm:$0xff] %v3791_v63  ;;  %v522_v58 = vsel %vm491_vm2, %v5075_v57, %v521_v48  ;;  %3029 = vpow2.f32 %v2857_v44  ;;  %v3809_v3 = vmul.f32 %v3359_v51, %v3780_v39  ;;  %v3813_v41 = vmul.f32 %v3362_v53, %v3780_v39 }
  0xf4   : > { %v3815_v42 = vpop.eup %3021  ;;  %v601_v27 = vmul.f32 %v3357_v50, %v522_v58  ;;  %v602_v29 = vmul.f32 %v3357_v50, %v524_v4  ;;  %v739_v17 = vmul.f32 %v3359_v51, %v522_v58  ;;  %v740_v49 = vmul.f32 %v3359_v51, %v524_v4 }
  0xf5   : > { %v3821_v47 = vpop.eup %3023  ;;  %v3825_v12 = vmul.f32 %v3370_v62, %v3780_v39  ;;  %v877_v54 = vmul.f32 %v3362_v53, %v522_v58  ;;  %v878_v19 = vmul.f32 %v3362_v53, %v524_v4  ;;  %v1015_v21 = vmul.f32 %v3370_v62, %v522_v58 }
  0xf6   : > { %5076 = vst [vmem:[#allocation22_spill] sm:$0xff] %v3821_v47  ;;  %v3830_v44 = vpop.eup %3025  ;;  %v662_v48 = vrot.slane %v601_v27, 1  ;;  %v664_v40 = vrot.slane %v602_v29, 1  ;;  %v800_v57 = vrot.slane %v739_v17, 2  ;;  %v802_v52 = vrot.slane %v740_v49, 2 }
  0xf7   : > { %5077 = vst [vmem:[#allocation23_spill] sm:$0xff] %v3830_v44  ;;  %v3832_v24 = vpop.eup %3027  ;;  %v577_v30 = vmul.f32 %v3366_v59, %v522_v58  ;;  %v578_v31 = vmul.f32 %v3366_v59, %v524_v4  ;;  %v938_v23 = vrot.slane %v877_v54, 3  ;;  %v5078_v15 = vrot.slane %v3685_v60, 1 }
  0xf8   : > { %v665_v0 = vsel %vm632_vm3, %v662_v48, %v664_v40  ;;  %v5079_v27 = vrot.slane %v3789_v56, 1  ;;  %v940_v17 = vrot.slane %v878_v19, 3  ;;  %v1016_v58 = vmul.f32 %v3370_v62, %v524_v4 }
  0xf9   : > { %v663_v16 = vsel %vm632_vm3, %v5078_v15, %v662_v48  ;;  %v3030_v49 = vpop.eup %3029  ;;  %v715_v2 = vadd.f32 %v665_v0, %v577_v30  ;;  %v5080_v54 = vrot.slane %v3690_v22, 2  ;;  %v803_v15 = vsel %vm770_vm4, %v800_v57, %v802_v52 }
  0xfa   : > { %v667_v29 = vsel %vm632_vm3, %v664_v40, %v5079_v27  ;;  %v714_v46 = vadd.f32 %v663_v16, %v576_v18  ;;  %v1076_v48 = vrot.slane %v1015_v21, 4  ;;  %v5042_v25 = vrot.slane %v3825_v12, 4 }
  0xfb   : > { %v716_v44 = vadd.f32 %v667_v29, %v578_v31  ;;  %v801_v60 = vsel %vm770_vm4, %v5080_v54, %v800_v57  ;;  %v5081_v40 = vrot.slane %v3809_v3, 2  ;;  %v853_v1 = vadd.f32 %v803_v15, %v715_v2  ;;  %v409_v15 = vpop.xlane.xlu0 %408 }
  0xfc   : > { %v852_v27 = vadd.f32 %v801_v60, %v714_v46  ;;  %v5082_v0 = vrot.slane %v3694_v33, 3  ;;  %v941_v31 = vsel %vm908_vm5, %v938_v23, %v940_v17  ;;  %v5041_v22 = vrot.slane %v3797_v38, 6 }
  0xfd   : > { %v805_v19 = vsel %vm770_vm4, %v802_v52, %v5081_v40  ;;  %v5083_v18 = vrot.slane %v3813_v41, 3  ;;  %v991_v57 = vadd.f32 %v941_v31, %v853_v1  ;;  %v1078_v29 = vrot.slane %v1016_v58, 4 }
  0xfe   : > { %v854_v16 = vadd.f32 %v805_v19, %v716_v44  ;;  %v939_v30 = vsel %vm908_vm5, %v5082_v0, %v938_v23  ;;  %v5084_v46 = vrot.slane %v3707_v13, 4  ;;  %v529_v33 = vrot.slane %v3804_v9, 6 }
  0xff   : > { %v943_v4 = vsel %vm908_vm5, %v940_v17, %v5083_v18  ;;  %v990_v21 = vadd.f32 %v939_v30, %v852_v27  ;;  %v428_v52 = vmul.f32 0.25, %v400_v35  ;;  %3031 = vrcp.f32 %v3791_v63 }
 0x100   : > { %v992_v54 = vadd.f32 %v943_v4, %v854_v16  ;;  %v1077_v2 = vsel %vm1046_vm6, %v5084_v46, %v1076_v48  ;;  %v1079_v23 = vsel %vm1046_vm6, %v1076_v48, %v1078_v29  ;;  %v1081_v44 = vsel %vm1046_vm6, %v1078_v29, %v5042_v25 }
 0x101   : > { %v1128_v17 = vadd.f32 %v1077_v2, %v990_v21  ;;  %v1129_v60 = vadd.f32 %v1079_v23, %v991_v57  ;;  %v3874_v13 = vsel %vm491_vm2, %v529_v33, %v5041_v22  ;;  %v527_v58 = vrot.slane %v428_v52, 6 }
 0x102   : > { %v1130_v1 = vadd.f32 %v1081_v44, %v992_v54  ;;  %3033 = vpow2.f32 %v3799_v32  ;;  %v3879_v9 = vmul.f32 %v3357_v50, %v3874_v13  ;;  %v3883_v48 = vmul.f32 %v3359_v51, %v3874_v13 }
 0x103   : > { %v2860_v35 = vmul.f32 -1.442695, %v1128_v17  ;;  %3035 = vpow2.f32 %v3801_v26  ;;  %v579_v40 = vmul.f32 %v3366_v59, %v3780_v39  ;;  %v2861_v19 = vmul.f32 -1.442695, %v1129_v60 }
 0x104   : > { %v3890_v27 = vmul.f32 %v3727_v37, %v3605_v36  ;;  %v3892_v32 = vadd.f32 1.0, %v3030_v49  ;;  %v3896_v16 = vmul.f32 %v3362_v53, %v3874_v13  ;;  %v5085_v0 = vrot.slane %v3739_v45, 6 }
 0x105   : > { %v3901_v31 = vmul.f32 0.25, %v409_v15  ;;  %3037 = vpow2.f32 %v2860_v35  ;;  %v2862_v26 = vmul.f32 -1.442695, %v1130_v1  ;;  %v3905_v39 = vmul.f32 %v3370_v62, %v3874_v13  ;;  %v3908_v49 = vpop.eup %3031 }
 0x106   : > { %v528_v30 = vsel %vm491_vm2, %v5085_v0, %v527_v58  ;;  %v530_v18 = vsel %vm491_vm2, %v527_v58, %v529_v33  ;;  %5086 = vst [vmem:[#allocation24_spill] sm:$0xff] %v3908_v49  ;;  %3039 = vpow2.f32 %v2861_v19  ;;  %v672_v4 = vrot.slane %v3879_v9, 1 }
 0x107   : > { %v604_v45 = vmul.f32 %v3357_v50, %v528_v30  ;;  %v605_v57 = vmul.f32 %v3357_v50, %v530_v18  ;;  %v742_v29 = vmul.f32 %v3359_v51, %v528_v30  ;;  %v743_v54 = vmul.f32 %v3359_v51, %v530_v18 }
 0x108   : > { %v880_v46 = vmul.f32 %v3362_v53, %v528_v30  ;;  %v3034_v2 = vpop.eup %3033  ;;  %v881_v23 = vmul.f32 %v3362_v53, %v530_v18  ;;  %v1018_v44 = vmul.f32 %v3370_v62, %v528_v30  ;;  %v1019_v15 = vmul.f32 %v3370_v62, %v530_v18 }
 0x109   : > { %v668_v52 = vrot.slane %v604_v45, 1  ;;  %v3036_v17 = vpop.eup %3035  ;;  %v670_v60 = vrot.slane %v605_v57, 1  ;;  %v806_v1 = vrot.slane %v742_v29, 2  ;;  %v808_v58 = vrot.slane %v743_v54, 2 }
 0x10a   : > { %v580_v35 = vmul.f32 %v3366_v59, %v528_v30  ;;  %v581_v19 = vmul.f32 %v3366_v59, %v530_v18  ;;  %v5087_v0 = vrot.slane %v3789_v56, 1  ;;  %v944_v25 = vrot.slane %v880_v46, 3 }
 0x10b   : > { %v3038_v45 = vpop.eup %3037  ;;  %v671_v33 = vsel %vm632_vm3, %v668_v52, %v670_v60  ;;  %v673_v57 = vsel %vm632_vm3, %v670_v60, %v672_v4  ;;  %v946_v54 = vrot.slane %v881_v23, 3  ;;  %3041 = vpow2.f32 %v2862_v26 }
 0x10c   : > { %v669_v22 = vsel %vm632_vm3, %v5087_v0, %v668_v52  ;;  %v3040_v21 = vpop.eup %3039  ;;  %v718_v49 = vadd.f32 %v671_v33, %v580_v35  ;;  %v719_v30 = vadd.f32 %v673_v57, %v581_v19  ;;  %v1082_v63 = vrot.slane %v1018_v44, 4 }
 0x10d   : > { %v717_v29 = vadd.f32 %v669_v22, %v579_v40  ;;  %v5088_v18 = vrot.slane %v3809_v3, 2  ;;  %v809_v46 = vsel %vm770_vm4, %v806_v1, %v808_v58  ;;  %v5089_v0 = vrot.slane %v3883_v48, 2 }
 0x10e   : > { %v1084_v47 = vrot.slane %v1019_v15, 4  ;;  %v3937_v28 = vadd.f32 1.0, %v3034_v2  ;;  %v856_v40 = vadd.f32 %v809_v46, %v718_v49  ;;  %v3939_v26 = vadd.f32 1.0, %v3036_v17 }
 0x10f   : > { %v807_v56 = vsel %vm770_vm4, %v5088_v18, %v806_v1  ;;  %v811_v52 = vsel %vm770_vm4, %v808_v58, %v5089_v0  ;;  %3043 = vrcp.f32 %v3892_v32  ;;  %v5090_v3 = vrot.slane %v3813_v41, 3 }
 0x110   : > { %v855_v22 = vadd.f32 %v807_v56, %v717_v29  ;;  %v857_v23 = vadd.f32 %v811_v52, %v719_v30  ;;  %v947_v44 = vsel %vm908_vm5, %v944_v25, %v946_v54  ;;  %v1086_v60 = vrot.slane %v3905_v39, 4 }
 0x111   : > { %v945_v33 = vsel %vm908_vm5, %v5090_v3, %v944_v25  ;;  %v994_v58 = vadd.f32 %v947_v44, %v856_v40  ;;  %v1256_v2 = vsub.f32 1.0, %v3890_v27  ;;  %v5091_v15 = vrot.slane %v3896_v16, 3  ;;  %v3042_v57 = vpop.eup %3041 }
 0x112   : > { %v993_v1 = vadd.f32 %v945_v33, %v855_v22  ;;  %v5092_v17 = vrot.slane %v3825_v12, 4  ;;  %v1085_v41 = vsel %vm1046_vm6, %v1082_v63, %v1084_v47  ;;  %v533_v19 = vrot.slane %v3901_v31, 6 }
 0x113   : > { %v949_v49 = vsel %vm908_vm5, %v946_v54, %v5091_v15  ;;  %3045 = vrcp.f32 %v3937_v28  ;;  %v1132_v30 = vadd.f32 %v1085_v41, %v994_v58  ;;  %v582_v27 = vmul.f32 %v3366_v59, %v3874_v13 }
 0x114   : > { %v1083_v35 = vsel %vm1046_vm6, %v5092_v17, %v1082_v63  ;;  %v995_v25 = vadd.f32 %v949_v49, %v857_v23  ;;  %3047 = vrcp.f32 %v3939_v26  ;;  %v5093_v54 = vrot.slane %v3797_v38, 6 }
 0x115   : > { %v1131_v29 = vadd.f32 %v1083_v35, %v993_v1  ;;  %v559_v18 = vsel %vm491_vm2, %v533_v19, 0.0  ;;  %v3964_v63 = vadd.f32 1.0, %v3038_v45  ;;  %v3966_v31 = vadd.f32 1.0, %v3040_v21  ;;  %v3972_v0 = vpop.eup %3043 }
 0x116   : > { %v534_v12 = vsel %vm491_vm2, %v5093_v54, %v533_v19  ;;  %v1087_v56 = vsel %vm1046_vm6, %v1084_v47, %v1086_v60  ;;  %v1257_v46 = vmul.f32 %v3727_v37, %v1256_v2  ;;  %v608_v38 = vmul.f32 %v3357_v50, %v559_v18 }
 0x117   : > { %v607_v13 = vmul.f32 %v3357_v50, %v534_v12  ;;  %v745_v52 = vmul.f32 %v3359_v51, %v534_v12  ;;  %v746_v22 = vmul.f32 %v3359_v51, %v559_v18  ;;  %v3978_v45 = vadd.f32 1.0, %v3042_v57 }
 0x118   : > { %v1133_v21 = vadd.f32 %v1087_v56, %v995_v25  ;;  %v2863_v40 = vmul.f32 -1.442695, %v1131_v29  ;;  %v2864_v23 = vmul.f32 -1.442695, %v1132_v30  ;;  %v676_v33 = vrot.slane %v608_v38, 1  ;;  %v1778_v38 = vld [vmem:[%s4977_s2 + $0x10] sm:$0xff] }
 0x119   : > { %v674_v3 = vrot.slane %v607_v13, 1  ;;  %v812_v47 = vrot.slane %v745_v52, 2  ;;  %v883_v44 = vmul.f32 %v3362_v53, %v534_v12  ;;  %v3981_v1 = vpop.eup %3045  ;;  %v583_v58 = vmul.f32 %v3366_v59, %v534_v12 }
 0x11a   : > { %v1258_v50 = vadd.f32 %v3727_v37, %v1257_v46  ;;  %vm1259_vm7 = vweird.f32 %v3605_v36  ;;  %vm1260_vm8 = vweird.f32 %v3727_v37  ;;  %v3987_v51 = vpop.eup %3047  ;;  %v814_v49 = vrot.slane %v746_v22, 2 }
 0x11b   : > { %v675_v2 = vsel %vm632_vm3, %v672_v4, %v674_v3  ;;  %v677_v15 = vsel %vm632_vm3, %v674_v3, %v676_v33  ;;  %v884_v17 = vmul.f32 %v3362_v53, %v559_v18  ;;  %3049 = vpow2.f32 %v2863_v40  ;;  %vm4007_vm9 = vmor %vm1259_vm7, %vm1260_vm8 }
 0x11c   : > { %v720_v35 = vadd.f32 %v675_v2, %v582_v27  ;;  %v721_v59 = vadd.f32 %v677_v15, %v583_v58  ;;  %v1021_v41 = vmul.f32 %v3370_v62, %v534_v12  ;;  %3051 = vpow2.f32 %v2864_v23 }
 0x11d   : > { %v2865_v19 = vmul.f32 -1.442695, %v1133_v21  ;;  %v5094_v57 = vrot.slane %v3883_v48, 2  ;;  %v950_v29 = vrot.slane %v883_v44, 3  ;;  %v1022_v4 = vmul.f32 %v3370_v62, %v559_v18 }
 0x11e   : > { %v1263_v30 = vand.u32 2147483647, %v3605_v36  ;;  %v1265_v54 = vand.u32 2147483648, %v3605_v36  ;;  %3053 = vrcp.f32 %v3964_v63  ;;  %v815_v53 = vsel %vm770_vm4, %v812_v47, %v814_v49 }
 0x11f   : > { %v813_v25 = vsel %vm770_vm4, %v5094_v57, %v812_v47  ;;  %v952_v27 = vrot.slane %v884_v17, 3  ;;  %v1225_v62 = vmul.f32 %v3717_v34, %v3593_v10  ;;  %3055 = vrcp.f32 %v3966_v31 }
 0x120   : > { %v858_v9 = vadd.f32 %v813_v25, %v720_v35  ;;  %v859_v12 = vadd.f32 %v815_v53, %v721_v59  ;;  %v1088_v18 = vrot.slane %v1021_v41, 4  ;;  %v1262_v56 = vsel %vm4007_vm9, %v3727_v37, %v1258_v50  ;;  %v1776_v25 = vld [vmem:[%s4977_s2] sm:$0xff] }
 0x121   : > { %3057 = vrcp.f32 %v3978_v45  ;;  %v5097_v46 = vrot.slane %v3896_v16, 3  ;;  %v1266_v13 = vor.u32 1.1754944e-38, %v1265_v54  ;;  %v1226_v52 = vsub.f32 1.0, %v1225_v62  ;;  %v3050_v22 = vpop.eup %3049 }
 0x122   : > { %3059 = vpow2.f32 %v2865_v19  ;;  %v1090_v40 = vrot.slane %v1022_v4, 4  ;;  %vm1264_vm10 = vcmp.eq.f32.partialorder %v1263_v30, 8.507059e+37  ;;  %v3052_v23 = vpop.eup %3051  ;;  %v953_v37 = vsel %vm908_vm5, %v950_v29, %v952_v27 }
 0x123   : > { %v951_v36 = vsel %vm908_vm5, %v5097_v46, %v950_v29  ;;  %v1267_v3 = vsel %vm1264_vm10, %v1266_v13, %v1262_v56  ;;  %v1227_v33 = vmul.f32 %v3717_v34, %v1226_v52  ;;  %vm1230_vm11 = vweird.f32 %v3717_v34 }
 0x124   : > { %v996_v21 = vadd.f32 %v951_v36, %v858_v9  ;;  %v997_v16 = vadd.f32 %v953_v37, %v859_v12  ;;  %v1089_v47 = vsel %vm1046_vm6, %v1086_v60, %v1088_v18  ;;  %v1834_v44 = vmul.f32 %v1778_v38, %v1267_v3  ;;  %v4031_v50 = vpop.eup %3053  ;;  %v1777_v38 = vld [vmem:[%s4977_s2 + $0x8] sm:$0xff] }
 0x125   : > { %v1233_v58 = vand.u32 2147483647, %v3593_v10  ;;  %v1228_v2 = vadd.f32 %v3717_v34, %v1227_v33  ;;  %vm1229_vm12 = vweird.f32 %v3593_v10  ;;  %v1235_v15 = vand.u32 2147483648, %v3593_v10  ;;  %v4038_v17 = vpop.eup %3055 }
 0x126   : > { %v1240_v49 = vmul.f32 %v3723_v20, %v3603_v14  ;;  %v4040_v35 = vadd.f32 1.0, %v3050_v22  ;;  %v1091_v39 = vsel %vm1046_vm6, %v1088_v18, %v1090_v40  ;;  %v1134_v60 = vadd.f32 %v1089_v47, %v996_v21  ;;  %vm1231_vm13 = vmor %vm1229_vm12, %vm1230_vm11  ;;  %v449_v47 = vpop.xlane.xlu2 %448 }
 0x127   : > { %v1856_v59 = vpack.c.bf16 %v1834_v44, %v1834_v44  ;;  %v4045_v41 = vpop.eup %3057  ;;  %v4047_v19 = vadd.f32 1.0, %v3052_v23  ;;  %v1232_v10 = vsel %vm1231_vm13, %v3717_v34, %v1228_v2  ;;  %v1236_v57 = vor.u32 1.1754944e-38, %v1235_v15 }
 0x128   : > { %v1241_v29 = vsub.f32 1.0, %v1240_v49  ;;  %v3060_v9 = vpop.eup %3059  ;;  %v1135_v4 = vadd.f32 %v1091_v39, %v997_v16  ;;  %vm1234_vm14 = vcmp.eq.f32.partialorder %v1233_v58, 8.507059e+37  ;;  %v1250_v30 = vand.u32 2147483648, %v3603_v14 }
 0x129   : > { %1936 = vperm.xlu0 %2986, %v1856_v59   ;;  %v1285_v54 = vmul.f32 %v3633_v55, %v3557_v7  ;;  %v1237_v53 = vsel %vm1234_vm14, %v1236_v57, %v1232_v10  ;;  %vm1245_vm15 = vweird.f32 %v3723_v20  ;;  %v1248_v34 = vand.u32 2147483647, %v3603_v14  ;;  %v446_v57 = vpop.xlane.xlu1 %445 }
 0x12a   : > { %v1242_v27 = vmul.f32 %v3723_v20, %v1241_v29  ;;  %v2866_v48 = vmul.f32 -1.442695, %v1134_v60  ;;  %v1832_v62 = vmul.f32 %v1776_v25, %v1237_v53  ;;  %vm1244_vm0 = vweird.f32 %v3603_v14 }
 0x12b   : > { %v1286_v12 = vsub.f32 1.0, %v1285_v54  ;;  %vm1290_vm2 = vweird.f32 %v3633_v55  ;;  %v1295_v56 = vand.u32 2147483648, %v3557_v7  ;;  %v1270_v46 = vmul.f32 %v3627_v43, %v3555_v8  ;;  %vm1246_vm6 = vmor %vm1244_vm0, %vm1245_vm15 }
 0x12c   : > { %v1243_v18 = vadd.f32 %v3723_v20, %v1242_v27  ;;  %v1854_v36 = vpack.c.bf16 %v1832_v62, %v1832_v62  ;;  %v1251_v13 = vor.u32 1.1754944e-38, %v1250_v30  ;;  %v1293_v14 = vand.u32 2147483647, %v3557_v7 }
 0x12d   : > { %v1287_v52 = vmul.f32 %v3633_v55, %v1286_v12  ;;  %vm1249_vm7 = vcmp.eq.f32.partialorder %v1248_v34, 8.507059e+37  ;;  %vm1289_vm8 = vweird.f32 %v3557_v7  ;;  %v1271_v21 = vsub.f32 1.0, %v1270_v46  ;;  %v1780_v7 = vld [vmem:[%s4977_s2 + $0x20] sm:$0xff] }
 0x12e   : > { %v1247_v22 = vsel %vm1246_vm6, %v3723_v20, %v1243_v18  ;;  %1918 = vperm.xlu1 %2985, %v1854_v36   ;;  %v1296_v37 = vor.u32 1.1754944e-38, %v1295_v56  ;;  %vm1275_vm9 = vweird.f32 %v3627_v43  ;;  %vm1291_vm10 = vmor %vm1289_vm8, %vm1290_vm2  ;;  %v1278_v33 = vand.u32 2147483647, %v3555_v8 }
 0x12f   : > { %v1252_v40 = vsel %vm1249_vm7, %v1251_v13, %v1247_v22  ;;  %v1288_v23 = vadd.f32 %v3633_v55, %v1287_v52  ;;  %v1272_v20 = vmul.f32 %v3627_v43, %v1271_v21  ;;  %v1280_v16 = vand.u32 2147483648, %v3555_v8 }
 0x130   : > { %v1833_v3 = vmul.f32 %v1777_v38, %v1252_v40  ;;  %v2867_v44 = vmul.f32 -1.442695, %v1135_v4  ;;  %vm1294_vm11 = vcmp.eq.f32.partialorder %v1293_v14, 8.507059e+37  ;;  %v4089_v2 = vmul.f32 0.25, %v449_v47 }
 0x131   : > { %v1292_v58 = vsel %vm1291_vm10, %v3633_v55, %v1288_v23  ;;  %v1273_v39 = vadd.f32 %v3627_v43, %v1272_v20  ;;  %vm1274_vm12 = vweird.f32 %v3555_v8  ;;  %v4093_v60 = vadd.f32 1.0, %v3060_v9  ;;  %v1779_v55 = vld [vmem:[%s4977_s2 + $0x18] sm:$0xff] }
 0x132   : > { %v1855_v15 = vpack.c.bf16 %v1833_v3, %v1833_v3  ;;  %v1297_v49 = vsel %vm1294_vm11, %v1296_v37, %v1292_v58  ;;  %3061 = vpow2.f32 %v2866_v48  ;;  %vm1276_vm13 = vmor %vm1274_vm12, %vm1275_vm9  ;;  %v1281_v10 = vor.u32 1.1754944e-38, %v1280_v16  ;;  %v1781_v16 = vld [vmem:[%s4977_s2 + $0x28] sm:$0xff] }
 0x133   : > { %v1836_v59 = vmul.f32 %v1780_v7, %v1297_v49  ;;  %v1277_v25 = vsel %vm1276_vm13, %v3627_v43, %v1273_v39  ;;  %vm1279_vm14 = vcmp.eq.f32.partialorder %v1278_v33, 8.507059e+37  ;;  %v1562_v8 = vrot.slane %v4089_v2, 7 }
 0x134   : > { %1927 = vperm.xlu2 %2984, %v1855_v15   ;;  %v463_v29 = vmul.f32 0.25, %v446_v57  ;;  %v1282_v4 = vsel %vm1279_vm14, %v1281_v10, %v1277_v25  ;;  %vm1560_vm15 = vcmask 1040384   ;;  %v1300_v30 = vmul.f32 %v3782_v61, %v3697_v6  ;;  %v452_v25 = vpop.xlane.xlu0 %451 }
 0x135   : > { %v1858_v9 = vpack.c.bf16 %v1836_v59, %v1836_v59  ;;  %3063 = vpow2.f32 %v2867_v44  ;;  %v1835_v54 = vmul.f32 %v1779_v55, %v1282_v4  ;;  %v4105_v53 = vstv %s4074_s30  ;;  %v1782_v4 = vld [vmem:[%s4977_s2 + $0x30] sm:$0xff] }
 0x136   : > { %v1561_v27 = vrot.slane %v463_v29, 7  ;;  %v4108_v34 = vstv %s4070_s29  ;;  %v4111_v48 = vstv %s4078_s7  ;;  %v1301_v43 = vsub.f32 1.0, %v1300_v30  ;;  %s2952_s29 = smul.u32 112, %s5164_s22 }
 0x137   : > { %1954 = vperm.xlu1 %2985, %v1858_v9   ;;  %v1315_v62 = vmul.f32 %v3815_v42, %v3701_v11  ;;  %v1308_v56 = vand.u32 2147483647, %v3697_v6  ;;  %v1310_v46 = vand.u32 2147483648, %v3697_v6  ;;  %vm1304_vm0 = vweird.f32 %v3697_v6 }
 0x138   : > { %v4118_v12 = vsel %vm1560_vm15, %v1561_v27, %v1562_v8  ;;  %v1578_v18 = vsel %vm1560_vm15, 0.0, %v1561_v27  ;;  %v4123_v36 = vpop.eup %3061  ;;  %vm1305_vm2 = vweird.f32 %v3782_v61  ;;  %v1857_v52 = vpack.c.bf16 %v1835_v54, %v1835_v54  ;;  %s4658_s7 = scalar_lea.vmem %s4981_s6, %s2952_s29 }
 0x139   : > { %v1590_v13 = vmul.f32 %v4105_v53, %v1578_v18  ;;  %v4128_v38 = vmul.f32 %v4105_v53, %v4118_v12  ;;  %v1627_v14 = vmul.f32 %v4111_v48, %v1578_v18  ;;  %v4135_v22 = vmul.f32 %v4111_v48, %v4118_v12  ;;  %vm1306_vm8 = vmor %vm1304_vm0, %vm1305_vm2 }
 0x13a   : > { %v1302_v21 = vmul.f32 %v3782_v61, %v1301_v43  ;;  %v1316_v37 = vsub.f32 1.0, %v1315_v62  ;;  %vm1319_vm6 = vweird.f32 %v3701_v11  ;;  %vm1309_vm7 = vcmp.eq.f32.partialorder %v1308_v56, 8.507059e+37  ;;  %v458_v43 = vpop.xlane.xlu2 %457  ;;  %v455_v62 = vpop.xlane.xlu1 %454 }
 0x13b   : > { %v1602_v40 = vrot.slane %v1590_v13, 1  ;;  %v1603_v23 = vrot.slane %v4128_v38, 1  ;;  %v4140_v3 = vpop.eup %3063  ;;  %v1311_v20 = vor.u32 1.1754944e-38, %v1310_v46  ;;  %v1323_v33 = vand.u32 2147483647, %v3701_v11 }
 0x13c   : > { %1945 = vperm.xlu2 %2984, %v1857_v52   ;;  %v1303_v7 = vadd.f32 %v3782_v61, %v1302_v21  ;;  %v1317_v47 = vmul.f32 %v3815_v42, %v1316_v37  ;;  %vm1320_vm9 = vweird.f32 %v3815_v42  ;;  %v1325_v44 = vand.u32 2147483648, %v3701_v11  ;;  %v1785_v21 = vld [vmem:[%s4977_s2 + $0x48] sm:$0xff] }
 0x13d   : > { %v1360_v58 = vmul.f32 %v3832_v24, %v3769_v5  ;;  %v1582_v15 = vmul.f32 %v4108_v34, %v1578_v18  ;;  %v1639_v49 = vrot.slane %v1627_v14, 2  ;;  %v1640_v39 = vrot.slane %v4135_v22, 2  ;;  %vm1321_vm10 = vmor %vm1319_vm6, %vm1320_vm9 }
 0x13e   : > { %v1307_v6 = vsel %vm1306_vm8, %v3782_v61, %v1303_v7  ;;  %v1604_v59 = vsel %vm632_vm3, %v1602_v40, %v1603_v23  ;;  %v1318_v55 = vadd.f32 %v3815_v42, %v1317_v47  ;;  %vm1324_vm11 = vcmp.eq.f32.partialorder %v1323_v33, 8.507059e+37  ;;  %v5099_v47 = vld [vmem:[#allocation22_spill] sm:$0xff] }
 0x13f   : > { %v1312_v10 = vsel %vm1309_vm7, %v1311_v20, %v1307_v6  ;;  %v1361_v57 = vsub.f32 1.0, %v1360_v58  ;;  %v1326_v9 = vor.u32 1.1754944e-38, %v1325_v44  ;;  %vm1365_vm12 = vweird.f32 %v3832_v24 }
 0x140   : > { %v1837_v29 = vmul.f32 %v1781_v16, %v1312_v10  ;;  %v1322_v61 = vsel %vm1321_vm10, %v3815_v42, %v1318_v55  ;;  %v1368_v54 = vand.u32 2147483647, %v3769_v5  ;;  %v1370_v27 = vand.u32 2147483648, %v3769_v5  ;;  %v5098_v16 = vld [vmem:[#allocation19_spill] sm:$0xff] }
 0x141   : > { %v1362_v30 = vmul.f32 %v3832_v24, %v1361_v57  ;;  %v1619_v11 = vadd.f32 %v1604_v59, %v1582_v15  ;;  %v1327_v56 = vsel %vm1324_vm11, %v1326_v9, %v1322_v61  ;;  %v465_v46 = vmul.f32 0.25, %v452_v25 }
 0x142   : > { %v1859_v18 = vpack.c.bf16 %v1837_v29, %v1837_v29  ;;  %v1641_v13 = vsel %vm770_vm4, %v1639_v49, %v1640_v39  ;;  %v1838_v52 = vmul.f32 %v1782_v4, %v1327_v56  ;;  %vm1364_vm13 = vweird.f32 %v3769_v5 }
 0x143   : > { %v1363_v14 = vadd.f32 %v3832_v24, %v1362_v30  ;;  %vm1366_vm14 = vmor %vm1364_vm13, %vm1365_vm12  ;;  %v1371_v42 = vor.u32 1.1754944e-38, %v1370_v27  ;;  %v1564_v40 = vrot.slane %v465_v46, 7  ;;  %v4183_v37 = vmul.f32 0.25, %v458_v43 }
 0x144   : > { %1963 = vperm.xlu2 %2984, %v1859_v18   ;;  %v466_v7 = vmul.f32 0.25, %v455_v62  ;;  %v1860_v20 = vpack.c.bf16 %v1838_v52, %v1838_v52  ;;  %vm1369_vm0 = vcmp.eq.f32.partialorder %v1368_v54, 8.507059e+37  ;;  %v1330_v5 = vmul.f32 %v5099_v47, %v5098_v16 }
 0x145   : > { %v1367_v33 = vsel %vm1366_vm14, %v3832_v24, %v1363_v14  ;;  %v1565_v58 = vsel %vm1560_vm15, %v1562_v8, %v1564_v40  ;;  %v1568_v15 = vrot.slane %v4183_v37, 7  ;;  %v1656_v6 = vadd.f32 %v1641_v13, %v1619_v11 }
 0x146   : > { %v1372_v44 = vsel %vm1369_vm0, %v1371_v42, %v1367_v33  ;;  %v1566_v49 = vrot.slane %v466_v7, 7  ;;  %1972 = vperm.xlu1 %2985, %v1860_v20   ;;  %v1592_v10 = vmul.f32 %v4105_v53, %v1565_v58  ;;  %v1629_v55 = vmul.f32 %v4111_v48, %v1565_v58  ;;  %v5104_v33 = vld [vmem:[#allocation21_spill] sm:$0xff] }
 0x147   : > { %v1841_v59 = vmul.f32 %v1785_v21, %v1372_v44  ;;  %3065 = vrcp.f32 %v4040_v35  ;;  %v1583_v24 = vmul.f32 %v4108_v34, %v4118_v12  ;;  %v1331_v9 = vsub.f32 1.0, %v1330_v5  ;;  %v5102_v44 = vld [vmem:[#allocation20_spill] sm:$0xff] }
 0x148   : > { %v1567_v57 = vsel %vm1560_vm15, %v1564_v40, %v1566_v49  ;;  %v4201_v2 = vsel %vm1560_vm15, %v1566_v49, %v1568_v15  ;;  %v1605_v25 = vrot.slane %v1592_v10, 1  ;;  %v1642_v29 = vrot.slane %v1629_v55, 2 }
 0x149   : > { %v1863_v8 = vpack.c.bf16 %v1841_v59, %v1841_v59  ;;  %3067 = vrcp.f32 %v4047_v19  ;;  %v1593_v4 = vmul.f32 %v4105_v53, %v1567_v57  ;;  %v4207_v61 = vmul.f32 %v4105_v53, %v4201_v2 }
 0x14a   : > { %v1630_v12 = vmul.f32 %v4111_v48, %v1567_v57  ;;  %3069 = vrcp.f32 %v4093_v60  ;;  %v2870_v30 = vmul.f32 -1.442695, %v1656_v6  ;;  %v1606_v54 = vsel %vm632_vm3, %v1603_v23, %v1605_v25 }
 0x14b   : > { %1999 = vperm.xlu0 %2986, %v1863_v8   ;;  %v4216_v27 = vmul.f32 %v4111_v48, %v4201_v2  ;;  %v1620_v43 = vadd.f32 %v1606_v54, %v1583_v24  ;;  %v1643_v62 = vsel %vm770_vm4, %v1640_v39, %v1642_v29  ;;  %v1607_v11 = vrot.slane %v1593_v4, 1 }
 0x14c   : > { %v1609_v18 = vrot.slane %v4207_v61, 1  ;;  %v1584_v56 = vmul.f32 %v4108_v34, %v1565_v58  ;;  %v1585_v46 = vmul.f32 %v4108_v34, %v1567_v57  ;;  %v1332_v38 = vmul.f32 %v5099_v47, %v1331_v9  ;;  %v5103_v58 = vld [vmem:[#allocation23_spill] sm:$0xff] }
 0x14d   : > { %vm1335_vm2 = vweird.f32 %v5099_v47  ;;  %v4226_v23 = vpop.eup %3065  ;;  %v1608_v13 = vsel %vm632_vm3, %v1605_v25, %v1607_v11  ;;  %v1644_v39 = vrot.slane %v1630_v12, 2  ;;  %v1646_v52 = vrot.slane %v4216_v27, 2 }
 0x14e   : > { %v1610_v22 = vsel %vm632_vm3, %v1607_v11, %v1609_v18  ;;  %v1657_v14 = vadd.f32 %v1643_v62, %v1620_v43  ;;  %v1333_v42 = vadd.f32 %v5099_v47, %v1332_v38  ;;  %vm1334_vm6 = vweird.f32 %v5098_v16  ;;  %v462_v62 = vpop.xlane.xlu0 %461 }
 0x14f   : > { %v1338_v21 = vand.u32 2147483647, %v5098_v16  ;;  %v4236_v40 = vpop.eup %3067  ;;  %v4239_v7 = vadd.f32 1.0, %v4123_v36  ;;  %v4242_v20 = vadd.f32 1.0, %v4140_v3  ;;  %vm4244_vm7 = vmor %vm1334_vm6, %vm1335_vm2  ;;  %v1340_v5 = vand.u32 2147483648, %v5098_v16  ;;  %v1783_v16 = vld [vmem:[%s4977_s2 + $0x38] sm:$0xff] }
 0x150   : > { %v1345_v49 = vmul.f32 %v5103_v58, %v5102_v44  ;;  %v4251_v6 = vpop.eup %3069  ;;  %3071 = vpow2.f32 %v2870_v30  ;;  %v1621_v59 = vadd.f32 %v1608_v13, %v1584_v56  ;;  %v1622_v10 = vadd.f32 %v1610_v22, %v1585_v46  ;;  %v1784_v13 = vld [vmem:[%s4977_s2 + $0x40] sm:$0xff] }
 0x151   : > { %v1337_v36 = vsel %vm4244_vm7, %v5099_v47, %v1333_v42  ;;  %v1645_v3 = vsel %vm770_vm4, %v1642_v29, %v1644_v39  ;;  %v1647_v55 = vsel %vm770_vm4, %v1644_v39, %v1646_v52  ;;  %v1341_v24 = vor.u32 1.1754944e-38, %v1340_v5  ;;  %v5105_v5 = vld [vmem:[#allocation24_spill] sm:$0xff] }
 0x152   : > { %v1346_v57 = vsub.f32 1.0, %v1345_v49  ;;  %v2871_v8 = vmul.f32 -1.442695, %v1657_v14  ;;  %vm1339_vm8 = vcmp.eq.f32.partialorder %v1338_v21, 8.507059e+37  ;;  %vm1350_vm9 = vweird.f32 %v5103_v58 }
 0x153   : > { %v1405_v25 = vmul.f32 %v3981_v1, %v3937_v28  ;;  %v1342_v47 = vsel %vm1339_vm8, %v1341_v24, %v1337_v36  ;;  %v1353_v9 = vand.u32 2147483647, %v5102_v44  ;;  %v1355_v4 = vand.u32 2147483648, %v5102_v44 }
 0x154   : > { %v1347_v29 = vmul.f32 %v5103_v58, %v1346_v57  ;;  %v1658_v12 = vadd.f32 %v1645_v3, %v1621_v59  ;;  %v1659_v30 = vadd.f32 %v1647_v55, %v1622_v10  ;;  %v1839_v54 = vmul.f32 %v1783_v16, %v1342_v47 }
 0x155   : > { %v1406_v43 = vsub.f32 1.0, %v1405_v25  ;;  %vm1349_vm10 = vweird.f32 %v5102_v44  ;;  %v1356_v56 = vor.u32 1.1754944e-38, %v1355_v4  ;;  %vm1410_vm11 = vweird.f32 %v3981_v1 }
 0x156   : > { %v1348_v11 = vadd.f32 %v5103_v58, %v1347_v29  ;;  %v3072_v46 = vpop.eup %3071  ;;  %v1861_v38 = vpack.c.bf16 %v1839_v54, %v1839_v54  ;;  %vm1351_vm12 = vmor %vm1349_vm10, %vm1350_vm9  ;;  %v1413_v39 = vand.u32 2147483647, %v3937_v28  ;;  %v1415_v14 = vand.u32 2147483648, %v3937_v28 }
 0x157   : > { %v1407_v22 = vmul.f32 %v3981_v1, %v1406_v43  ;;  %vm1354_vm13 = vcmp.eq.f32.partialorder %v1353_v9, 8.507059e+37  ;;  %v468_v21 = vmul.f32 0.25, %v462_v62  ;;  %v1375_v44 = vmul.f32 %v5105_v5, %v5104_v33 }
 0x158   : > { %v1352_v42 = vsel %vm1351_vm12, %v5103_v58, %v1348_v11  ;;  %3073 = vpow2.f32 %v2871_v8  ;;  %1981 = vperm.xlu2 %2984, %v1861_v38   ;;  %vm1409_vm14 = vweird.f32 %v3937_v28  ;;  %v1416_v36 = vor.u32 1.1754944e-38, %v1415_v14  ;;  %v1788_v58 = vld [vmem:[%s4977_s2 + $0x60] sm:$0xff] }
 0x159   : > { %v1357_v49 = vsel %vm1354_vm13, %v1356_v56, %v1352_v42  ;;  %v1408_v59 = vadd.f32 %v3981_v1, %v1407_v22  ;;  %vm1411_vm0 = vmor %vm1409_vm14, %vm1410_vm11  ;;  %v1570_v3 = vrot.slane %v468_v21, 7  ;;  %v1376_v55 = vsub.f32 1.0, %v1375_v44 }
 0x15a   : > { %v1840_v10 = vmul.f32 %v1784_v13, %v1357_v49  ;;  %3075 = vrcp.f32 %v4239_v7  ;;  %v4291_v24 = vadd.f32 1.0, %v3072_v46  ;;  %vm1414_vm2 = vcmp.eq.f32.partialorder %v1413_v39, 8.507059e+37  ;;  %v1786_v13 = vld [vmem:[%s4977_s2 + $0x50] sm:$0xff] }
 0x15b   : > { %v1412_v16 = vsel %vm1411_vm0, %v3981_v1, %v1408_v59  ;;  %v2872_v57 = vmul.f32 -1.442695, %v1658_v12  ;;  %v1571_v25 = vsel %vm1560_vm15, %v1568_v15, %v1570_v3  ;;  %v1377_v9 = vmul.f32 %v5105_v5, %v1376_v55 }
 0x15c   : > { %v1862_v28 = vpack.c.bf16 %v1840_v10, %v1840_v10  ;;  %v1417_v8 = vsel %vm1414_vm2, %v1416_v36, %v1412_v16  ;;  %v1579_v29 = vsel %vm908_vm5, %v1571_v25, 0.0  ;;  %vm1380_vm6 = vweird.f32 %v5105_v5 }
 0x15d   : > { %v1844_v47 = vmul.f32 %v1788_v58, %v1417_v8  ;;  %3077 = vrcp.f32 %v4242_v20  ;;  %v2873_v4 = vmul.f32 -1.442695, %v1659_v30  ;;  %vm1379_vm7 = vweird.f32 %v5104_v33 }
 0x15e   : > { %1990 = vperm.xlu1 %2985, %v1862_v28   ;;  %v3074_v1 = vpop.eup %3073  ;;  %v1595_v54 = vmul.f32 %v4105_v53, %v1579_v29  ;;  %v1378_v37 = vadd.f32 %v5105_v5, %v1377_v9  ;;  %v1383_v15 = vand.u32 2147483647, %v5104_v33  ;;  %3079 = vrcp.f32 %v4291_v24  ;;  %vm4306_vm5 = vmor %vm1379_vm7, %vm1380_vm6 }
 0x15f   : > { %v1866_v12 = vpack.c.bf16 %v1844_v47, %v1844_v47  ;;  %v1385_v62 = vand.u32 2147483648, %v5104_v33  ;;  %v1390_v30 = vmul.f32 %v3972_v0, %v3892_v32  ;;  %3081 = vpow2.f32 %v2872_v57 }
 0x160   : > { %v4313_v11 = vpop.eup %3075  ;;  %v1382_v53 = vsel %vm4306_vm5, %v5105_v5, %v1378_v37  ;;  %v4320_v56 = vmul.f32 %v4108_v34, %v4201_v2  ;;  %3083 = vpow2.f32 %v2873_v4  ;;  %v4323_v46 = vmul.f32 %v4111_v48, %v1579_v29 }
 0x161   : > { %2026 = vperm.xlu0 %2986, %v1866_v12   ;;  %v1386_v38 = vor.u32 1.1754944e-38, %v1385_v62  ;;  %v4328_v22 = vadd.f32 1.0, %v3074_v1  ;;  %v1611_v39 = vrot.slane %v1595_v54, 1  ;;  %vm1384_vm15 = vcmp.eq.f32.partialorder %v1383_v15, 8.507059e+37  ;;  %v1791_v54 = vld [vmem:[%s4977_s2 + $0x78] sm:$0xff]  ;;  %v4369_v15 = vpop.permute.xlu2 %2182 }
 0x162   : > { %v1391_v14 = vsub.f32 1.0, %v1390_v30  ;;  %v1587_v21 = vmul.f32 %v4108_v34, %v1579_v29  ;;  %v1400_v33 = vand.u32 2147483648, %v3892_v32  ;;  %v1450_v48 = vmul.f32 %v4038_v17, %v3966_v31 }
 0x163   : > { %v4330_v42 = vpop.eup %3077  ;;  %v1387_v2 = vsel %vm1384_vm15, %v1386_v38, %v1382_v53  ;;  %vm1395_vm8 = vweird.f32 %v3972_v0  ;;  %v1398_v49 = vand.u32 2147483647, %v3892_v32  ;;  %v1648_v10 = vrot.slane %v4323_v46, 2 }
 0x164   : > { %v1842_v5 = vmul.f32 %v1786_v13, %v1387_v2  ;;  %v1392_v44 = vmul.f32 %v3972_v0, %v1391_v14  ;;  %v4339_v59 = vpop.eup %3079  ;;  %vm1394_vm9 = vweird.f32 %v3892_v32  ;;  %v1451_v34 = vsub.f32 1.0, %v1450_v48  ;;  %v1787_v32 = vld [vmem:[%s4977_s2 + $0x58] sm:$0xff] }
 0x165   : > { %v1458_v36 = vand.u32 2147483647, %v3966_v31  ;;  %v4344_v58 = vpop.eup %3081  ;;  %v1612_v3 = vsel %vm632_vm3, %v1609_v18, %v1611_v39  ;;  %v1460_v57 = vand.u32 2147483648, %v3966_v31  ;;  %vm1396_vm10 = vmor %vm1394_vm9, %vm1395_vm8  ;;  %v1401_v8 = vor.u32 1.1754944e-38, %v1400_v33 }
 0x166   : > { %v1864_v55 = vpack.c.bf16 %v1842_v5, %v1842_v5  ;;  %v1393_v16 = vadd.f32 %v3972_v0, %v1392_v44  ;;  %v4351_v28 = vpop.eup %3083  ;;  %v1452_v25 = vmul.f32 %v4038_v17, %v1451_v34  ;;  %vm1455_vm11 = vweird.f32 %v4038_v17 }
 0x167   : > { %v1420_v61 = vmul.f32 %v3987_v51, %v3939_v26  ;;  %v1624_v18 = vadd.f32 %v1611_v39, %v1587_v21  ;;  %vm1399_vm3 = vcmp.eq.f32.partialorder %v1398_v49, 8.507059e+37  ;;  %vm1454_vm12 = vweird.f32 %v3966_v31  ;;  %v1789_v21 = vld [vmem:[%s4977_s2 + $0x68] sm:$0xff] }
 0x168   : > { %2008 = vperm.xlu2 %2984, %v1864_v55   ;;  %v1397_v47 = vsel %vm1396_vm10, %v3972_v0, %v1393_v16  ;;  %v1453_v9 = vadd.f32 %v4038_v17, %v1452_v25  ;;  %vm1459_vm13 = vcmp.eq.f32.partialorder %v1458_v36, 8.507059e+37  ;;  %vm1456_vm14 = vmor %vm1454_vm12, %vm1455_vm11  ;;  %v1461_v12 = vor.u32 1.1754944e-38, %v1460_v57 }
 0x169   : > { %v1402_v29 = vsel %vm1399_vm3, %v1401_v8, %v1397_v47  ;;  %v1421_v4 = vsub.f32 1.0, %v1420_v61  ;;  %v1430_v37 = vand.u32 2147483648, %v3939_v26  ;;  %v1435_v0 = vmul.f32 %v4031_v50, %v3964_v63  ;;  %v4406_v61 = vpop.permute.xlu2 %2209 }
 0x16a   : > { %v1843_v1 = vmul.f32 %v1787_v32, %v1402_v29  ;;  %v1457_v31 = vsel %vm1456_vm14, %v4038_v17, %v1453_v9  ;;  %vm1425_vm0 = vweird.f32 %v3987_v51  ;;  %v1428_v62 = vand.u32 2147483647, %v3939_v26 }
 0x16b   : > { %v1422_v43 = vmul.f32 %v3987_v51, %v1421_v4  ;;  %v1649_v30 = vsel %vm770_vm4, %v1646_v52, %v1648_v10  ;;  %v1462_v46 = vsel %vm1459_vm13, %v1461_v12, %v1457_v31  ;;  %vm1424_vm2 = vweird.f32 %v3939_v26 }
 0x16c   : > { %v1865_v53 = vpack.c.bf16 %v1843_v1, %v1843_v1  ;;  %v1847_v38 = vmul.f32 %v1791_v54, %v1462_v46  ;;  %v1436_v39 = vsub.f32 1.0, %v1435_v0  ;;  %v1443_v17 = vand.u32 2147483647, %v3964_v63  ;;  %vm1426_vm6 = vmor %vm1424_vm2, %vm1425_vm0 }
 0x16d   : > { %v1423_v13 = vadd.f32 %v3987_v51, %v1422_v43  ;;  %v1431_v14 = vor.u32 1.1754944e-38, %v1430_v37  ;;  %vm1440_vm7 = vweird.f32 %v4031_v50  ;;  %v1445_v27 = vand.u32 2147483648, %v3964_v63 }
 0x16e   : > { %2017 = vperm.xlu1 %2985, %v1865_v53   ;;  %v1495_v26 = vmul.f32 %v4236_v40, %v4047_v19  ;;  %v1869_v52 = vpack.c.bf16 %v1847_v38, %v1847_v38  ;;  %vm1429_vm4 = vcmp.eq.f32.partialorder %v1428_v62, 8.507059e+37  ;;  %v1437_v33 = vmul.f32 %v4031_v50, %v1436_v39 }
 0x16f   : > { %v1427_v2 = vsel %vm1426_vm6, %v3987_v51, %v1423_v13  ;;  %v1623_v48 = vadd.f32 %v1612_v3, %v4320_v56  ;;  %v1661_v5 = vadd.f32 %v1648_v10, %v1624_v18  ;;  %vm1439_vm5 = vweird.f32 %v3964_v63  ;;  %v1790_v51 = vld [vmem:[%s4977_s2 + $0x70] sm:$0xff] }
 0x170   : > { %v1432_v44 = vsel %vm1429_vm4, %v1431_v14, %v1427_v2  ;;  %2053 = vperm.xlu0 %2986, %v1869_v52   ;;  %v1438_v34 = vadd.f32 %v4031_v50, %v1437_v33  ;;  %vm1444_vm15 = vcmp.eq.f32.partialorder %v1443_v17, 8.507059e+37  ;;  %v1496_v36 = vsub.f32 1.0, %v1495_v26  ;;  %vm1441_vm8 = vmor %vm1439_vm5, %vm1440_vm7  ;;  %v1793_v26 = vld [vmem:[%s4977_s2 + $0x88] sm:$0xff] }
 0x171   : > { %v1845_v49 = vmul.f32 %v1789_v21, %v1432_v44  ;;  %v1446_v55 = vor.u32 1.1754944e-38, %v1445_v27  ;;  %vm1500_vm9 = vweird.f32 %v4236_v40  ;;  %v1505_v56 = vand.u32 2147483648, %v4047_v19  ;;  %v4447_v44 = vpop.permute.xlu2 %2236 }
 0x172   : > { %v1465_v63 = vmul.f32 %v4045_v41, %v3978_v45  ;;  %v1442_v3 = vsel %vm1441_vm8, %v4031_v50, %v1438_v34  ;;  %v1497_v16 = vmul.f32 %v4236_v40, %v1496_v36  ;;  %v1503_v57 = vand.u32 2147483647, %v4047_v19  ;;  %v1794_v50 = vld [vmem:[%s4977_s2 + $0x90] sm:$0xff] }
 0x173   : > { %v1867_v10 = vpack.c.bf16 %v1845_v49, %v1845_v49  ;;  %v1660_v8 = vadd.f32 %v1649_v30, %v1623_v48  ;;  %v1447_v32 = vsel %vm1444_vm15, %v1446_v55, %v1442_v3  ;;  %vm1499_vm10 = vweird.f32 %v4047_v19  ;;  %v1792_v30 = vld [vmem:[%s4977_s2 + $0x80] sm:$0xff] }
 0x174   : > { %v1466_v25 = vsub.f32 1.0, %v1465_v63  ;;  %v1846_v18 = vmul.f32 %v1790_v51, %v1447_v32  ;;  %v1498_v47 = vadd.f32 %v4236_v40, %v1497_v16  ;;  %v1506_v29 = vor.u32 1.1754944e-38, %v1505_v56  ;;  %vm1501_vm3 = vmor %vm1499_vm10, %vm1500_vm9 }
 0x175   : > { %2035 = vperm.xlu2 %2984, %v1867_v10   ;;  %vm1470_vm11 = vweird.f32 %v4045_v41  ;;  %v1473_v19 = vand.u32 2147483647, %v3978_v45  ;;  %v1475_v4 = vand.u32 2147483648, %v3978_v45  ;;  %v1480_v1 = vmul.f32 %v4226_v23, %v4040_v35 }
 0x176   : > { %v1467_v9 = vmul.f32 %v4045_v41, %v1466_v25  ;;  %v1868_v12 = vpack.c.bf16 %v1846_v18, %v1846_v18  ;;  %v1502_v54 = vsel %vm1501_vm3, %v4236_v40, %v1498_v47  ;;  %vm1504_vm12 = vcmp.eq.f32.partialorder %v1503_v57, 8.507059e+37 }
 0x177   : > { %vm1469_vm13 = vweird.f32 %v3978_v45  ;;  %v1507_v37 = vsel %vm1504_vm12, %v1506_v29, %v1502_v54  ;;  %v1476_v31 = vor.u32 1.1754944e-38, %v1475_v4  ;;  %v1481_v43 = vsub.f32 1.0, %v1480_v1  ;;  %v1795_v29 = vld [vmem:[%s4977_s2 + $0x98] sm:$0xff] }
 0x178   : > { %v1468_v0 = vadd.f32 %v4045_v41, %v1467_v9  ;;  %2044 = vperm.xlu1 %2985, %v1868_v12   ;;  %v1850_v62 = vmul.f32 %v1794_v50, %v1507_v37  ;;  %vm1471_vm14 = vmor %vm1469_vm13, %vm1470_vm11  ;;  %v1488_v53 = vand.u32 2147483647, %v4040_v35  ;;  %v1490_v40 = vand.u32 2147483648, %v4040_v35 }
 0x179   : > { %v1540_v45 = vmul.f32 %v4330_v42, %v4242_v20  ;;  %vm1474_vm0 = vcmp.eq.f32.partialorder %v1473_v19, 8.507059e+37  ;;  %v1482_v38 = vmul.f32 %v4226_v23, %v1481_v43  ;;  %vm1485_vm2 = vweird.f32 %v4226_v23 }
 0x17a   : > { %v1472_v46 = vsel %vm1471_vm14, %v4045_v41, %v1468_v0  ;;  %v2875_v13 = vmul.f32 -1.442695, %v1661_v5  ;;  %v1872_v39 = vpack.c.bf16 %v1850_v62, %v1850_v62  ;;  %vm1484_vm6 = vweird.f32 %v4040_v35 }
 0x17b   : > { %v1477_v17 = vsel %vm1474_vm0, %v1476_v31, %v1472_v46  ;;  %v1483_v21 = vadd.f32 %v4226_v23, %v1482_v38  ;;  %v1541_v27 = vsub.f32 1.0, %v1540_v45  ;;  %vm1545_vm7 = vweird.f32 %v4330_v42  ;;  %vm1486_vm4 = vmor %vm1484_vm6, %vm1485_vm2  ;;  %v4480_v31 = vpop.permute.xlu2 %2263  ;;  %v1815_v45 = vld [vmem:[%s4978_s3 + $0x58] sm:$0xff] }
 0x17c   : > { %v1848_v14 = vmul.f32 %v1792_v30, %v1477_v17  ;;  %2080 = vperm.xlu0 %2986, %v1872_v39   ;;  %vm1489_vm5 = vcmp.eq.f32.partialorder %v1488_v53, 8.507059e+37  ;;  %v1491_v41 = vor.u32 1.1754944e-38, %v1490_v40  ;;  %v1550_v52 = vand.u32 2147483648, %v4242_v20  ;;  %v1796_v40 = vld [vmem:[%s4977_s2 + $0xa0] sm:$0xff] }
 0x17d   : > { %v1510_v2 = vmul.f32 %v4251_v6, %v4093_v60  ;;  %v1487_v33 = vsel %vm1486_vm4, %v4226_v23, %v1483_v21  ;;  %v1542_v48 = vmul.f32 %v4330_v42, %v1541_v27  ;;  %v1548_v5 = vand.u32 2147483647, %v4242_v20  ;;  %v1797_v23 = vld [vmem:[%s4977_s2 + $0xa8] sm:$0xff]  ;;  %v1816_v17 = vld [vmem:[%s4978_s3 + $0x60] sm:$0xff]  ;;  %v4504_v21 = vpop.permute.xlu0 %2200 }
 0x17e   : > { %v1870_v35 = vpack.c.bf16 %v1848_v14, %v1848_v14  ;;  %v2874_v49 = vmul.f32 -1.442695, %v1660_v8  ;;  %v1492_v34 = vsel %vm1489_vm5, %v1491_v41, %v1487_v33  ;;  %vm1544_vm15 = vweird.f32 %v4242_v20  ;;  %v4463_v8 = vpop.permute.xlu1 %2191 }
 0x17f   : > { %v1511_v36 = vsub.f32 1.0, %v1510_v2  ;;  %v1849_v55 = vmul.f32 %v1793_v26, %v1492_v34  ;;  %v1543_v51 = vadd.f32 %v4330_v42, %v1542_v48  ;;  %v1551_v56 = vor.u32 1.1754944e-38, %v1550_v52  ;;  %vm1546_vm9 = vmor %vm1544_vm15, %vm1545_vm7 }
 0x180   : > { %2062 = vperm.xlu2 %2984, %v1870_v35   ;;  %vm1515_vm8 = vweird.f32 %v4251_v6  ;;  %v1518_v10 = vand.u32 2147483647, %v4093_v60  ;;  %v1520_v20 = vand.u32 2147483648, %v4093_v60  ;;  %v1525_v3 = vmul.f32 %v4313_v11, %v4239_v7 }
 0x181   : > { %v1512_v63 = vmul.f32 %v4251_v6, %v1511_v36  ;;  %3085 = vpow2.f32 %v2875_v13  ;;  %v1871_v16 = vpack.c.bf16 %v1849_v55, %v1849_v55  ;;  %v1547_v57 = vsel %vm1546_vm9, %v4330_v42, %v1543_v51  ;;  %v4537_v36 = vld [vmem:[%s4978_s3 + $0x80] sm:$0xff] }
 0x182   : > { %vm1549_vm10 = vcmp.eq.f32.partialorder %v1548_v5, 8.507059e+37  ;;  %3087 = vpow2.f32 %v2874_v49  ;;  %vm1514_vm11 = vweird.f32 %v4093_v60  ;;  %v1521_v47 = vor.u32 1.1754944e-38, %v1520_v20  ;;  %v1818_v49 = vld [vmem:[%s4978_s3 + $0x70] sm:$0xff] }
 0x183   : > { %v1552_v32 = vsel %vm1549_vm10, %v1551_v56, %v1547_v57  ;;  %v1513_v25 = vadd.f32 %v4251_v6, %v1512_v63  ;;  %2071 = vperm.xlu1 %2985, %v1871_v16   ;;  %vm1516_vm3 = vmor %vm1514_vm11, %vm1515_vm8  ;;  %v1526_v42 = vsub.f32 1.0, %v1525_v3  ;;  %vm1519_vm12 = vcmp.eq.f32.partialorder %v1518_v10, 8.507059e+37 }
 0x184   : > { %v1853_v18 = vmul.f32 %v1797_v23, %v1552_v32  ;;  %vm1530_vm13 = vweird.f32 %v4313_v11  ;;  %v1535_v9 = vand.u32 2147483648, %v4239_v7  ;;  %v1533_v1 = vand.u32 2147483647, %v4239_v7  ;;  %v4547_v23 = vld [vmem:[%s4978_s3 + $0x88] sm:$0xff] }
 0x185   : > { %v1517_v50 = vsel %vm1516_vm3, %v4251_v6, %v1513_v25  ;;  %v1527_v4 = vmul.f32 %v4313_v11, %v1526_v42  ;;  %3089 = vrcp.f32 %v4328_v22  ;;  %v3148_v12 = vmov 839922192   ;;  %v4564_v42 = vld [vmem:[%s4978_s3 + $0x90] sm:$0xff] }
 0x186   : > { %v1875_v19 = vpack.c.bf16 %v1853_v18, %v1853_v18  ;;  %v1522_v60 = vsel %vm1519_vm12, %v1521_v47, %v1517_v50  ;;  %v1922_v54 = vunpack.c.l.s4 %v3148_v12  ;;  %vm1529_vm14 = vweird.f32 %v4239_v7  ;;  %v4502_v14 = vpop.permute.xlu1 %2218 }
 0x187   : > { %v1851_v37 = vmul.f32 %v1795_v29, %v1522_v60  ;;  %v3086_v0 = vpop.eup %3085  ;;  %v1528_v6 = vadd.f32 %v4313_v11, %v1527_v4  ;;  %v4483_v62 = vadd.f32 1.0, %v4344_v58  ;;  %vm1531_vm0 = vmor %vm1529_vm14, %vm1530_vm13  ;;  %v1536_v53 = vor.u32 1.1754944e-38, %v1535_v9  ;;  %v4569_v9 = vpop.permute.xlu0 %2227  ;;  %v4579_v60 = vld [vmem:[%s4978_s3 + $0xa0] sm:$0xff] }
 0x188   : > { %2107 = vperm.xlu0 %2986, %v1875_v19   ;;  %v3088_v43 = vpop.eup %3087  ;;  %v4494_v7 = vadd.f32 1.0, %v4351_v28  ;;  %vm1534_vm2 = vcmp.eq.f32.partialorder %v1533_v1, 8.507059e+37  ;;  %v4497_v58 = vunpack.c.0.s8 %v1922_v54  ;;  %v1899_v39 = vpack.c.bf16 %v1815_v45, %v1815_v45  ;;  %v4574_v19 = vld [vmem:[%s4978_s3 + $0x98] sm:$0xff]  ;;  %v5108_v1 = vld [vmem:[#allocation10_spill] sm:$0xff] }
 0x189   : > { %v1873_v30 = vpack.c.bf16 %v1851_v37, %v1851_v37  ;;  %v1532_v46 = vsel %vm1531_vm0, %v4313_v11, %v1528_v6  ;;  %3091 = vrcp.f32 %v4483_v62  ;;  %v4510_v11 = vadd.f32 1.0, %v3086_v0 }
 0x18a   : > { %v1537_v38 = vsel %vm1534_vm2, %v1536_v53, %v1532_v46  ;;  %3093 = vrcp.f32 %v4494_v7  ;;  %v4512_v41 = vadd.f32 1.0, %v3088_v43  ;;  %v2188_v26 = vperm.slane %v4369_v15, %v4497_v58  ;;  %v1817_v15 = vld [vmem:[%s4978_s3 + $0x68] sm:$0xff] }
 0x18b   : > { %2089 = vperm.xlu2 %2984, %v1873_v30   ;;  %v1852_v13 = vmul.f32 %v1796_v40, %v1537_v38  ;;  %v4506_v27 = vpop.eup %3089  ;;  %v1900_v52 = vpack.c.bf16 %v1816_v17, %v1816_v17  ;;  %v1687_v2 = vmul.f32 %v4339_v59, %v4291_v24  ;;  %v2215_v35 = vperm.slane %v4406_v61, %v4497_v58  ;;  %v1819_v61 = vld [vmem:[%s4978_s3 + $0x78] sm:$0xff]  ;;  %v4593_v43 = vld [vmem:[%s4978_s3 + $0xa8] sm:$0xff] }
 0x18c   : > { %v2197_v33 = vperm.slane %v4463_v8, %v4497_v58  ;;  %v1702_v48 = vmul.f32 %v4506_v27, %v4328_v22  ;;  %3095 = vrcp.f32 %v4510_v11  ;;  %v4542_v56 = vunpack.c.l.bf16 %v2188_v26 }
 0x18d   : > { %v1874_v28 = vpack.c.bf16 %v1852_v13, %v1852_v13  ;;  %v1688_v34 = vsub.f32 1.0, %v1687_v2  ;;  %3097 = vrcp.f32 %v4512_v41  ;;  %v4552_v20 = vunpack.c.l.bf16 %v2215_v35 }
 0x18e   : > { %v1928_v5 = vpop.permute.xlu2 %1927  ;;  %v1703_v55 = vsub.f32 1.0, %v1702_v48  ;;  %v2401_v3 = vunpack.c.l.bf16 %v2197_v33  ;;  %v1901_v16 = vpack.c.bf16 %v1817_v15, %v1817_v15  ;;  %v1902_v57 = vpack.c.bf16 %v1818_v49, %v1818_v49  ;;  %v4559_v29 = vpop.permute.xlu1 %2245 }
 0x18f   : > { %2098 = vperm.xlu1 %2985, %v1874_v28   ;;  %v4539_v51 = vpop.eup %3091  ;;  %v1933_v63 = vperm.slane %v1928_v5, %v4497_v58  ;;  %v1903_v8 = vpack.c.bf16 %v1819_v61, %v1819_v61  ;;  %v1904_v32 = vpack.c.bf16 %v4537_v36, %v4537_v36  ;;  %v1689_v25 = vmul.f32 %v4339_v59, %v1688_v34 }
 0x190   : > { %2281 = vperm.xlu0 %2986, %v1899_v39   ;;  %v4550_v10 = vpop.eup %3093  ;;  %v1905_v47 = vpack.c.bf16 %v4547_v23, %v4547_v23  ;;  %vm1691_vm6 = vweird.f32 %v4291_v24  ;;  %vm1692_vm7 = vweird.f32 %v4339_v59  ;;  %v1704_v50 = vmul.f32 %v4506_v27, %v1703_v55 }
 0x191   : > { %v2115_v18 = vunpack.c.l.bf16 %v1933_v63  ;;  %v1695_v4 = vand.u32 2147483647, %v4291_v24  ;;  %v5109_v12 = vunpack.c.h.bf16 %v5108_v1  ;;  %v1732_v37 = vmul.f32 %v4550_v10, %v4494_v7  ;;  %vm4613_vm15 = vmor %vm1691_vm6, %vm1692_vm7 }
 0x192   : > { %v1717_v0 = vmul.f32 %v4539_v51, %v4483_v62  ;;  %v4588_v6 = vpop.eup %3095  ;;  %v1697_v30 = vand.u32 2147483648, %v4291_v24  ;;  %vm1706_vm4 = vweird.f32 %v4328_v22  ;;  %vm1707_vm5 = vweird.f32 %v4506_v27 }
 0x193   : > { %2290 = vperm.xlu2 %2984, %v1900_v52   ;;  %v2137_v54 = vmul.f32 %v5109_v12, %v2115_v18  ;;  %v1710_v53 = vand.u32 2147483647, %v4328_v22  ;;  %v4599_v40 = vpop.eup %3097  ;;  %v1906_v45 = vpack.c.bf16 %v4564_v42, %v4564_v42  ;;  %v1690_v46 = vadd.f32 %v4339_v59, %v1689_v25  ;;  %vm4626_vm8 = vmor %vm1706_vm4, %vm1707_vm5  ;;  %v1798_v18 = vld [vmem:[%s4977_s2 + $0xb0] sm:$0xff] }
 0x194   : > { %v1712_v38 = vand.u32 2147483648, %v4328_v22  ;;  %v1907_v17 = vpack.c.bf16 %v4574_v19, %v4574_v19  ;;  %v1908_v28 = vpack.c.bf16 %v4579_v60, %v4579_v60  ;;  %v1705_v52 = vadd.f32 %v4506_v27, %v1704_v50 }
 0x195   : > { %v2159_v13 = vpack.c.bf16 %v2137_v54, %v2137_v54  ;;  %v1718_v2 = vsub.f32 1.0, %v1717_v0  ;;  %v2206_v35 = vperm.slane %v4504_v21, %v4497_v58  ;;  %v1909_v33 = vpack.c.bf16 %v4593_v43, %v4593_v43  ;;  %v1803_v21 = vld [vmem:[%s4977_s2 + $0xd8] sm:$0xf] }
 0x196   : > { %v1946_v39 = vpop.permute.xlu2 %1945  ;;  %v1733_v5 = vsub.f32 1.0, %v1732_v37  ;;  %vm4631_vm9 = vcmp.eq.f32.partialorder %v1695_v4, 8.507059e+37  ;;  %v1698_v49 = vor.u32 1.1754944e-38, %v1697_v30  ;;  %vm4635_vm10 = vcmp.eq.f32.partialorder %v1710_v53, 8.507059e+37  ;;  %v1802_v37 = vld [vmem:[%s4977_s2 + $0xd0] sm:$0xff] }
 0x197   : > { %2299 = vperm.xlu1 %2985, %v1901_v16   ;;  %v2379_v48 = vunpack.c.l.bf16 %v2159_v13  ;;  %v1747_v61 = vmul.f32 %v4599_v40, %v4512_v41  ;;  %v1694_v22 = vsel %vm4613_vm15, %v4339_v59, %v1690_v46  ;;  %v1713_v36 = vor.u32 1.1754944e-38, %v1712_v38 }
 0x198   : > { %2308 = vperm.xlu0 %2986, %v1902_v57   ;;  %v2233_v23 = vperm.slane %v4569_v9, %v4497_v58  ;;  %v1709_v63 = vsel %vm4626_vm8, %v4506_v27, %v1705_v52  ;;  %vm1736_vm11 = vweird.f32 %v4494_v7  ;;  %v1740_v16 = vand.u32 2147483647, %v4494_v7  ;;  %v4660_v27 = vpop.permute.xlu1 %2272  ;;  %v4669_v9 = vpop.permute.xlu0 %2254 }
 0x199   : > { %v2423_v55 = vadd.f32 %v2401_v3, %v2379_v48  ;;  %v1719_v57 = vmul.f32 %v4539_v51, %v1718_v2  ;;  %v1734_v25 = vmul.f32 %v4550_v10, %v1733_v5  ;;  %v1742_v59 = vand.u32 2147483648, %v4494_v7 }
 0x19a   : > { %vm1721_vm3 = vweird.f32 %v4483_v62  ;;  %v1699_v3 = vsel %vm4631_vm9, %v1698_v49, %v1694_v22  ;;  %vm1722_vm12 = vweird.f32 %v4539_v51  ;;  %v1725_v42 = vand.u32 2147483647, %v4483_v62  ;;  %v5126_v49 = vld [vmem:[#allocation9_spill] sm:$0xff] }
 0x19b   : > { %2317 = vperm.xlu2 %2984, %v1903_v8   ;;  %v2489_v8 = vmax.f32 %v2423_v55, 0.0  ;;  %v1748_v50 = vsub.f32 1.0, %v1747_v61  ;;  %vm1737_vm13 = vweird.f32 %v4550_v10  ;;  %v1727_v12 = vand.u32 2147483648, %v4483_v62  ;;  %vm4695_vm0 = vmor %vm1721_vm3, %vm1722_vm12 }
 0x19c   : > { %v4678_v54 = vunpack.c.l.bf16 %v2233_v23  ;;  %vm4680_vm14 = vcmp.eq.f32.partialorder %v1740_v16, 8.507059e+37  ;;  %v1720_v0 = vadd.f32 %v4539_v51, %v1719_v57  ;;  %v1951_v30 = vperm.slane %v1946_v39, %v4497_v58  ;;  %vm4705_vm2 = vmor %vm1736_vm11, %vm1737_vm13 }
 0x19d   : > { %v2511_v4 = vpack.c.bf16 %v2489_v8, %v2489_v8  ;;  %v4686_v53 = vmul.f32 %v1798_v18, %v1699_v3  ;;  %v1735_v46 = vadd.f32 %v4550_v10, %v1734_v25  ;;  %v1743_v38 = vor.u32 1.1754944e-38, %v1742_v59 }
 0x19e   : > { %v1762_v26 = vmul.f32 %v4588_v6, %v4510_v11  ;;  %v1964_v39 = vpop.permute.xlu2 %1963  ;;  %vm4709_vm6 = vcmp.eq.f32.partialorder %v1725_v42, 8.507059e+37  ;;  %v1749_v62 = vmul.f32 %v4599_v40, %v1748_v50  ;;  %v2117_v24 = vunpack.c.l.bf16 %v1951_v30 }
 0x19f   : > { %2326 = vperm.xlu1 %2985, %v1904_v32   ;;  %v1714_v32 = vsel %vm4635_vm10, %v1713_v36, %v1709_v63  ;;  %2533 = vst.msk [vmem:[%s4658_s7 + $0x4] sm:$0xf] %vm459_vm1, %v2511_v4  ;;  %v1728_v48 = vor.u32 1.1754944e-38, %v1727_v12  ;;  %vm1751_vm7 = vweird.f32 %v4512_v41  ;;  %v1755_v5 = vand.u32 2147483647, %v4512_v41 }
 0x1a0   : > { %2335 = vperm.xlu0 %2986, %v1905_v47   ;;  %v1799_v47 = vld [vmem:[%s4977_s2 + $0xb8] sm:$0xff]  ;;  %v1763_v15 = vsub.f32 1.0, %v1762_v26  ;;  %v1724_v7 = vsel %vm4695_vm0, %v4539_v51, %v1720_v0  ;;  %vm1752_vm4 = vweird.f32 %v4599_v40  ;;  %v5127_v34 = vunpack.c.h.bf16 %v5126_v49  ;;  %v1919_v8 = vpop.permute.xlu1 %1918 }
 0x1a1   : > { %v1969_v22 = vperm.slane %v1964_v39, %v4497_v58  ;;  %v1882_v36 = vpack.c.bf16 %v4686_v53, %v4686_v53  ;;  %v1739_v55 = vsel %vm4705_vm2, %v4550_v10, %v1735_v46  ;;  %v1757_v23 = vand.u32 2147483648, %v4512_v41  ;;  %v1937_v10 = vpop.permute.xlu0 %1936  ;;  %vm4744_vm15 = vmor %vm1751_vm7, %vm1752_vm4  ;;  %v5132_v41 = vld [vmem:[#allocation8_spill] sm:$0xff] }
 0x1a2   : > { %v2139_v61 = vmul.f32 %v5127_v34, %v2117_v24  ;;  %v1764_v63 = vmul.f32 %v4588_v6, %v1763_v15  ;;  %v1750_v51 = vadd.f32 %v4599_v40, %v1749_v62  ;;  %vm1766_vm5 = vweird.f32 %v4510_v11 }
 0x1a3   : > { %2344 = vperm.xlu2 %2984, %v1906_v45   ;;  %v1877_v45 = vmul.f32 %v1799_v47, %v1714_v32  ;;  %v2119_v57 = vunpack.c.l.bf16 %v1969_v22  ;;  %v1729_v25 = vsel %vm4709_vm6, %v1728_v48, %v1724_v7  ;;  %vm4748_vm8 = vcmp.eq.f32.partialorder %v1755_v5, 8.507059e+37 }
 0x1a4   : > { %v2161_v16 = vpack.c.bf16 %v2139_v61, %v2139_v61  ;;  %vm1767_vm9 = vweird.f32 %v4588_v6  ;;  %v1772_v3 = vand.u32 2147483648, %v4510_v11  ;;  %v5133_v18 = vunpack.c.h.bf16 %v5132_v41 }
 0x1a5   : > { %v1942_v50 = vperm.slane %v1937_v10, %v4497_v58  ;;  %v1758_v32 = vor.u32 1.1754944e-38, %v1757_v23  ;;  %v1765_v47 = vadd.f32 %v4588_v6, %v1764_v63  ;;  %v1770_v4 = vand.u32 2147483647, %v4510_v11  ;;  %vm4772_vm10 = vmor %vm1766_vm5, %vm1767_vm9 }
 0x1a6   : > { %v2381_v59 = vunpack.c.l.bf16 %v2161_v16  ;;  %v2141_v42 = vmul.f32 %v5133_v18, %v2119_v57  ;;  %v1754_v0 = vsel %vm4744_vm15, %v4599_v40, %v1750_v51  ;;  %v1883_v46 = vpack.c.bf16 %v1877_v45, %v1877_v45 }
 0x1a7   : > { %2353 = vperm.xlu1 %2985, %v1907_v17   ;;  %v1924_v17 = vperm.slane %v1919_v8, %v4497_v58  ;;  %v1744_v13 = vsel %vm4680_vm14, %v1743_v38, %v1739_v55  ;;  %v5136_v39 = vunpack.c.l.bf16 %v5108_v1  ;;  %v1773_v11 = vor.u32 1.1754944e-38, %v1772_v3 }
 0x1a8   : > { %2362 = vperm.xlu0 %2986, %v1908_v28   ;;  %v1800_v28 = vld [vmem:[%s4977_s2 + $0xc0] sm:$0xff]  ;;  %v2425_v30 = vadd.f32 %v4552_v20, %v2381_v59  ;;  %v2163_v43 = vpack.c.bf16 %v2141_v42, %v2141_v42  ;;  %v1801_v20 = vld [vmem:[%s4977_s2 + $0xc8] sm:$0xff]  ;;  %v5137_v62 = vunpack.c.l.bf16 %v5126_v49  ;;  %v1759_v45 = vsel %vm4748_vm8, %v1758_v32, %v1754_v0  ;;  %v1826_v0 = vld [vmem:[%s4978_s3 + $0xb0] sm:$0xff] }
 0x1a9   : > { %v2114_v12 = vunpack.c.l.bf16 %v1924_v17  ;;  %v1878_v26 = vmul.f32 %v1800_v28, %v1729_v25  ;;  %v1769_v1 = vsel %vm4772_vm10, %v4588_v6, %v1765_v47  ;;  %vm1771_vm11 = vcmp.eq.f32.partialorder %v1770_v4, 8.507059e+37  ;;  %v1955_v49 = vpop.permute.xlu1 %1954 }
 0x1aa   : > { %v2491_v40 = vmax.f32 %v2425_v30, 0.0  ;;  %v2383_v2 = vunpack.c.l.bf16 %v2163_v43  ;;  %v2402_v48 = vunpack.c.l.bf16 %v2206_v35  ;;  %v1879_v34 = vmul.f32 %v1801_v20, %v1744_v13  ;;  %v1827_v30 = vld [vmem:[%s4978_s3 + $0xb8] sm:$0xff]  ;;  %v1828_v13 = vld [vmem:[%s4978_s3 + $0xc0] sm:$0xff] }
 0x1ab   : > { %2371 = vperm.xlu2 %2984, %v1909_v33   ;;  %v2116_v33 = vunpack.c.l.bf16 %v1942_v50  ;;  %v2136_v52 = vmul.f32 %v5136_v39, %v2114_v12  ;;  %v1884_v61 = vpack.c.bf16 %v1878_v26, %v1878_v26  ;;  %v1960_v55 = vperm.slane %v1955_v49, %v4497_v58 }
 0x1ac   : > { %v2513_v5 = vpack.c.bf16 %v2491_v40, %v2491_v40  ;;  %v2427_v15 = vadd.f32 %v4678_v54, %v2383_v2  ;;  %v1880_v23 = vmul.f32 %v1802_v37, %v1759_v45  ;;  %v1774_v6 = vsel %vm1771_vm11, %v1773_v11, %v1769_v1 }
 0x1ad   : > { %v2138_v24 = vmul.f32 %v5137_v62, %v2116_v33  ;;  %v2158_v38 = vpack.c.bf16 %v2136_v52, %v2136_v52  ;;  %v2118_v16 = vunpack.c.l.bf16 %v1960_v55  ;;  %v2224_v57 = vperm.slane %v4502_v14, %v4497_v58  ;;  %v5139_v14 = vld [vmem:[#allocation12_spill] sm:$0xff] }
 0x1ae   : > { %2535 = vst.msk [vmem:[%s4658_s7 + $0xc] sm:$0xf] %vm459_vm1, %v2513_v5  ;;  %v2493_v35 = vmax.f32 %v2427_v15, 0.0  ;;  %v1881_v25 = vmul.f32 %v1803_v21, %v1774_v6  ;;  %v5138_v17 = vunpack.c.l.bf16 %v5132_v41  ;;  %v1885_v59 = vpack.c.bf16 %v1879_v34, %v1879_v34  ;;  %v1829_v34 = vld [vmem:[%s4978_s3 + $0xc8] sm:$0xff] }
 0x1af   : > { %2562 = vperm.xlu1 %2985, %v1882_v36   ;;  %v2160_v7 = vpack.c.bf16 %v2138_v24, %v2138_v24  ;;  %v2378_v22 = vunpack.c.l.bf16 %v2158_v38  ;;  %v1886_v3 = vpack.c.bf16 %v1880_v23, %v1880_v23  ;;  %v2251_v18 = vperm.slane %v4559_v29, %v4497_v58  ;;  %v5142_v23 = vld [vmem:[#allocation11_spill] sm:$0xff] }
 0x1b0   : > { %2571 = vperm.xlu0 %2986, %v1883_v46   ;;  %v2515_v8 = vpack.c.bf16 %v2493_v35, %v2493_v35  ;;  %v2140_v28 = vmul.f32 %v5138_v17, %v2118_v16  ;;  %v5140_v50 = vunpack.c.h.bf16 %v5139_v14  ;;  %v2404_v4 = vunpack.c.l.bf16 %v2224_v57  ;;  %v1831_v16 = vld [vmem:[%s4978_s3 + $0xd8] sm:$0xf]  ;;  %v5144_v17 = vld [vmem:[#allocation13_spill] sm:$0xff] }
 0x1b1   : > { %v2380_v63 = vunpack.c.l.bf16 %v2160_v7  ;;  %v2422_v54 = vadd.f32 %v4542_v56, %v2378_v22  ;;  %v1887_v29 = vpack.c.bf16 %v1881_v25, %v1881_v25  ;;  %v2407_v46 = vunpack.c.l.bf16 %v2251_v18 }
 0x1b2   : > { %v1982_v36 = vpop.permute.xlu2 %1981  ;;  %2537 = vst.msk [vmem:[%s4658_s7 + $0x14] sm:$0xf] %vm459_vm1, %v2515_v8  ;;  %v2162_v47 = vpack.c.bf16 %v2140_v28, %v2140_v28  ;;  %v2242_v20 = vperm.slane %v4447_v44, %v4497_v58  ;;  %v1910_v40 = vpack.c.bf16 %v1826_v0, %v1826_v0  ;;  %v1911_v11 = vpack.c.bf16 %v1827_v30, %v1827_v30 }
 0x1b3   : > { %2580 = vperm.xlu2 %2984, %v1884_v61   ;;  %v1987_v51 = vperm.slane %v1982_v36, %v4497_v58  ;;  %v2424_v10 = vadd.f32 %v2402_v48, %v2380_v63  ;;  %v2488_v19 = vmax.f32 %v2422_v54, 0.0  ;;  %v5141_v45 = vunpack.c.l.bf16 %v5139_v14  ;;  %v1830_v61 = vld [vmem:[%s4978_s3 + $0xd0] sm:$0xff] }
 0x1b4   : > { %v2382_v43 = vunpack.c.l.bf16 %v2162_v47  ;;  %v1912_v38 = vpack.c.bf16 %v1828_v13, %v1828_v13  ;;  %v2406_v49 = vunpack.c.l.bf16 %v2242_v20  ;;  %v2269_v44 = vperm.slane %v4480_v31, %v4497_v58 }
 0x1b5   : > { %v2121_v60 = vunpack.c.l.bf16 %v1987_v51  ;;  %v2490_v56 = vmax.f32 %v2424_v10, 0.0  ;;  %v2510_v42 = vpack.c.bf16 %v2488_v19, %v2488_v19  ;;  %v5143_v6 = vunpack.c.h.bf16 %v5142_v23 }
 0x1b6   : > { %v2426_v39 = vadd.f32 %v2404_v4, %v2382_v43  ;;  %v1913_v54 = vpack.c.bf16 %v1829_v34, %v1829_v34  ;;  %v1914_v51 = vpack.c.bf16 %v1830_v61, %v1830_v61  ;;  %v2409_v57 = vunpack.c.l.bf16 %v2269_v44  ;;  %v5149_v61 = vld [vmem:[#allocation14_spill] sm:$0xff] }
 0x1b7   : > { %v2143_v32 = vmul.f32 %v5140_v50, %v2121_v60  ;;  %2589 = vperm.xlu1 %2985, %v1885_v59   ;;  %v2512_v41 = vpack.c.bf16 %v2490_v56, %v2490_v56  ;;  %2532 = vst.msk [vmem:[%s4658_s7] sm:$0xf] %vm459_vm1, %v2510_v42  ;;  %v2278_v19 = vperm.slane %v4660_v27, %v4497_v58  ;;  %v5145_v28 = vunpack.c.l.bf16 %v5144_v17 }
 0x1b8   : > { %2598 = vperm.xlu0 %2986, %v1886_v3   ;;  %v1973_v12 = vpop.permute.xlu1 %1972  ;;  %v2492_v24 = vmax.f32 %v2426_v39, 0.0  ;;  %v1915_v60 = vpack.c.bf16 %v1831_v16, %v1831_v16  ;;  %vm2739_vm3 = vcmask 25600  }
 0x1b9   : > { %v2165_v53 = vpack.c.bf16 %v2143_v32, %v2143_v32  ;;  %v1978_v33 = vperm.slane %v1973_v12, %v4497_v58  ;;  %2534 = vst.msk [vmem:[%s4658_s7 + $0x8] sm:$0xf] %vm459_vm1, %v2512_v41  ;;  %v2410_v14 = vunpack.c.l.bf16 %v2278_v19 }
 0x1ba   : > { %v2514_v5 = vpack.c.bf16 %v2492_v24, %v2492_v24 }
 0x1bb   : > { %2607 = vperm.xlu2 %2984, %v1887_v29   ;;  %v2385_v26 = vunpack.c.l.bf16 %v2165_v53  ;;  %v2120_v52 = vunpack.c.l.bf16 %v1978_v33  ;;  %v2260_v29 = vperm.slane %v4669_v9, %v4497_v58  ;;  %v5146_v53 = vunpack.c.l.bf16 %v5142_v23 }
 0x1bc   : > { %2536 = vst.msk [vmem:[%s4658_s7 + $0x10] sm:$0xf] %vm459_vm1, %v2514_v5 }
 0x1bd   : > { %v2000_v2 = vpop.permute.xlu0 %1999  ;;  %v2429_v62 = vadd.f32 %v2407_v46, %v2385_v26  ;;  %v2142_v37 = vmul.f32 %v5141_v45, %v2120_v52  ;;  %v2408_v46 = vunpack.c.l.bf16 %v2260_v29  ;;  %v5147_v45 = vld [vmem:[#allocation15_spill] sm:$0xff] }
 0x1be   : > { %v2005_v1 = vperm.slane %v2000_v2, %v4497_v58 }
 0x1bf   : > { %v2495_v48 = vmax.f32 %v2429_v62, 0.0  ;;  %v2164_v15 = vpack.c.bf16 %v2142_v37, %v2142_v37  ;;  %2640 = vperm.xlu1 %2985, %v1910_v40   ;;  %v5148_v37 = vunpack.c.l.bf16 %v5147_v45 }
 0x1c0   : > { %v2123_v7 = vunpack.c.l.bf16 %v2005_v1  ;;  %2649 = vperm.xlu0 %2986, %v1911_v11  }
 0x1c1   : > { %v2517_v22 = vpack.c.bf16 %v2495_v48, %v2495_v48  ;;  %v2384_v55 = vunpack.c.l.bf16 %v2164_v15 }
 0x1c2   : > { %v2145_v21 = vmul.f32 %v5143_v6, %v2123_v7  ;;  %v2009_v35 = vpop.permute.xlu2 %2008 }
 0x1c3   : > { %2658 = vperm.xlu2 %2984, %v1912_v38   ;;  %2539 = vst.msk [vmem:[%s4658_s7 + $0x1c] sm:$0xf] %vm459_vm1, %v2517_v22  ;;  %v2014_v31 = vperm.slane %v2009_v35, %v4497_v58  ;;  %v2428_v36 = vadd.f32 %v2406_v49, %v2384_v55  ;;  %v5150_v22 = vunpack.c.h.bf16 %v5149_v61 }
 0x1c4   : > { %v2167_v63 = vpack.c.bf16 %v2145_v21, %v2145_v21 }
 0x1c5   : > { %v2124_v8 = vunpack.c.l.bf16 %v2014_v31  ;;  %v2494_v10 = vmax.f32 %v2428_v36, 0.0 }
 0x1c6   : > { %v2387_v25 = vunpack.c.l.bf16 %v2167_v63 }
 0x1c7   : > { %v2146_v59 = vmul.f32 %v5145_v28, %v2124_v8  ;;  %v2516_v3 = vpack.c.bf16 %v2494_v10, %v2494_v10  ;;  %2667 = vperm.xlu1 %2985, %v1913_v54   ;;  %v5151_v8 = vld [vmem:[#allocation18_spill] sm:$0xff] }
 0x1c8   : > { %v2431_v56 = vadd.f32 %v2409_v57, %v2387_v25  ;;  %2676 = vperm.xlu0 %2986, %v1914_v51   ;;  %v5152_v10 = vunpack.c.l.bf16 %v5151_v8 }
 0x1c9   : > { %v2168_v18 = vpack.c.bf16 %v2146_v59, %v2146_v59  ;;  %2538 = vst.msk [vmem:[%s4658_s7 + $0x18] sm:$0xf] %vm459_vm1, %v2516_v3 }
 0x1ca   : > { %v2497_v42 = vmax.f32 %v2431_v56, 0.0 }
 0x1cb   : > { %2685 = vperm.xlu2 %2984, %v1915_v60   ;;  %v2388_v50 = vunpack.c.l.bf16 %v2168_v18 }
 0x1cc   : > { %v2519_v32 = vpack.c.bf16 %v2497_v42, %v2497_v42 }
 0x1cd   : > { %v2432_v47 = vadd.f32 %v2410_v14, %v2388_v50 }
 0x1ce   : > { %2541 = vst.msk [vmem:[%s4658_s7 + $0x24] sm:$0xf] %vm459_vm1, %v2519_v32  ;;  %v5153_v32 = vunpack.c.h.bf16 %v5144_v17  ;;  %v5156_v17 = vunpack.c.h.bf16 %v5147_v45 }
 0x1cf   : > { %v2498_v27 = vmax.f32 %v2432_v47, 0.0  ;;  %v2036_v0 = vpop.permute.xlu2 %2035 }
 0x1d0   : > { %v1991_v4 = vpop.permute.xlu1 %1990  ;;  %v2041_v56 = vperm.slane %v2036_v0, %v4497_v58  ;;  %v5154_v0 = vld [vmem:[#allocation17_spill] sm:$0xff] }
 0x1d1   : > { %v1996_v41 = vperm.slane %v1991_v4, %v4497_v58  ;;  %v2520_v12 = vpack.c.bf16 %v2498_v27, %v2498_v27 }
 0x1d3   : > { %v2122_v30 = vunpack.c.l.bf16 %v1996_v41  ;;  %2542 = vst.msk [vmem:[%s4658_s7 + $0x28] sm:$0xf] %vm459_vm1, %v2520_v12  ;;  %v2027_v52 = vpop.permute.xlu0 %2026 }
 0x1d4   : > { %v2032_v11 = vperm.slane %v2027_v52, %v4497_v58 }
 0x1d5   : > { %v2144_v43 = vmul.f32 %v5146_v53, %v2122_v30  ;;  %v2127_v30 = vunpack.c.l.bf16 %v2041_v56 }
 0x1d6   : > { %v2126_v2 = vunpack.c.l.bf16 %v2032_v11 }
 0x1d7   : > { %v2166_v33 = vpack.c.bf16 %v2144_v43, %v2144_v43  ;;  %v5155_v43 = vunpack.c.h.bf16 %v5154_v0 }
 0x1d8   : > { %v2148_v1 = vmul.f32 %v5148_v37, %v2126_v2 }
 0x1d9   : > { %v2386_v13 = vunpack.c.l.bf16 %v2166_v33 }
 0x1da   : > { %v4867_v39 = vpop.permute.xlu2 %2062  ;;  %v2170_v48 = vpack.c.bf16 %v2148_v1, %v2148_v1 }
 0x1db   : > { %v2430_v26 = vadd.f32 %v2408_v46, %v2386_v13  ;;  %v2068_v2 = vperm.slane %v4867_v39, %v4497_v58 }
 0x1dc   : > { %v2390_v34 = vunpack.c.l.bf16 %v2170_v48 }
 0x1dd   : > { %v2496_v20 = vmax.f32 %v2430_v26, 0.0 }
 0x1df   : > { %v2518_v40 = vpack.c.bf16 %v2496_v20, %v2496_v20 }
 0x1e0   : > { %v2018_v62 = vpop.permute.xlu1 %2017 }
 0x1e1   : > { %2540 = vst.msk [vmem:[%s4658_s7 + $0x20] sm:$0xf] %vm459_vm1, %v2518_v40  ;;  %v2023_v63 = vperm.slane %v2018_v62, %v4497_v58  ;;  %v2149_v40 = vmul.f32 %v5156_v17, %v2127_v30  ;;  %v5157_v62 = vunpack.c.l.bf16 %v5149_v61  ;;  %v4923_v30 = vld [vmem:[%s3323_s14 + $0x8] sm:$0xff]  }
 0x1e2   : > { %v2054_v9 = vpop.permute.xlu0 %2053  ;;  %v2936_v17 = vunpack.c.l.bf16 %v4923_v30 }
 0x1e3   : > { %v2059_v38 = vperm.slane %v2054_v9, %v4497_v58  ;;  %v2125_v28 = vunpack.c.l.bf16 %v2023_v63 }
 0x1e5   : > { %v4872_v24 = vpop.permute.xlu2 %2089  ;;  %v2129_v5 = vunpack.c.l.bf16 %v2059_v38  ;;  %v2147_v47 = vmul.f32 %v5153_v32, %v2125_v28 }
 0x1e7   : > { %v2151_v55 = vmul.f32 %v5150_v22, %v2129_v5  ;;  %v2169_v13 = vpack.c.bf16 %v2147_v47, %v2147_v47 }
 0x1e9   : > { %v2173_v35 = vpack.c.bf16 %v2151_v55, %v2151_v55  ;;  %v2389_v38 = vunpack.c.l.bf16 %v2169_v13 }
 0x1ea   : > { %v2045_v7 = vpop.permute.xlu1 %2044 }
 0x1eb   : > { %v2393_v57 = vunpack.c.l.bf16 %v2173_v35  ;;  %v2050_v42 = vperm.slane %v2045_v7, %v4497_v58 }
 0x1ed   : > { %v2291_v15 = vpop.permute.xlu2 %2290  ;;  %v2128_v29 = vunpack.c.l.bf16 %v2050_v42 }
 0x1ee   : > { %v2296_v49 = vperm.slane %v2291_v15, %v4497_v58  ;;  %v2081_v44 = vpop.permute.xlu0 %2080 }
 0x1ef   : > { %v2086_v6 = vperm.slane %v2081_v44, %v4497_v58  ;;  %v2150_v9 = vmul.f32 %v5157_v62, %v2128_v29 }
 0x1f0   : > { %v2412_v23 = vunpack.c.l.bf16 %v2296_v49  ;;  %v2171_v49 = vpack.c.bf16 %v2149_v40, %v2149_v40 }
 0x1f1   : > { %v2132_v36 = vunpack.c.l.bf16 %v2086_v6  ;;  %v2172_v22 = vpack.c.bf16 %v2150_v9, %v2150_v9 }
 0x1f2   : > { %v2434_v21 = vadd.f32 %v2412_v23, %v2390_v34  ;;  %v2130_v34 = vunpack.c.l.bf16 %v2068_v2  ;;  %v5162_v2 = vunpack.c.l.bf16 %v5154_v0 }
 0x1f3   : > { %v2154_v25 = vmul.f32 %v5152_v10, %v2132_v36  ;;  %v2095_v10 = vperm.slane %v4872_v24, %v4497_v58 }
 0x1f4   : > { %v2500_v31 = vmax.f32 %v2434_v21, 0.0 }
 0x1f5   : > { %v2318_v54 = vpop.permute.xlu2 %2317  ;;  %v2072_v60 = vpop.permute.xlu1 %2071  ;;  %v2176_v14 = vpack.c.bf16 %v2154_v25, %v2154_v25  ;;  %v2392_v25 = vunpack.c.l.bf16 %v2172_v22  ;;  %v2133_v47 = vunpack.c.l.bf16 %v2095_v10 }
 0x1f6   : > { %v2522_v51 = vpack.c.bf16 %v2500_v31, %v2500_v31  ;;  %v2323_v16 = vperm.slane %v2318_v54, %v4497_v58  ;;  %v2077_v48 = vperm.slane %v2072_v60, %v4497_v58  ;;  %v2391_v31 = vunpack.c.l.bf16 %v2171_v49 }
 0x1f7   : > { %v2396_v53 = vunpack.c.l.bf16 %v2176_v14 }
 0x1f8   : > { %2544 = vst.msk [vmem:[%s4658_s7 + $0x30] sm:$0xf] %vm459_vm1, %v2522_v51  ;;  %v2415_v19 = vunpack.c.l.bf16 %v2323_v16  ;;  %v2131_v61 = vunpack.c.l.bf16 %v2077_v48  ;;  %v5158_v51 = vld [vmem:[#allocation16_spill] sm:$0xff] }
 0x1f9   : > { %v5159_v16 = vunpack.c.l.bf16 %v5158_v51  ;;  %v5160_v60 = vunpack.c.h.bf16 %v5158_v51 }
 0x1fa   : > { %v2437_v59 = vadd.f32 %v2415_v19, %v2393_v57  ;;  %v2108_v3 = vpop.permute.xlu0 %2107 }
 0x1fb   : > { %v2113_v18 = vperm.slane %v2108_v3, %v4497_v58  ;;  %v2152_v57 = vmul.f32 %v5159_v16, %v2130_v34  ;;  %v2153_v28 = vmul.f32 %v5160_v60, %v2131_v61 }
 0x1fc   : > { %v2503_v50 = vmax.f32 %v2437_v59, 0.0 }
 0x1fd   : > { %v2135_v27 = vunpack.c.l.bf16 %v2113_v18  ;;  %v2345_v4 = vpop.permute.xlu2 %2344  ;;  %v2174_v32 = vpack.c.bf16 %v2152_v57, %v2152_v57 }
 0x1fe   : > { %v2525_v41 = vpack.c.bf16 %v2503_v50, %v2503_v50  ;;  %v2350_v12 = vperm.slane %v2345_v4, %v4497_v58 }
 0x1ff   : > { %v2157_v33 = vmul.f32 %v5155_v43, %v2135_v27  ;;  %v2175_v27 = vpack.c.bf16 %v2153_v28, %v2153_v28 }
 0x200   : > { %2547 = vst.msk [vmem:[%s4658_s7 + $0x3c] sm:$0xf] %vm459_vm1, %v2525_v41  ;;  %v2418_v46 = vunpack.c.l.bf16 %v2350_v12 }
 0x201   : > { %v2099_v52 = vpop.permute.xlu1 %2098  ;;  %v2179_v37 = vpack.c.bf16 %v2157_v33, %v2157_v33 }
 0x202   : > { %v2440_v26 = vadd.f32 %v2418_v46, %v2396_v53  ;;  %v2282_v20 = vpop.permute.xlu0 %2281  ;;  %v2104_v59 = vperm.slane %v2099_v52, %v4497_v58  ;;  %v5161_v52 = vunpack.c.h.bf16 %v5151_v8 }
 0x203   : > { %v2287_v11 = vperm.slane %v2282_v20, %v4497_v58  ;;  %v2399_v55 = vunpack.c.l.bf16 %v2179_v37 }
 0x204   : > { %v2506_v1 = vmax.f32 %v2440_v26, 0.0  ;;  %v2134_v4 = vunpack.c.l.bf16 %v2104_v59  ;;  %v2394_v26 = vunpack.c.l.bf16 %v2174_v32  ;;  %v2155_v20 = vmul.f32 %v5161_v52, %v2133_v47 }
 0x205   : > { %v2411_v5 = vunpack.c.l.bf16 %v2287_v11  ;;  %v2372_v15 = vpop.permute.xlu2 %2371  ;;  %v2395_v11 = vunpack.c.l.bf16 %v2175_v27 }
 0x206   : > { %v2528_v7 = vpack.c.bf16 %v2506_v1, %v2506_v1  ;;  %v2377_v45 = vperm.slane %v2372_v15, %v4497_v58  ;;  %v2156_v62 = vmul.f32 %v5162_v2, %v2134_v4  ;;  %v2177_v15 = vpack.c.bf16 %v2155_v20, %v2155_v20 }
 0x207   : > { %v2433_v44 = vadd.f32 %v2411_v5, %v2389_v38 }
 0x208   : > { %2550 = vst.msk [vmem:[%s4658_s7 + $0x48] sm:$0xf] %vm459_vm1, %v2528_v7  ;;  %v2421_v39 = vunpack.c.l.bf16 %v2377_v45  ;;  %v2178_v7 = vpack.c.bf16 %v2156_v62, %v2156_v62 }
 0x209   : > { %v2499_v23 = vmax.f32 %v2433_v44, 0.0  ;;  %v2300_v21 = vpop.permute.xlu1 %2299  ;;  %v2559_v44 = vld [vmem:[%s3323_s14 + $0x14] sm:$0x3] }
 0x20a   : > { %v2443_v6 = vadd.f32 %v2421_v39, %v2399_v55  ;;  %v2309_v35 = vpop.permute.xlu0 %2308  ;;  %v2305_v63 = vperm.slane %v2300_v21, %v4497_v58 }
 0x20b   : > { %v2521_v36 = vpack.c.bf16 %v2499_v23, %v2499_v23  ;;  %v2314_v54 = vperm.slane %v2309_v35, %v4497_v58  ;;  %v2397_v35 = vunpack.c.l.bf16 %v2177_v15 }
 0x20c   : > { %v2509_v19 = vmax.f32 %v2443_v6, 0.0  ;;  %v2413_v3 = vunpack.c.l.bf16 %v2305_v63  ;;  %v2619_v6 = vunpack.c.l.bf16 %v2559_v44 }
 0x20d   : > { %2543 = vst.msk [vmem:[%s4658_s7 + $0x2c] sm:$0xf] %vm459_vm1, %v2521_v36  ;;  %v2414_v56 = vunpack.c.l.bf16 %v2314_v54  ;;  %v2581_v18 = vpop.permute.xlu2 %2580 }
 0x20e   : > { %v2531_v42 = vpack.c.bf16 %v2509_v19, %v2509_v19  ;;  %v2435_v14 = vadd.f32 %v2413_v3, %v2391_v31  ;;  %v2586_v24 = vperm.slane %v2581_v18, %v4497_v58  ;;  %v2398_v31 = vunpack.c.l.bf16 %v2178_v7 }
 0x20f   : > { %v2436_v50 = vadd.f32 %v2414_v56, %v2392_v25 }
 0x210   : > { %2553 = vst.msk [vmem:[%s4658_s7 + $0x54] sm:$0xf] %vm459_vm1, %v2531_v42  ;;  %v2501_v41 = vmax.f32 %v2435_v14, 0.0  ;;  %v2622_v40 = vunpack.c.l.bf16 %v2586_v24 }
 0x211   : > { %v2502_v12 = vmax.f32 %v2436_v50, 0.0  ;;  %v2327_v29 = vpop.permute.xlu1 %2326  ;;  %v2931_v50 = vld [vmem:[%s3323_s14] sm:$0xff]  }
 0x212   : > { %v2336_v53 = vpop.permute.xlu0 %2335  ;;  %v2523_v43 = vpack.c.bf16 %v2501_v41, %v2501_v41  ;;  %v2332_v46 = vperm.slane %v2327_v29, %v4497_v58  ;;  %v2628_v5 = vmul.f32 %v2936_v17, %v2622_v40  ;;  %v2933_v29 = vunpack.c.h.bf16 %v2931_v50 }
 0x213   : > { %v2524_v33 = vpack.c.bf16 %v2502_v12, %v2502_v12  ;;  %v2341_v13 = vperm.slane %v2336_v53, %v4497_v58  ;;  %v2932_v12 = vunpack.c.l.bf16 %v2931_v50 }
 0x214   : > { %2545 = vst.msk [vmem:[%s4658_s7 + $0x34] sm:$0xf] %vm459_vm1, %v2523_v43  ;;  %v2416_v9 = vunpack.c.l.bf16 %v2332_v46  ;;  %v2634_v23 = vpack.c.bf16 %v2628_v5, %v2628_v5 }
 0x215   : > { %v2417_v37 = vunpack.c.l.bf16 %v2341_v13  ;;  %v2608_v1 = vpop.permute.xlu2 %2607  ;;  %2546 = vst.msk [vmem:[%s4658_s7 + $0x38] sm:$0xf] %vm459_vm1, %v2524_v33 }
 0x216   : > { %v2438_v38 = vadd.f32 %v2416_v9, %v2394_v26  ;;  %v2613_v8 = vperm.slane %v2608_v1, %v4497_v58  ;;  %v2694_v10 = vunpack.c.l.bf16 %v2634_v23  ;;  %v2558_v9 = vld [vmem:[%s3323_s14 + $0x10] sm:$0xf] }
 0x217   : > { %v2439_v48 = vadd.f32 %v2417_v37, %v2395_v11  ;;  %v2618_v5 = vunpack.c.l.bf16 %v2558_v9 }
 0x218   : > { %v2504_v45 = vmax.f32 %v2438_v38, 0.0  ;;  %v2625_v21 = vunpack.c.l.bf16 %v2613_v8  ;;  %v2937_v38 = vunpack.c.h.bf16 %v4923_v30 }
 0x219   : > { %v2505_v49 = vmax.f32 %v2439_v48, 0.0  ;;  %v2354_v0 = vpop.permute.xlu1 %2353 }
 0x21a   : > { %v2363_v34 = vpop.permute.xlu0 %2362  ;;  %v2526_v22 = vpack.c.bf16 %v2504_v45, %v2504_v45  ;;  %v2359_v39 = vperm.slane %v2354_v0, %v4497_v58  ;;  %v2631_v25 = vmul.f32 %v2625_v21, %v2619_v6 }
 0x21b   : > { %v2527_v55 = vpack.c.bf16 %v2505_v49, %v2505_v49  ;;  %v2368_v61 = vperm.slane %v2363_v34, %v4497_v58 }
 0x21c   : > { %2548 = vst.msk [vmem:[%s4658_s7 + $0x40] sm:$0xf] %vm459_vm1, %v2526_v22  ;;  %v2419_v36 = vunpack.c.l.bf16 %v2359_v39  ;;  %v2637_v14 = vpack.c.bf16 %v2631_v25, %v2631_v25 }
 0x21d   : > { %v2420_v63 = vunpack.c.l.bf16 %v2368_v61  ;;  %v2659_v54 = vpop.permute.xlu2 %2658  ;;  %2549 = vst.msk [vmem:[%s4658_s7 + $0x44] sm:$0xf] %vm459_vm1, %v2527_v55 }
 0x21e   : > { %v2664_v51 = vperm.slane %v2659_v54, %v4497_v58  ;;  %v2441_v16 = vadd.f32 %v2419_v36, %v2397_v35  ;;  %v2697_v53 = vunpack.c.l.bf16 %v2637_v14 }
 0x21f   : > { %v2442_v57 = vadd.f32 %v2420_v63, %v2398_v31 }
 0x220   : > { %v2700_v19 = vunpack.c.l.bf16 %v2664_v51  ;;  %v2507_v60 = vmax.f32 %v2441_v16, 0.0 }
 0x221   : > { %v2508_v28 = vmax.f32 %v2442_v57, 0.0  ;;  %v2563_v59 = vpop.permute.xlu1 %2562 }
 0x222   : > { %v2706_v3 = vadd.f32 %v2700_v19, %v2694_v10  ;;  %v2572_v56 = vpop.permute.xlu0 %2571  ;;  %v2529_v18 = vpack.c.bf16 %v2507_v60, %v2507_v60  ;;  %v2568_v32 = vperm.slane %v2563_v59, %v4497_v58 }
 0x223   : > { %v2530_v42 = vpack.c.bf16 %v2508_v28, %v2508_v28  ;;  %v2577_v24 = vperm.slane %v2572_v56, %v4497_v58 }
 0x224   : > { %v2724_v47 = vmax.f32 %v2706_v3, 0.0  ;;  %2551 = vst.msk [vmem:[%s4658_s7 + $0x4c] sm:$0xf] %vm459_vm1, %v2529_v18  ;;  %v2620_v43 = vunpack.c.l.bf16 %v2568_v32 }
 0x225   : > { %v2686_v27 = vpop.permute.xlu2 %2685  ;;  %2552 = vst.msk [vmem:[%s4658_s7 + $0x50] sm:$0xf] %vm459_vm1, %v2530_v42  ;;  %v2621_v33 = vunpack.c.l.bf16 %v2577_v24 }
 0x226   : > { %v2730_v4 = vpack.c.bf16 %v2724_v47, %v2724_v47  ;;  %v2691_v41 = vperm.slane %v2686_v27, %v4497_v58  ;;  %v2626_v20 = vmul.f32 %v2932_v12, %v2620_v43 }
 0x227   : > { %v2627_v17 = vmul.f32 %v2933_v29, %v2621_v33 }
 0x228   : > { %2736 = vst.msk [vmem:[%s4658_s7 + $0x60] sm:$0xf] %vm459_vm1, %v2730_v4  ;;  %v2703_v46 = vunpack.c.l.bf16 %v2691_v41  ;;  %v2632_v37 = vpack.c.bf16 %v2626_v20, %v2626_v20 }
 0x229   : > { %v2590_v13 = vpop.permute.xlu1 %2589  ;;  %v2633_v1 = vpack.c.bf16 %v2627_v17, %v2627_v17 }
 0x22a   : > { %v2709_v26 = vadd.f32 %v2703_v46, %v2697_v53  ;;  %v2599_v52 = vpop.permute.xlu0 %2598  ;;  %v2595_v11 = vperm.slane %v2590_v13, %v4497_v58  ;;  %v2692_v44 = vunpack.c.l.bf16 %v2632_v37 }
 0x22b   : > { %v2604_v2 = vperm.slane %v2599_v52, %v4497_v58  ;;  %v2693_v0 = vunpack.c.l.bf16 %v2633_v1 }
 0x22c   : > { %v2727_v40 = vmax.f32 %v2709_v26, 0.0  ;;  %v2623_v48 = vunpack.c.l.bf16 %v2595_v11 }
 0x22d   : > { %v2624_v8 = vunpack.c.l.bf16 %v2604_v2 }
 0x22e   : > { %v2733_v62 = vpack.c.bf16 %v2727_v40, %v2727_v40  ;;  %v2629_v34 = vmul.f32 %v2937_v38, %v2623_v48 }
 0x22f   : > { %v2630_v22 = vmul.f32 %v2624_v8, %v2618_v5 }
 0x230   : > { %2740 = vst.msk [vmem:[%s4658_s7 + $0x6c] sm:$0x3] %vm2739_vm3, %v2733_v62  ;;  %v2635_v30 = vpack.c.bf16 %v2629_v34, %v2629_v34 }
 0x231   : > { %v2641_v15 = vpop.permute.xlu1 %2640  ;;  %v2636_v6 = vpack.c.bf16 %v2630_v22, %v2630_v22 }
 0x232   : > { %v2650_v7 = vpop.permute.xlu0 %2649  ;;  %v2646_v45 = vperm.slane %v2641_v15, %v4497_v58  ;;  %v2695_v57 = vunpack.c.l.bf16 %v2635_v30 }
 0x233   : > { %v2655_v49 = vperm.slane %v2650_v7, %v4497_v58  ;;  %v2696_v10 = vunpack.c.l.bf16 %v2636_v6 }
 0x234   : > { %v2698_v55 = vunpack.c.l.bf16 %v2646_v45 }
 0x235   : > { %v2699_v39 = vunpack.c.l.bf16 %v2655_v49 }
 0x236   : > { %v2704_v61 = vadd.f32 %v2698_v55, %v2692_v44 }
 0x237   : > { %v2705_v23 = vadd.f32 %v2699_v39, %v2693_v0 }
 0x238   : > { %v2722_v21 = vmax.f32 %v2704_v61, 0.0 }
 0x239   : > { %v2723_v35 = vmax.f32 %v2705_v23, 0.0  ;;  %v2668_v31 = vpop.permute.xlu1 %2667 }
 0x23a   : > { %v2677_v36 = vpop.permute.xlu0 %2676  ;;  %v2728_v63 = vpack.c.bf16 %v2722_v21, %v2722_v21  ;;  %v2673_v51 = vperm.slane %v2668_v31, %v4497_v58 }
 0x23b   : > { %v2729_v54 = vpack.c.bf16 %v2723_v35, %v2723_v35  ;;  %v2682_v16 = vperm.slane %v2677_v36, %v4497_v58 }
 0x23c   : > { %2734 = vst.msk [vmem:[%s4658_s7 + $0x58] sm:$0xf] %vm459_vm1, %v2728_v63  ;;  %v2701_v25 = vunpack.c.l.bf16 %v2673_v51 }
 0x23d   : > { %v2702_v19 = vunpack.c.l.bf16 %v2682_v16  ;;  %2735 = vst.msk [vmem:[%s4658_s7 + $0x5c] sm:$0xf] %vm459_vm1, %v2729_v54 }
 0x23e   : > { %v2707_v60 = vadd.f32 %v2701_v25, %v2695_v57 }
 0x23f   : > { %v2708_v28 = vadd.f32 %v2702_v19, %v2696_v10 }
 0x240   : > { %v2725_v59 = vmax.f32 %v2707_v60, 0.0 }
 0x241   : > { %v2726_v3 = vmax.f32 %v2708_v28, 0.0 }
 0x242   : > { %v2731_v56 = vpack.c.bf16 %v2725_v59, %v2725_v59 }
 0x243   : > { %v2732_v18 = vpack.c.bf16 %v2726_v3, %v2726_v3 }
 0x244   : > { %2737 = vst.msk [vmem:[%s4658_s7 + $0x64] sm:$0xf] %vm459_vm1, %v2731_v56 }
 0x245   : > { %2738 = vst.msk [vmem:[%s4658_s7 + $0x68] sm:$0xf] %vm459_vm1, %v2732_v18 }
 0x246 PF: > { %s18_s21 = sadd.s32 1, %s3143_s21  }
 0x247   : > { %p15_p7 = scmp.ge.s32.totalorder %s18_s21, 4  }
 0x249   :  { %17 = sbr.rel (!%p15_p7) target bundleno = 2 (0x2), region = 86 }
 0x24e   :  { %2762 = vsyncpa [#allocation3], 1 }
 0x24f   :  { %2764 = vsyncpa [#allocation3 + $0x1], 1 }
 0x250   :  { %2765 = vsyncpa [#allocation5], 1 }

</bundles_post_ra>
